<compile_context>
chip_gen: v7x
topology: tpu7x:2x2x1
jax: 0.10.0
libtpu: 0.0.40
codegen_flags: <defaults>
</compile_context>

<pallas_src>
import jax
import jax.numpy as jnp
from jax.experimental import pallas as pl
from jax.experimental.pallas import tpu as pltpu

EPS = 1e-5
LANE = 128


# ------------------------------ small helpers ------------------------------ #
def _round_up(n, m):
  return ((n + m - 1) // m) * m


def _pad_last(x, c_to):
  c = x.shape[-1]
  if c == c_to:
    return x
  pad = [(0, 0)] * (x.ndim - 1) + [(0, c_to - c)]
  return jnp.pad(x, pad)


def _fold_bn(w, gamma, beta, mean, var):
  """Fold inference BN into conv weights: y = conv(x, w*inv) + (beta - mean*inv)."""
  inv = gamma / jnp.sqrt(var + EPS)          # (Cout,)
  return w * inv, beta - mean * inv


def _space_to_depth(x, s):
  """(B,H,W,C) -> (B,ceil(H/s),ceil(W/s),s*s*C); channel order (py, px, ci)."""
  if s == 1:
    return x
  B, H, W, C = x.shape
  Hs, Ws = _round_up(H, s), _round_up(W, s)
  if (Hs, Ws) != (H, W):
    x = jnp.pad(x, ((0, 0), (0, Hs - H), (0, Ws - W), (0, 0)))
  x = x.reshape(B, Hs // s, s, Ws // s, s, C)
  x = x.transpose(0, 1, 3, 2, 4, 5)
  return x.reshape(B, Hs // s, Ws // s, s * s * C)


def _weights_to_s2d(w, s):
  """(K,K,Cin,Cout) stride-s conv -> (ceil(K/s),)*2 x (s*s*Cin, Cout) stride-1 conv."""
  if s == 1:
    return w
  K, _, Cin, Cout = w.shape
  K2 = -(-K // s)
  w2 = jnp.zeros((K2, K2, s, s, Cin, Cout), w.dtype)
  for dy in range(K):
    for dx in range(K):
      w2 = w2.at[dy // s, dx // s, dy % s, dx % s].set(w[dy, dx])
  return w2.reshape(K2, K2, s * s * Cin, Cout)


def _pick_tile_h(ho, wo):
  """Output-row tile: divisor of Ho, ~<=2048 output pixels per grid step."""
  max_h = max(1, 2048 // max(wo, 1))
  if ho <= max_h:
    return ho
  for th in range(max_h, 0, -1):
    if ho % th == 0:
      return th
  return 1


# ----------------------------- Pallas kernel -------------------------------- #
def _make_conv_kernel(k2, th, wo, cx, cp, *, has_res, has_ds):
  """Implicit-GEMM conv (stride-1, k2 x k2 taps) + bias + residual + PACT clamp.

  Inputs: x (full padded spatial block), w (k2,k2,cx,cp), bias (1,cp),
  alpha (SMEM scalar), then either [xd, wd, bd] (fused 1x1 downsample) or
  [res] (identity residual). Output block: (1, th, wo, cp), lane-dense.
  Note: wo must be a multiple of 8 for the (th,wo)->(th*wo) VMEM reshape.
  """
  m = th * wo

  def kernel(x_ref, w_ref, b_ref, alpha_ref, *rest):
    o_ref = rest[-1]
    t = pl.program_id(1)
    row0 = t * th

    acc = jnp.zeros((m, cp), jnp.float32)
    for dy in range(k2):
      for dx in range(k2):
        lhs = x_ref[0, pl.ds(row0 + dy, th), pl.ds(dx, wo), :]   # (th, wo, cx)
        acc = acc + jnp.dot(lhs.reshape(m, cx), w_ref[dy, dx],
                            preferred_element_type=jnp.float32)
    out = acc + b_ref[...]                                        # folded BN bias

    if has_ds:          # fused 1x1 downsample conv + BN on the residual path
      xd_ref, wd_ref, bd_ref = rest[0], rest[1], rest[2]
      cd = xd_ref.shape[-1]
      xd = xd_ref[0].reshape(m, cd)
      out = out + jnp.dot(xd, wd_ref[...], preferred_element_type=jnp.float32)
      out = out + bd_ref[...]
    elif has_res:       # identity residual (already channel-padded)
      out = out + rest[0][0].reshape(m, cp)

    # PACT: clamp(x, 0, alpha); STE with act_bit=0 is the identity.
    out = jnp.minimum(jnp.maximum(out, 0.0), alpha_ref[0])
    o_ref[0] = out.reshape(th, wo, cp).astype(o_ref.dtype)

  return kernel


def _conv2d_pallas(xs, w4, bias, alpha, *, ho, wo, residual, downsample,
                   out_dtype):
  """Run the implicit-GEMM conv kernel. xs: (B,Hs,Ws,Cx) stride-1-equivalent
  padded input; w4: (K2,K2,Cx,Cp); bias: (1,Cp); alpha: (1,) f32 (SMEM)."""
  B, Hs, Ws, Cx = xs.shape
  K2, _, _, Cp = w4.shape
  th = _pick_tile_h(ho, wo)
  nT = ho // th

  has_ds = downsample is not None
  has_res = residual is not None
  kernel = _make_conv_kernel(K2, th, wo, Cx, Cp, has_res=has_res, has_ds=has_ds)

  in_specs = [
      # full padded spatial block per batch element (re-used across row tiles)
      pl.BlockSpec((1, Hs, Ws, Cx), lambda b, t: (b, 0, 0, 0)),
      pl.BlockSpec((K2, K2, Cx, Cp), lambda b, t: (0, 0, 0, 0)),
      pl.BlockSpec((1, Cp), lambda b, t: (0, 0)),
      pl.BlockSpec(memory_space=pltpu.MemorySpace.SMEM),          # alpha scalar
  ]
  inputs = [xs, w4, bias, alpha]

  if has_ds:
    xd, wd, bd = downsample
    Cd = xd.shape[-1]
    in_specs += [
        pl.BlockSpec((1, th, wo, Cd), lambda b, t: (b, t, 0, 0)),
        pl.BlockSpec((Cd, Cp), lambda b, t: (0, 0)),
        pl.BlockSpec((1, Cp), lambda b, t: (0, 0)),
    ]
    inputs += [xd, wd, bd]
  elif has_res:
    in_specs.append(pl.BlockSpec((1, th, wo, Cp), lambda b, t: (b, t, 0, 0)))
    inputs.append(residual)

  k_total = K2 * K2 * Cx + (downsample[0].shape[-1] if has_ds else 0)
  flops = 2 * B * ho * wo * Cp * k_total
  bytes_accessed = (sum(int(a.size) * a.dtype.itemsize for a in inputs)
                    + B * ho * wo * Cp * 4)

  return pl.pallas_call(
      kernel,
      out_shape=jax.ShapeDtypeStruct((B, ho, wo, Cp), out_dtype),
      grid=(B, nT),
      in_specs=in_specs,
      out_specs=pl.BlockSpec((1, th, wo, Cp), lambda b, t: (b, t, 0, 0)),
      compiler_params=pltpu.CompilerParams(
          dimension_semantics=("parallel", "parallel"),
          vmem_limit_bytes=32 * 1024 * 1024),
      cost_estimate=pl.CostEstimate(flops=int(flops), transcendentals=0,
                                    bytes_accessed=int(bytes_accessed)),
  )(*inputs)


# -------------------------- conv + BN + PACT wrapper ------------------------ #
def conv_bn_pact(x, w, bn, alpha, *, stride, padding, cp,
                 residual=None, downsample=None):
  """Fused conv (no bias) + folded BN + optional residual/downsample + PACT.

  x: (B,H,W,Cx) NHWC, possibly already zero-padded in channels (Cx >= w Cin).
  w: (K,K,Cin,Cout). Returns (B,Ho,Wo,cp) with channels >= Cout equal to 0.
  """
  gamma, beta, mean, var = bn
  B, H, W, Cx = x.shape
  K = w.shape[0]
  Ho = (H + 2 * padding - K) // stride + 1
  Wo = (W + 2 * padding - K) // stride + 1

  w_f, bias = _fold_bn(w, gamma, beta, mean, var)
  if w_f.shape[2] < Cx:                       # activation channels were padded
    w_f = jnp.pad(w_f, ((0, 0), (0, 0), (0, Cx - w_f.shape[2]), (0, 0)))

  xp = jnp.pad(x, ((0, 0), (padding, padding), (padding, padding), (0, 0)))
  xs = _space_to_depth(xp, stride)            # stride-1 equivalent input
  ws = _pad_last(_weights_to_s2d(w_f, stride), cp)
  bias = _pad_last(bias, cp).reshape(1, cp)
  alpha = jnp.reshape(alpha, (1,)).astype(jnp.float32)

  return _conv2d_pallas(xs, ws, bias, alpha, ho=Ho, wo=Wo,
                        residual=residual, downsample=downsample,
                        out_dtype=jnp.float32)


# ------------------------------ module forward ------------------------------ #
def basic_block_forward(x, p, *, stride, cp):
  """BasicBlock with act_bit=0 (PACT activations, STE identity)."""
  bn1 = (p["bn1_g"], p["bn1_b"], p["bn1_m"], p["bn1_v"])
  bn2 = (p["bn2_g"], p["bn2_b"], p["bn2_m"], p["bn2_v"])

  # conv1 -> bn1 -> PACT -> STE(bit=0) == identity
  h = conv_bn_pact(x, p["w1"], bn1, p["alpha1"], stride=stride, padding=1, cp=cp)

  if "wd" in p:
    # 1x1-conv + BN downsample, fused into conv2's kernel as an extra matmul.
    wd_f, bd = _fold_bn(p["wd"], p["bnd_g"], p["bnd_b"], p["bnd_m"], p["bnd_v"])
    xd = _space_to_depth(x, stride)                        # (B, Ho, Wo, s*s*Cin)
    wd_s = _weights_to_s2d(wd_f, stride)                   # (1,1,s*s*Cin,Cout)
    wd_m = _pad_last(wd_s.reshape(wd_s.shape[2], wd_s.shape[3]), cp)
    bd_m = _pad_last(bd, cp).reshape(1, cp)
    ds, res = (xd, wd_m, bd_m), None
  else:
    ds, res = None, x                                      # identity residual

  # conv2 -> bn2 -> (+residual) -> PACT -> STE(bit=0) == identity
  return conv_bn_pact(h, p["w2"], bn2, p["alpha2"], stride=1, padding=1, cp=cp,
                      residual=res, downsample=ds)


def res_stage_forward(x_nchw, params, temp=None):
  # `temp` only feeds BitConv2d's bit decomposition (not provided) -> unused.
  cout = params["block1"]["w1"].shape[-1]
  cp = _round_up(cout, LANE)                 # lane-dense channel padding
  x = jnp.transpose(x_nchw, (0, 2, 3, 1)).astype(jnp.float32)   # NCHW -> NHWC
  x = basic_block_forward(x, params["block1"], stride=params["stride"], cp=cp)
  x = basic_block_forward(x, params["block2"], stride=1, cp=cp)
  x = basic_block_forward(x, params["block3"], stride=1, cp=cp)
  x = x[..., :cout]                          # drop channel padding once
  return jnp.transpose(x, (0, 3, 1, 2))      # NHWC -> NCHW


# ----------------------------- parameter creation --------------------------- #
def _init_conv(key, k, cin, cout):
  fan_in = k * k * cin
  std = (2.0 / fan_in) ** 0.5
  return std * jax.random.normal(key, (k, k, cin, cout), jnp.float32)


def _init_bn(key, c):
  k1, k2, k3, k4 = jax.random.split(key, 4)
  return (jax.random.uniform(k1, (c,), jnp.float32, 0.8, 1.2),   # gamma
          0.1 * jax.random.normal(k2, (c,), jnp.float32),        # beta
          0.1 * jax.random.normal(k3, (c,), jnp.float32),        # running_mean
          jax.random.uniform(k4, (c,), jnp.float32, 0.5, 1.5))   # running_var


def _init_block(key, cin, cout, *, downsample):
  keys = jax.random.split(key, 6)
  g1, b1, m1, v1 = _init_bn(keys[1], cout)
  g2, b2, m2, v2 = _init_bn(keys[3], cout)
  p = dict(
      w1=_init_conv(keys[0], 3, cin, cout),
      bn1_g=g1, bn1_b=b1, bn1_m=m1, bn1_v=v1,
      w2=_init_conv(keys[2], 3, cout, cout),
      bn2_g=g2, bn2_b=b2, bn2_m=m2, bn2_v=v2,
      alpha1=jnp.array(10.0, jnp.float32),   # PACT alpha init
      alpha2=jnp.array(10.0, jnp.float32),
  )
  if downsample:
    gd, bd, md, vd = _init_bn(keys[5], cout)
    p.update(wd=_init_conv(keys[4], 1, cin, cout),
             bnd_g=gd, bnd_b=bd, bnd_m=md, bnd_v=vd)
  return p


def init_res_stage(key, in_planes, out_planes, stride):
  k1, k2, k3 = jax.random.split(key, 3)
  needs_ds = (stride != 1) or (in_planes != out_planes)
  return dict(
      stride=stride,
      block1=_init_block(k1, in_planes, out_planes, downsample=needs_ds),
      block2=_init_block(k2, out_planes, out_planes, downsample=False),
      block3=_init_block(k3, out_planes, out_planes, downsample=False),
  )


# ----------------------------- pure-JAX reference ---------------------------- #
def _ref_conv_bn_act(x, w, g, b, m, v, stride, padding, alpha=None, residual=None):
  y = jax.lax.conv_general_dilated(
      x, w, (stride, stride), [(padding, padding), (padding, padding)],
      dimension_numbers=("NHWC", "HWIO", "NHWC"))
  y = (y - m) / jnp.sqrt(v + EPS) * g + b
  if residual is not None:
    y = y + residual
  if alpha is not None:
    y = jnp.clip(y, 0.0, alpha)
  return y


def _ref_block(x, p, stride):
  h = _ref_conv_bn_act(x, p["w1"], p["bn1_g"], p["bn1_b"], p["bn1_m"], p["bn1_v"],
                       stride, 1, alpha=p["alpha1"])
  if "wd" in p:
    res = _ref_conv_bn_act(x, p["wd"], p["bnd_g"], p["bnd_b"], p["bnd_m"],
                           p["bnd_v"], stride, 0)
  else:
    res = x
  return _ref_conv_bn_act(h, p["w2"], p["bn2_g"], p["bn2_b"], p["bn2_m"],
                          p["bn2_v"], 1, 1, alpha=p["alpha2"], residual=res)


def ref_res_stage(x_nchw, params):
  x = jnp.transpose(x_nchw, (0, 2, 3, 1))
  x = _ref_block(x, params["block1"], params["stride"])
  x = _ref_block(x, params["block2"], 1)
  x = _ref_block(x, params["block3"], 1)
  return jnp.transpose(x, (0, 3, 1, 2))


# ------------------------------------ main ----------------------------------- #
if __name__ == "__main__":
  key = jax.random.PRNGKey(0)
  kx, kp = jax.random.split(key)

  B, Cin, H, W = 2, 4, 16, 16
  Cout, stride = 8, 2          # exercises the fused downsample path in block1

  x = jax.random.normal(kx, (B, Cin, H, W), jnp.float32)
  params = init_res_stage(kp, Cin, Cout, stride)

  fwd = jax.jit(lambda xx: res_stage_forward(xx, params, temp=1.0))
  out = jax.block_until_ready(fwd(x))

  assert out.shape == (B, Cout, H // stride, W // stride), out.shape

  ref = jax.block_until_ready(ref_res_stage(x, params))
  max_err = float(jnp.max(jnp.abs(out - ref)))
  assert jnp.allclose(out, ref, rtol=1e-3, atol=1e-3), max_err

  print("KERNEL_OK")
</pallas_src>

<mosaic_0001>
module attributes {stable_mosaic.version = 11 : i64} {
  func.func @kernel(%arg0: i32, %arg1: i32, %arg2: memref<1x9x9x16xf32, #tpu.memory_space<vmem>>, %arg3: memref<2x2x16x128xf32, #tpu.memory_space<vmem>>, %arg4: memref<1x128xf32, #tpu.memory_space<vmem>>, %arg5: memref<1xf32, #tpu.memory_space<smem>>, %arg6: memref<1x8x8x128xf32, #tpu.memory_space<vmem>>) attributes {dimension_semantics = [#tpu.dimension_semantics<parallel>, #tpu.dimension_semantics<parallel>], iteration_bounds = array<i64: 2, 1>, scalar_prefetch = 0 : i64, scratch_operands = 0 : i64, tpu.core_type = #tpu.core_type<tc>, window_params = [{transform_indices = @transform_0, window_bounds = array<i64: 1, 9, 9, 16>}, {pipeline_mode = #tpu.pipeline_mode<synchronous>, transform_indices = @transform_1, window_bounds = array<i64: 2, 2, 16, 128>}, {pipeline_mode = #tpu.pipeline_mode<synchronous>, transform_indices = @transform_2, window_bounds = array<i64: 1, 128>}, {transform_indices = @transform_3, window_bounds = array<i64: 1>}, {transform_indices = @transform_4, window_bounds = array<i64: 1, 8, 8, 128>}]} {
    %c8_i32 = arith.constant 8 : i32
    %0 = arith.muli %arg1, %c8_i32 : i32
    %cst = arith.constant 0.000000e+00 : f32
    %1 = vector.broadcast %cst : f32 to vector<64x128xf32>
    %c0_i32 = arith.constant 0 : i32
    %2 = arith.addi %0, %c0_i32 : i32
    %c0 = arith.constant 0 : index
    %3 = arith.index_cast %2 : i32 to index
    %c0_0 = arith.constant 0 : index
    %c0_1 = arith.constant 0 : index
    %4 = vector.load %arg2[%c0, %3, %c0_0, %c0_1] : memref<1x9x9x16xf32, #tpu.memory_space<vmem>>, vector<1x8x8x16xf32>
    %5 = vector.shape_cast %4 : vector<1x8x8x16xf32> to vector<8x8x16xf32>
    %6 = vector.shape_cast %5 : vector<8x8x16xf32> to vector<64x16xf32>
    %c0_2 = arith.constant 0 : index
    %c0_3 = arith.constant 0 : index
    %c0_4 = arith.constant 0 : index
    %c0_5 = arith.constant 0 : index
    %7 = vector.load %arg3[%c0_2, %c0_3, %c0_4, %c0_5] : memref<2x2x16x128xf32, #tpu.memory_space<vmem>>, vector<1x1x16x128xf32>
    %8 = vector.shape_cast %7 : vector<1x1x16x128xf32> to vector<16x128xf32>
    %cst_6 = arith.constant dense<0.000000e+00> : vector<64x128xf32>
    %9 = tpu.matmul %6, %8, %cst_6 {dimension_numbers = #tpu.dot_dimension_numbers<[1], [0], [0], [1], [0, 0, 1, 1], [], []>} : vector<64x16xf32>, vector<16x128xf32>, vector<64x128xf32> -> vector<64x128xf32>
    %10 = arith.addf %1, %9 : vector<64x128xf32>
    %c0_i32_7 = arith.constant 0 : i32
    %11 = arith.addi %0, %c0_i32_7 : i32
    %c0_8 = arith.constant 0 : index
    %12 = arith.index_cast %11 : i32 to index
    %c1 = arith.constant 1 : index
    %c0_9 = arith.constant 0 : index
    %13 = vector.load %arg2[%c0_8, %12, %c1, %c0_9] : memref<1x9x9x16xf32, #tpu.memory_space<vmem>>, vector<1x8x8x16xf32>
    %14 = vector.shape_cast %13 : vector<1x8x8x16xf32> to vector<8x8x16xf32>
    %15 = vector.shape_cast %14 : vector<8x8x16xf32> to vector<64x16xf32>
    %c0_10 = arith.constant 0 : index
    %c1_11 = arith.constant 1 : index
    %c0_12 = arith.constant 0 : index
    %c0_13 = arith.constant 0 : index
    %16 = vector.load %arg3[%c0_10, %c1_11, %c0_12, %c0_13] : memref<2x2x16x128xf32, #tpu.memory_space<vmem>>, vector<1x1x16x128xf32>
    %17 = vector.shape_cast %16 : vector<1x1x16x128xf32> to vector<16x128xf32>
    %cst_14 = arith.constant dense<0.000000e+00> : vector<64x128xf32>
    %18 = tpu.matmul %15, %17, %cst_14 {dimension_numbers = #tpu.dot_dimension_numbers<[1], [0], [0], [1], [0, 0, 1, 1], [], []>} : vector<64x16xf32>, vector<16x128xf32>, vector<64x128xf32> -> vector<64x128xf32>
    %19 = arith.addf %10, %18 : vector<64x128xf32>
    %c1_i32 = arith.constant 1 : i32
    %20 = arith.addi %0, %c1_i32 : i32
    %c0_15 = arith.constant 0 : index
    %21 = arith.index_cast %20 : i32 to index
    %c0_16 = arith.constant 0 : index
    %c0_17 = arith.constant 0 : index
    %22 = vector.load %arg2[%c0_15, %21, %c0_16, %c0_17] : memref<1x9x9x16xf32, #tpu.memory_space<vmem>>, vector<1x8x8x16xf32>
    %23 = vector.shape_cast %22 : vector<1x8x8x16xf32> to vector<8x8x16xf32>
    %24 = vector.shape_cast %23 : vector<8x8x16xf32> to vector<64x16xf32>
    %c1_18 = arith.constant 1 : index
    %c0_19 = arith.constant 0 : index
    %c0_20 = arith.constant 0 : index
    %c0_21 = arith.constant 0 : index
    %25 = vector.load %arg3[%c1_18, %c0_19, %c0_20, %c0_21] : memref<2x2x16x128xf32, #tpu.memory_space<vmem>>, vector<1x1x16x128xf32>
    %26 = vector.shape_cast %25 : vector<1x1x16x128xf32> to vector<16x128xf32>
    %cst_22 = arith.constant dense<0.000000e+00> : vector<64x128xf32>
    %27 = tpu.matmul %24, %26, %cst_22 {dimension_numbers = #tpu.dot_dimension_numbers<[1], [0], [0], [1], [0, 0, 1, 1], [], []>} : vector<64x16xf32>, vector<16x128xf32>, vector<64x128xf32> -> vector<64x128xf32>
    %28 = arith.addf %19, %27 : vector<64x128xf32>
    %c1_i32_23 = arith.constant 1 : i32
    %29 = arith.addi %0, %c1_i32_23 : i32
    %c0_24 = arith.constant 0 : index
    %30 = arith.index_cast %29 : i32 to index
    %c1_25 = arith.constant 1 : index
    %c0_26 = arith.constant 0 : index
    %31 = vector.load %arg2[%c0_24, %30, %c1_25, %c0_26] : memref<1x9x9x16xf32, #tpu.memory_space<vmem>>, vector<1x8x8x16xf32>
    %32 = vector.shape_cast %31 : vector<1x8x8x16xf32> to vector<8x8x16xf32>
    %33 = vector.shape_cast %32 : vector<8x8x16xf32> to vector<64x16xf32>
    %c1_27 = arith.constant 1 : index
    %c1_28 = arith.constant 1 : index
    %c0_29 = arith.constant 0 : index
    %c0_30 = arith.constant 0 : index
    %34 = vector.load %arg3[%c1_27, %c1_28, %c0_29, %c0_30] : memref<2x2x16x128xf32, #tpu.memory_space<vmem>>, vector<1x1x16x128xf32>
    %35 = vector.shape_cast %34 : vector<1x1x16x128xf32> to vector<16x128xf32>
    %cst_31 = arith.constant dense<0.000000e+00> : vector<64x128xf32>
    %36 = tpu.matmul %33, %35, %cst_31 {dimension_numbers = #tpu.dot_dimension_numbers<[1], [0], [0], [1], [0, 0, 1, 1], [], []>} : vector<64x16xf32>, vector<16x128xf32>, vector<64x128xf32> -> vector<64x128xf32>
    %37 = arith.addf %28, %36 : vector<64x128xf32>
    %c0_32 = arith.constant 0 : index
    %c0_33 = arith.constant 0 : index
    %38 = vector.load %arg4[%c0_32, %c0_33] : memref<1x128xf32, #tpu.memory_space<vmem>>, vector<1x128xf32>
    %39 = vector.broadcast %38 : vector<1x128xf32> to vector<64x128xf32>
    %40 = arith.addf %37, %39 : vector<64x128xf32>
    %cst_34 = arith.constant 0.000000e+00 : f32
    %41 = vector.broadcast %cst_34 : f32 to vector<64x128xf32>
    %42 = arith.maximumf %40, %41 : vector<64x128xf32>
    %c0_35 = arith.constant 0 : index
    %43 = memref.load %arg5[%c0_35] : memref<1xf32, #tpu.memory_space<smem>>
    %44 = vector.broadcast %43 : f32 to vector<64x128xf32>
    %45 = arith.minimumf %42, %44 : vector<64x128xf32>
    %46 = vector.shape_cast %45 : vector<64x128xf32> to vector<8x8x128xf32>
    %c0_36 = arith.constant 0 : index
    %c0_37 = arith.constant 0 : index
    %c0_38 = arith.constant 0 : index
    %c0_39 = arith.constant 0 : index
    %47 = vector.load %arg6[%c0_36, %c0_37, %c0_38, %c0_39] : memref<1x8x8x128xf32, #tpu.memory_space<vmem>>, vector<1x8x8x128xf32>
    %48 = vector.shape_cast %47 : vector<1x8x8x128xf32> to vector<8x8x128xf32>
    %49 = vector.shape_cast %46 : vector<8x8x128xf32> to vector<1x8x8x128xf32>
    tpu.vector_store %arg6[%c0_36, %c0_37, %c0_38, %c0_39], %49 {strides = array<i32>} : memref<1x8x8x128xf32, #tpu.memory_space<vmem>>, vector<1x8x8x128xf32>,
    return
  }
  func.func @transform_0(%arg0: i32, %arg1: i32) -> (i32, i32, i32, i32) {
    %c0_i32 = arith.constant 0 : i32
    %c0_i32_0 = arith.constant 0 : i32
    %c0_i32_1 = arith.constant 0 : i32
    %c0_i32_2 = arith.constant 0 : i32
    return %arg0, %c0_i32, %c0_i32_0, %c0_i32_1 : i32, i32, i32, i32
  }
  func.func @transform_1(%arg0: i32, %arg1: i32) -> (i32, i32, i32, i32) {
    %c0_i32 = arith.constant 0 : i32
    %c0_i32_0 = arith.constant 0 : i32
    %c0_i32_1 = arith.constant 0 : i32
    %c0_i32_2 = arith.constant 0 : i32
    %c0_i32_3 = arith.constant 0 : i32
    return %c0_i32, %c0_i32_0, %c0_i32_1, %c0_i32_2 : i32, i32, i32, i32
  }
  func.func @transform_2(%arg0: i32, %arg1: i32) -> (i32, i32) {
    %c0_i32 = arith.constant 0 : i32
    %c0_i32_0 = arith.constant 0 : i32
    %c0_i32_1 = arith.constant 0 : i32
    return %c0_i32, %c0_i32_0 : i32, i32
  }
  func.func @transform_3(%arg0: i32, %arg1: i32) -> i32 {
    %c0_i32 = arith.constant 0 : i32
    %c0_i32_0 = arith.constant 0 : i32
    return %c0_i32 : i32
  }
  func.func @transform_4(%arg0: i32, %arg1: i32) -> (i32, i32, i32, i32) {
    %c0_i32 = arith.constant 0 : i32
    %c0_i32_0 = arith.constant 0 : i32
    %c0_i32_1 = arith.constant 0 : i32
    return %arg0, %arg1, %c0_i32, %c0_i32_0 : i32, i32, i32, i32
  }
}

module attributes {stable_mosaic.version = 11 : i64} {
  func.func @kernel(%arg0: i32, %arg1: i32, %arg2: memref<1x10x10x128xf32, #tpu.memory_space<vmem>>, %arg3: memref<3x3x128x128xf32, #tpu.memory_space<vmem>>, %arg4: memref<1x128xf32, #tpu.memory_space<vmem>>, %arg5: memref<1xf32, #tpu.memory_space<smem>>, %arg6: memref<1x8x8x16xf32, #tpu.memory_space<vmem>>, %arg7: memref<16x128xf32, #tpu.memory_space<vmem>>, %arg8: memref<1x128xf32, #tpu.memory_space<vmem>>, %arg9: memref<1x8x8x128xf32, #tpu.memory_space<vmem>>) attributes {dimension_semantics = [#tpu.dimension_semantics<parallel>, #tpu.dimension_semantics<parallel>], iteration_bounds = array<i64: 2, 1>, scalar_prefetch = 0 : i64, scratch_operands = 0 : i64, tpu.core_type = #tpu.core_type<tc>, window_params = [{transform_indices = @transform_0, window_bounds = array<i64: 1, 10, 10, 128>}, {pipeline_mode = #tpu.pipeline_mode<synchronous>, transform_indices = @transform_1, window_bounds = array<i64: 3, 3, 128, 128>}, {pipeline_mode = #tpu.pipeline_mode<synchronous>, transform_indices = @transform_2, window_bounds = array<i64: 1, 128>}, {transform_indices = @transform_3, window_bounds = array<i64: 1>}, {transform_indices = @transform_4, window_bounds = array<i64: 1, 8, 8, 16>}, {pipeline_mode = #tpu.pipeline_mode<synchronous>, transform_indices = @transform_5, window_bounds = array<i64: 16, 128>}, {pipeline_mode = #tpu.pipeline_mode<synchronous>, transform_indices = @transform_6, window_bounds = array<i64: 1, 128>}, {transform_indices = @transform_7, window_bounds = array<i64: 1, 8, 8, 128>}]} {
    %c8_i32 = arith.constant 8 : i32
    %0 = arith.muli %arg1, %c8_i32 : i32
    %cst = arith.constant 0.000000e+00 : f32
    %1 = vector.broadcast %cst : f32 to vector<64x128xf32>
    %c0_i32 = arith.constant 0 : i32
    %2 = arith.addi %0, %c0_i32 : i32
    %c0 = arith.constant 0 : index
    %3 = arith.index_cast %2 : i32 to index
    %c0_0 = arith.constant 0 : index
    %c0_1 = arith.constant 0 : index
    %4 = vector.load %arg2[%c0, %3, %c0_0, %c0_1] : memref<1x10x10x128xf32, #tpu.memory_space<vmem>>, vector<1x8x8x128xf32>
    %5 = vector.shape_cast %4 : vector<1x8x8x128xf32> to vector<8x8x128xf32>
    %6 = vector.shape_cast %5 : vector<8x8x128xf32> to vector<64x128xf32>
    %c0_2 = arith.constant 0 : index
    %c0_3 = arith.constant 0 : index
    %c0_4 = arith.constant 0 : index
    %c0_5 = arith.constant 0 : index
    %7 = vector.load %arg3[%c0_2, %c0_3, %c0_4, %c0_5] : memref<3x3x128x128xf32, #tpu.memory_space<vmem>>, vector<1x1x128x128xf32>
    %8 = vector.shape_cast %7 : vector<1x1x128x128xf32> to vector<128x128xf32>
    %cst_6 = arith.constant dense<0.000000e+00> : vector<64x128xf32>
    %9 = tpu.matmul %6, %8, %cst_6 {dimension_numbers = #tpu.dot_dimension_numbers<[1], [0], [0], [1], [0, 0, 1, 1], [], []>} : vector<64x128xf32>, vector<128x128xf32>, vector<64x128xf32> -> vector<64x128xf32>
    %10 = arith.addf %1, %9 : vector<64x128xf32>
    %c0_i32_7 = arith.constant 0 : i32
    %11 = arith.addi %0, %c0_i32_7 : i32
    %c0_8 = arith.constant 0 : index
    %12 = arith.index_cast %11 : i32 to index
    %c1 = arith.constant 1 : index
    %c0_9 = arith.constant 0 : index
    %13 = vector.load %arg2[%c0_8, %12, %c1, %c0_9] : memref<1x10x10x128xf32, #tpu.memory_space<vmem>>, vector<1x8x8x128xf32>
    %14 = vector.shape_cast %13 : vector<1x8x8x128xf32> to vector<8x8x128xf32>
    %15 = vector.shape_cast %14 : vector<8x8x128xf32> to vector<64x128xf32>
    %c0_10 = arith.constant 0 : index
    %c1_11 = arith.constant 1 : index
    %c0_12 = arith.constant 0 : index
    %c0_13 = arith.constant 0 : index
    %16 = vector.load %arg3[%c0_10, %c1_11, %c0_12, %c0_13] : memref<3x3x128x128xf32, #tpu.memory_space<vmem>>, vector<1x1x128x128xf32>
    %17 = vector.shape_cast %16 : vector<1x1x128x128xf32> to vector<128x128xf32>
    %cst_14 = arith.constant dense<0.000000e+00> : vector<64x128xf32>
    %18 = tpu.matmul %15, %17, %cst_14 {dimension_numbers = #tpu.dot_dimension_numbers<[1], [0], [0], [1], [0, 0, 1, 1], [], []>} : vector<64x128xf32>, vector<128x128xf32>, vector<64x128xf32> -> vector<64x128xf32>
    %19 = arith.addf %10, %18 : vector<64x128xf32>
    %c0_i32_15 = arith.constant 0 : i32
    %20 = arith.addi %0, %c0_i32_15 : i32
    %c0_16 = arith.constant 0 : index
    %21 = arith.index_cast %20 : i32 to index
    %c2 = arith.constant 2 : index
    %c0_17 = arith.constant 0 : index
    %22 = vector.load %arg2[%c0_16, %21, %c2, %c0_17] : memref<1x10x10x128xf32, #tpu.memory_space<vmem>>, vector<1x8x8x128xf32>
    %23 = vector.shape_cast %22 : vector<1x8x8x128xf32> to vector<8x8x128xf32>
    %24 = vector.shape_cast %23 : vector<8x8x128xf32> to vector<64x128xf32>
    %c0_18 = arith.constant 0 : index
    %c2_19 = arith.constant 2 : index
    %c0_20 = arith.constant 0 : index
    %c0_21 = arith.constant 0 : index
    %25 = vector.load %arg3[%c0_18, %c2_19, %c0_20, %c0_21] : memref<3x3x128x128xf32, #tpu.memory_space<vmem>>, vector<1x1x128x128xf32>
    %26 = vector.shape_cast %25 : vector<1x1x128x128xf32> to vector<128x128xf32>
    %cst_22 = arith.constant dense<0.000000e+00> : vector<64x128xf32>
    %27 = tpu.matmul %24, %26, %cst_22 {dimension_numbers = #tpu.dot_dimension_numbers<[1], [0], [0], [1], [0, 0, 1, 1], [], []>} : vector<64x128xf32>, vector<128x128xf32>, vector<64x128xf32> -> vector<64x128xf32>
    %28 = arith.addf %19, %27 : vector<64x128xf32>
    %c1_i32 = arith.constant 1 : i32
    %29 = arith.addi %0, %c1_i32 : i32
    %c0_23 = arith.constant 0 : index
    %30 = arith.index_cast %29 : i32 to index
    %c0_24 = arith.constant 0 : index
    %c0_25 = arith.constant 0 : index
    %31 = vector.load %arg2[%c0_23, %30, %c0_24, %c0_25] : memref<1x10x10x128xf32, #tpu.memory_space<vmem>>, vector<1x8x8x128xf32>
    %32 = vector.shape_cast %31 : vector<1x8x8x128xf32> to vector<8x8x128xf32>
    %33 = vector.shape_cast %32 : vector<8x8x128xf32> to vector<64x128xf32>
    %c1_26 = arith.constant 1 : index
    %c0_27 = arith.constant 0 : index
    %c0_28 = arith.constant 0 : index
    %c0_29 = arith.constant 0 : index
    %34 = vector.load %arg3[%c1_26, %c0_27, %c0_28, %c0_29] : memref<3x3x128x128xf32, #tpu.memory_space<vmem>>, vector<1x1x128x128xf32>
    %35 = vector.shape_cast %34 : vector<1x1x128x128xf32> to vector<128x128xf32>
    %cst_30 = arith.constant dense<0.000000e+00> : vector<64x128xf32>
    %36 = tpu.matmul %33, %35, %cst_30 {dimension_numbers = #tpu.dot_dimension_numbers<[1], [0], [0], [1], [0, 0, 1, 1], [], []>} : vector<64x128xf32>, vector<128x128xf32>, vector<64x128xf32> -> vector<64x128xf32>
    %37 = arith.addf %28, %36 : vector<64x128xf32>
    %c1_i32_31 = arith.constant 1 : i32
    %38 = arith.addi %0, %c1_i32_31 : i32
    %c0_32 = arith.constant 0 : index
    %39 = arith.index_cast %38 : i32 to index
    %c1_33 = arith.constant 1 : index
    %c0_34 = arith.constant 0 : index
    %40 = vector.load %arg2[%c0_32, %39, %c1_33, %c0_34] : memref<1x10x10x128xf32, #tpu.memory_space<vmem>>, vector<1x8x8x128xf32>
    %41 = vector.shape_cast %40 : vector<1x8x8x128xf32> to vector<8x8x128xf32>
    %42 = vector.shape_cast %41 : vector<8x8x128xf32> to vector<64x128xf32>
    %c1_35 = arith.constant 1 : index
    %c1_36 = arith.constant 1 : index
    %c0_37 = arith.constant 0 : index
    %c0_38 = arith.constant 0 : index
    %43 = vector.load %arg3[%c1_35, %c1_36, %c0_37, %c0_38] : memref<3x3x128x128xf32, #tpu.memory_space<vmem>>, vector<1x1x128x128xf32>
    %44 = vector.shape_cast %43 : vector<1x1x128x128xf32> to vector<128x128xf32>
    %cst_39 = arith.constant dense<0.000000e+00> : vector<64x128xf32>
    %45 = tpu.matmul %42, %44, %cst_39 {dimension_numbers = #tpu.dot_dimension_numbers<[1], [0], [0], [1], [0, 0, 1, 1], [], []>} : vector<64x128xf32>, vector<128x128xf32>, vector<64x128xf32> -> vector<64x128xf32>
    %46 = arith.addf %37, %45 : vector<64x128xf32>
    %c1_i32_40 = arith.constant 1 : i32
    %47 = arith.addi %0, %c1_i32_40 : i32
    %c0_41 = arith.constant 0 : index
    %48 = arith.index_cast %47 : i32 to index
    %c2_42 = arith.constant 2 : index
    %c0_43 = arith.constant 0 : index
    %49 = vector.load %arg2[%c0_41, %48, %c2_42, %c0_43] : memref<1x10x10x128xf32, #tpu.memory_space<vmem>>, vector<1x8x8x128xf32>
    %50 = vector.shape_cast %49 : vector<1x8x8x128xf32> to vector<8x8x128xf32>
    %51 = vector.shape_cast %50 : vector<8x8x128xf32> to vector<64x128xf32>
    %c1_44 = arith.constant 1 : index
    %c2_45 = arith.constant 2 : index
    %c0_46 = arith.constant 0 : index
    %c0_47 = arith.constant 0 : index
    %52 = vector.load %arg3[%c1_44, %c2_45, %c0_46, %c0_47] : memref<3x3x128x128xf32, #tpu.memory_space<vmem>>, vector<1x1x128x128xf32>
    %53 = vector.shape_cast %52 : vector<1x1x128x128xf32> to vector<128x128xf32>
    %cst_48 = arith.constant dense<0.000000e+00> : vector<64x128xf32>
    %54 = tpu.matmul %51, %53, %cst_48 {dimension_numbers = #tpu.dot_dimension_numbers<[1], [0], [0], [1], [0, 0, 1, 1], [], []>} : vector<64x128xf32>, vector<128x128xf32>, vector<64x128xf32> -> vector<64x128xf32>
    %55 = arith.addf %46, %54 : vector<64x128xf32>
    %c2_i32 = arith.constant 2 : i32
    %56 = arith.addi %0, %c2_i32 : i32
    %c0_49 = arith.constant 0 : index
    %57 = arith.index_cast %56 : i32 to index
    %c0_50 = arith.constant 0 : index
    %c0_51 = arith.constant 0 : index
    %58 = vector.load %arg2[%c0_49, %57, %c0_50, %c0_51] : memref<1x10x10x128xf32, #tpu.memory_space<vmem>>, vector<1x8x8x128xf32>
    %59 = vector.shape_cast %58 : vector<1x8x8x128xf32> to vector<8x8x128xf32>
    %60 = vector.shape_cast %59 : vector<8x8x128xf32> to vector<64x128xf32>
    %c2_52 = arith.constant 2 : index
    %c0_53 = arith.constant 0 : index
    %c0_54 = arith.constant 0 : index
    %c0_55 = arith.constant 0 : index
    %61 = vector.load %arg3[%c2_52, %c0_53, %c0_54, %c0_55] : memref<3x3x128x128xf32, #tpu.memory_space<vmem>>, vector<1x1x128x128xf32>
    %62 = vector.shape_cast %61 : vector<1x1x128x128xf32> to vector<128x128xf32>
    %cst_56 = arith.constant dense<0.000000e+00> : vector<64x128xf32>
    %63 = tpu.matmul %60, %62, %cst_56 {dimension_numbers = #tpu.dot_dimension_numbers<[1], [0], [0], [1], [0, 0, 1, 1], [], []>} : vector<64x128xf32>, vector<128x128xf32>, vector<64x128xf32> -> vector<64x128xf32>
    %64 = arith.addf %55, %63 : vector<64x128xf32>
    %c2_i32_57 = arith.constant 2 : i32
    %65 = arith.addi %0, %c2_i32_57 : i32
    %c0_58 = arith.constant 0 : index
    %66 = arith.index_cast %65 : i32 to index
    %c1_59 = arith.constant 1 : index
    %c0_60 = arith.constant 0 : index
    %67 = vector.load %arg2[%c0_58, %66, %c1_59, %c0_60] : memref<1x10x10x128xf32, #tpu.memory_space<vmem>>, vector<1x8x8x128xf32>
    %68 = vector.shape_cast %67 : vector<1x8x8x128xf32> to vector<8x8x128xf32>
    %69 = vector.shape_cast %68 : vector<8x8x128xf32> to vector<64x128xf32>
    %c2_61 = arith.constant 2 : index
    %c1_62 = arith.constant 1 : index
    %c0_63 = arith.constant 0 : index
    %c0_64 = arith.constant 0 : index
    %70 = vector.load %arg3[%c2_61, %c1_62, %c0_63, %c0_64] : memref<3x3x128x128xf32, #tpu.memory_space<vmem>>, vector<1x1x128x128xf32>
    %71 = vector.shape_cast %70 : vector<1x1x128x128xf32> to vector<128x128xf32>
    %cst_65 = arith.constant dense<0.000000e+00> : vector<64x128xf32>
    %72 = tpu.matmul %69, %71, %cst_65 {dimension_numbers = #tpu.dot_dimension_numbers<[1], [0], [0], [1], [0, 0, 1, 1], [], []>} : vector<64x128xf32>, vector<128x128xf32>, vector<64x128xf32> -> vector<64x128xf32>
    %73 = arith.addf %64, %72 : vector<64x128xf32>
    %c2_i32_66 = arith.constant 2 : i32
    %74 = arith.addi %0, %c2_i32_66 : i32
    %c0_67 = arith.constant 0 : index
    %75 = arith.index_cast %74 : i32 to index
    %c2_68 = arith.constant 2 : index
    %c0_69 = arith.constant 0 : index
    %76 = vector.load %arg2[%c0_67, %75, %c2_68, %c0_69] : memref<1x10x10x128xf32, #tpu.memory_space<vmem>>, vector<1x8x8x128xf32>
    %77 = vector.shape_cast %76 : vector<1x8x8x128xf32> to vector<8x8x128xf32>
    %78 = vector.shape_cast %77 : vector<8x8x128xf32> to vector<64x128xf32>
    %c2_70 = arith.constant 2 : index
    %c2_71 = arith.constant 2 : index
    %c0_72 = arith.constant 0 : index
    %c0_73 = arith.constant 0 : index
    %79 = vector.load %arg3[%c2_70, %c2_71, %c0_72, %c0_73] : memref<3x3x128x128xf32, #tpu.memory_space<vmem>>, vector<1x1x128x128xf32>
    %80 = vector.shape_cast %79 : vector<1x1x128x128xf32> to vector<128x128xf32>
    %cst_74 = arith.constant dense<0.000000e+00> : vector<64x128xf32>
    %81 = tpu.matmul %78, %80, %cst_74 {dimension_numbers = #tpu.dot_dimension_numbers<[1], [0], [0], [1], [0, 0, 1, 1], [], []>} : vector<64x128xf32>, vector<128x128xf32>, vector<64x128xf32> -> vector<64x128xf32>
    %82 = arith.addf %73, %81 : vector<64x128xf32>
    %c0_75 = arith.constant 0 : index
    %c0_76 = arith.constant 0 : index
    %83 = vector.load %arg4[%c0_75, %c0_76] : memref<1x128xf32, #tpu.memory_space<vmem>>, vector<1x128xf32>
    %84 = vector.broadcast %83 : vector<1x128xf32> to vector<64x128xf32>
    %85 = arith.addf %82, %84 : vector<64x128xf32>
    %c0_77 = arith.constant 0 : index
    %c0_78 = arith.constant 0 : index
    %c0_79 = arith.constant 0 : index
    %c0_80 = arith.constant 0 : index
    %86 = vector.load %arg6[%c0_77, %c0_78, %c0_79, %c0_80] : memref<1x8x8x16xf32, #tpu.memory_space<vmem>>, vector<1x8x8x16xf32>
    %87 = vector.shape_cast %86 : vector<1x8x8x16xf32> to vector<8x8x16xf32>
    %88 = vector.shape_cast %87 : vector<8x8x16xf32> to vector<64x16xf32>
    %c0_81 = arith.constant 0 : index
    %c0_82 = arith.constant 0 : index
    %89 = vector.load %arg7[%c0_81, %c0_82] : memref<16x128xf32, #tpu.memory_space<vmem>>, vector<16x128xf32>
    %cst_83 = arith.constant dense<0.000000e+00> : vector<64x128xf32>
    %90 = tpu.matmul %88, %89, %cst_83 {dimension_numbers = #tpu.dot_dimension_numbers<[1], [0], [0], [1], [0, 0, 1, 1], [], []>} : vector<64x16xf32>, vector<16x128xf32>, vector<64x128xf32> -> vector<64x128xf32>
    %91 = arith.addf %85, %90 : vector<64x128xf32>
    %c0_84 = arith.constant 0 : index
    %c0_85 = arith.constant 0 : index
    %92 = vector.load %arg8[%c0_84, %c0_85] : memref<1x128xf32, #tpu.memory_space<vmem>>, vector<1x128xf32>
    %93 = vector.broadcast %92 : vector<1x128xf32> to vector<64x128xf32>
    %94 = arith.addf %91, %93 : vector<64x128xf32>
    %cst_86 = arith.constant 0.000000e+00 : f32
    %95 = vector.broadcast %cst_86 : f32 to vector<64x128xf32>
    %96 = arith.maximumf %94, %95 : vector<64x128xf32>
    %c0_87 = arith.constant 0 : index
    %97 = memref.load %arg5[%c0_87] : memref<1xf32, #tpu.memory_space<smem>>
    %98 = vector.broadcast %97 : f32 to vector<64x128xf32>
    %99 = arith.minimumf %96, %98 : vector<64x128xf32>
    %100 = vector.shape_cast %99 : vector<64x128xf32> to vector<8x8x128xf32>
    %c0_88 = arith.constant 0 : index
    %c0_89 = arith.constant 0 : index
    %c0_90 = arith.constant 0 : index
    %c0_91 = arith.constant 0 : index
    %101 = vector.load %arg9[%c0_88, %c0_89, %c0_90, %c0_91] : memref<1x8x8x128xf32, #tpu.memory_space<vmem>>, vector<1x8x8x128xf32>
    %102 = vector.shape_cast %101 : vector<1x8x8x128xf32> to vector<8x8x128xf32>
    %103 = vector.shape_cast %100 : vector<8x8x128xf32> to vector<1x8x8x128xf32>
    tpu.vector_store %arg9[%c0_88, %c0_89, %c0_90, %c0_91], %103 {strides = array<i32>} : memref<1x8x8x128xf32, #tpu.memory_space<vmem>>, vector<1x8x8x128xf32>,
    return
  }
  func.func @transform_0(%arg0: i32, %arg1: i32) -> (i32, i32, i32, i32) {
    %c0_i32 = arith.constant 0 : i32
    %c0_i32_0 = arith.constant 0 : i32
    %c0_i32_1 = arith.constant 0 : i32
    %c0_i32_2 = arith.constant 0 : i32
    return %arg0, %c0_i32, %c0_i32_0, %c0_i32_1 : i32, i32, i32, i32
  }
  func.func @transform_1(%arg0: i32, %arg1: i32) -> (i32, i32, i32, i32) {
    %c0_i32 = arith.constant 0 : i32
    %c0_i32_0 = arith.constant 0 : i32
    %c0_i32_1 = arith.constant 0 : i32
    %c0_i32_2 = arith.constant 0 : i32
    %c0_i32_3 = arith.constant 0 : i32
    return %c0_i32, %c0_i32_0, %c0_i32_1, %c0_i32_2 : i32, i32, i32, i32
  }
  func.func @transform_2(%arg0: i32, %arg1: i32) -> (i32, i32) {
    %c0_i32 = arith.constant 0 : i32
    %c0_i32_0 = arith.constant 0 : i32
    %c0_i32_1 = arith.constant 0 : i32
    return %c0_i32, %c0_i32_0 : i32, i32
  }
  func.func @transform_3(%arg0: i32, %arg1: i32) -> i32 {
    %c0_i32 = arith.constant 0 : i32
    %c0_i32_0 = arith.constant 0 : i32
    return %c0_i32 : i32
  }
  func.func @transform_4(%arg0: i32, %arg1: i32) -> (i32, i32, i32, i32) {
    %c0_i32 = arith.constant 0 : i32
    %c0_i32_0 = arith.constant 0 : i32
    %c0_i32_1 = arith.constant 0 : i32
    return %arg0, %arg1, %c0_i32, %c0_i32_0 : i32, i32, i32, i32
  }
  func.func @transform_5(%arg0: i32, %arg1: i32) -> (i32, i32) {
    %c0_i32 = arith.constant 0 : i32
    %c0_i32_0 = arith.constant 0 : i32
    %c0_i32_1 = arith.constant 0 : i32
    return %c0_i32, %c0_i32_0 : i32, i32
  }
  func.func @transform_6(%arg0: i32, %arg1: i32) -> (i32, i32) {
    %c0_i32 = arith.constant 0 : i32
    %c0_i32_0 = arith.constant 0 : i32
    %c0_i32_1 = arith.constant 0 : i32
    return %c0_i32, %c0_i32_0 : i32, i32
  }
  func.func @transform_7(%arg0: i32, %arg1: i32) -> (i32, i32, i32, i32) {
    %c0_i32 = arith.constant 0 : i32
    %c0_i32_0 = arith.constant 0 : i32
    %c0_i32_1 = arith.constant 0 : i32
    return %arg0, %arg1, %c0_i32, %c0_i32_0 : i32, i32, i32, i32
  }
}

module attributes {stable_mosaic.version = 11 : i64} {
  func.func @kernel(%arg0: i32, %arg1: i32, %arg2: memref<1x10x10x128xf32, #tpu.memory_space<vmem>>, %arg3: memref<3x3x128x128xf32, #tpu.memory_space<vmem>>, %arg4: memref<1x128xf32, #tpu.memory_space<vmem>>, %arg5: memref<1xf32, #tpu.memory_space<smem>>, %arg6: memref<1x8x8x128xf32, #tpu.memory_space<vmem>>) attributes {dimension_semantics = [#tpu.dimension_semantics<parallel>, #tpu.dimension_semantics<parallel>], iteration_bounds = array<i64: 2, 1>, scalar_prefetch = 0 : i64, scratch_operands = 0 : i64, tpu.core_type = #tpu.core_type<tc>, window_params = [{transform_indices = @transform_0, window_bounds = array<i64: 1, 10, 10, 128>}, {pipeline_mode = #tpu.pipeline_mode<synchronous>, transform_indices = @transform_1, window_bounds = array<i64: 3, 3, 128, 128>}, {pipeline_mode = #tpu.pipeline_mode<synchronous>, transform_indices = @transform_2, window_bounds = array<i64: 1, 128>}, {transform_indices = @transform_3, window_bounds = array<i64: 1>}, {transform_indices = @transform_4, window_bounds = array<i64: 1, 8, 8, 128>}]} {
    %c8_i32 = arith.constant 8 : i32
    %0 = arith.muli %arg1, %c8_i32 : i32
    %cst = arith.constant 0.000000e+00 : f32
    %1 = vector.broadcast %cst : f32 to vector<64x128xf32>
    %c0_i32 = arith.constant 0 : i32
    %2 = arith.addi %0, %c0_i32 : i32
    %c0 = arith.constant 0 : index
    %3 = arith.index_cast %2 : i32 to index
    %c0_0 = arith.constant 0 : index
    %c0_1 = arith.constant 0 : index
    %4 = vector.load %arg2[%c0, %3, %c0_0, %c0_1] : memref<1x10x10x128xf32, #tpu.memory_space<vmem>>, vector<1x8x8x128xf32>
    %5 = vector.shape_cast %4 : vector<1x8x8x128xf32> to vector<8x8x128xf32>
    %6 = vector.shape_cast %5 : vector<8x8x128xf32> to vector<64x128xf32>
    %c0_2 = arith.constant 0 : index
    %c0_3 = arith.constant 0 : index
    %c0_4 = arith.constant 0 : index
    %c0_5 = arith.constant 0 : index
    %7 = vector.load %arg3[%c0_2, %c0_3, %c0_4, %c0_5] : memref<3x3x128x128xf32, #tpu.memory_space<vmem>>, vector<1x1x128x128xf32>
    %8 = vector.shape_cast %7 : vector<1x1x128x128xf32> to vector<128x128xf32>
    %cst_6 = arith.constant dense<0.000000e+00> : vector<64x128xf32>
    %9 = tpu.matmul %6, %8, %cst_6 {dimension_numbers = #tpu.dot_dimension_numbers<[1], [0], [0], [1], [0, 0, 1, 1], [], []>} : vector<64x128xf32>, vector<128x128xf32>, vector<64x128xf32> -> vector<64x128xf32>
    %10 = arith.addf %1, %9 : vector<64x128xf32>
    %c0_i32_7 = arith.constant 0 : i32
    %11 = arith.addi %0, %c0_i32_7 : i32
    %c0_8 = arith.constant 0 : index
    %12 = arith.index_cast %11 : i32 to index
    %c1 = arith.constant 1 : index
    %c0_9 = arith.constant 0 : index
    %13 = vector.load %arg2[%c0_8, %12, %c1, %c0_9] : memref<1x10x10x128xf32, #tpu.memory_space<vmem>>, vector<1x8x8x128xf32>
    %14 = vector.shape_cast %13 : vector<1x8x8x128xf32> to vector<8x8x128xf32>
    %15 = vector.shape_cast %14 : vector<8x8x128xf32> to vector<64x128xf32>
    %c0_10 = arith.constant 0 : index
    %c1_11 = arith.constant 1 : index
    %c0_12 = arith.constant 0 : index
    %c0_13 = arith.constant 0 : index
    %16 = vector.load %arg3[%c0_10, %c1_11, %c0_12, %c0_13] : memref<3x3x128x128xf32, #tpu.memory_space<vmem>>, vector<1x1x128x128xf32>
    %17 = vector.shape_cast %16 : vector<1x1x128x128xf32> to vector<128x128xf32>
    %cst_14 = arith.constant dense<0.000000e+00> : vector<64x128xf32>
    %18 = tpu.matmul %15, %17, %cst_14 {dimension_numbers = #tpu.dot_dimension_numbers<[1], [0], [0], [1], [0, 0, 1, 1], [], []>} : vector<64x128xf32>, vector<128x128xf32>, vector<64x128xf32> -> vector<64x128xf32>
    %19 = arith.addf %10, %18 : vector<64x128xf32>
    %c0_i32_15 = arith.constant 0 : i32
    %20 = arith.addi %0, %c0_i32_15 : i32
    %c0_16 = arith.constant 0 : index
    %21 = arith.index_cast %20 : i32 to index
    %c2 = arith.constant 2 : index
    %c0_17 = arith.constant 0 : index
    %22 = vector.load %arg2[%c0_16, %21, %c2, %c0_17] : memref<1x10x10x128xf32, #tpu.memory_space<vmem>>, vector<1x8x8x128xf32>
    %23 = vector.shape_cast %22 : vector<1x8x8x128xf32> to vector<8x8x128xf32>
    %24 = vector.shape_cast %23 : vector<8x8x128xf32> to vector<64x128xf32>
    %c0_18 = arith.constant 0 : index
    %c2_19 = arith.constant 2 : index
    %c0_20 = arith.constant 0 : index
    %c0_21 = arith.constant 0 : index
    %25 = vector.load %arg3[%c0_18, %c2_19, %c0_20, %c0_21] : memref<3x3x128x128xf32, #tpu.memory_space<vmem>>, vector<1x1x128x128xf32>
    %26 = vector.shape_cast %25 : vector<1x1x128x128xf32> to vector<128x128xf32>
    %cst_22 = arith.constant dense<0.000000e+00> : vector<64x128xf32>
    %27 = tpu.matmul %24, %26, %cst_22 {dimension_numbers = #tpu.dot_dimension_numbers<[1], [0], [0], [1], [0, 0, 1, 1], [], []>} : vector<64x128xf32>, vector<128x128xf32>, vector<64x128xf32> -> vector<64x128xf32>
    %28 = arith.addf %19, %27 : vector<64x128xf32>
    %c1_i32 = arith.constant 1 : i32
    %29 = arith.addi %0, %c1_i32 : i32
    %c0_23 = arith.constant 0 : index
    %30 = arith.index_cast %29 : i32 to index
    %c0_24 = arith.constant 0 : index
    %c0_25 = arith.constant 0 : index
    %31 = vector.load %arg2[%c0_23, %30, %c0_24, %c0_25] : memref<1x10x10x128xf32, #tpu.memory_space<vmem>>, vector<1x8x8x128xf32>
    %32 = vector.shape_cast %31 : vector<1x8x8x128xf32> to vector<8x8x128xf32>
    %33 = vector.shape_cast %32 : vector<8x8x128xf32> to vector<64x128xf32>
    %c1_26 = arith.constant 1 : index
    %c0_27 = arith.constant 0 : index
    %c0_28 = arith.constant 0 : index
    %c0_29 = arith.constant 0 : index
    %34 = vector.load %arg3[%c1_26, %c0_27, %c0_28, %c0_29] : memref<3x3x128x128xf32, #tpu.memory_space<vmem>>, vector<1x1x128x128xf32>
    %35 = vector.shape_cast %34 : vector<1x1x128x128xf32> to vector<128x128xf32>
    %cst_30 = arith.constant dense<0.000000e+00> : vector<64x128xf32>
    %36 = tpu.matmul %33, %35, %cst_30 {dimension_numbers = #tpu.dot_dimension_numbers<[1], [0], [0], [1], [0, 0, 1, 1], [], []>} : vector<64x128xf32>, vector<128x128xf32>, vector<64x128xf32> -> vector<64x128xf32>
    %37 = arith.addf %28, %36 : vector<64x128xf32>
    %c1_i32_31 = arith.constant 1 : i32
    %38 = arith.addi %0, %c1_i32_31 : i32
    %c0_32 = arith.constant 0 : index
    %39 = arith.index_cast %38 : i32 to index
    %c1_33 = arith.constant 1 : index
    %c0_34 = arith.constant 0 : index
    %40 = vector.load %arg2[%c0_32, %39, %c1_33, %c0_34] : memref<1x10x10x128xf32, #tpu.memory_space<vmem>>, vector<1x8x8x128xf32>
    %41 = vector.shape_cast %40 : vector<1x8x8x128xf32> to vector<8x8x128xf32>
    %42 = vector.shape_cast %41 : vector<8x8x128xf32> to vector<64x128xf32>
    %c1_35 = arith.constant 1 : index
    %c1_36 = arith.constant 1 : index
    %c0_37 = arith.constant 0 : index
    %c0_38 = arith.constant 0 : index
    %43 = vector.load %arg3[%c1_35, %c1_36, %c0_37, %c0_38] : memref<3x3x128x128xf32, #tpu.memory_space<vmem>>, vector<1x1x128x128xf32>
    %44 = vector.shape_cast %43 : vector<1x1x128x128xf32> to vector<128x128xf32>
    %cst_39 = arith.constant dense<0.000000e+00> : vector<64x128xf32>
    %45 = tpu.matmul %42, %44, %cst_39 {dimension_numbers = #tpu.dot_dimension_numbers<[1], [0], [0], [1], [0, 0, 1, 1], [], []>} : vector<64x128xf32>, vector<128x128xf32>, vector<64x128xf32> -> vector<64x128xf32>
    %46 = arith.addf %37, %45 : vector<64x128xf32>
    %c1_i32_40 = arith.constant 1 : i32
    %47 = arith.addi %0, %c1_i32_40 : i32
    %c0_41 = arith.constant 0 : index
    %48 = arith.index_cast %47 : i32 to index
    %c2_42 = arith.constant 2 : index
    %c0_43 = arith.constant 0 : index
    %49 = vector.load %arg2[%c0_41, %48, %c2_42, %c0_43] : memref<1x10x10x128xf32, #tpu.memory_space<vmem>>, vector<1x8x8x128xf32>
    %50 = vector.shape_cast %49 : vector<1x8x8x128xf32> to vector<8x8x128xf32>
    %51 = vector.shape_cast %50 : vector<8x8x128xf32> to vector<64x128xf32>
    %c1_44 = arith.constant 1 : index
    %c2_45 = arith.constant 2 : index
    %c0_46 = arith.constant 0 : index
    %c0_47 = arith.constant 0 : index
    %52 = vector.load %arg3[%c1_44, %c2_45, %c0_46, %c0_47] : memref<3x3x128x128xf32, #tpu.memory_space<vmem>>, vector<1x1x128x128xf32>
    %53 = vector.shape_cast %52 : vector<1x1x128x128xf32> to vector<128x128xf32>
    %cst_48 = arith.constant dense<0.000000e+00> : vector<64x128xf32>
    %54 = tpu.matmul %51, %53, %cst_48 {dimension_numbers = #tpu.dot_dimension_numbers<[1], [0], [0], [1], [0, 0, 1, 1], [], []>} : vector<64x128xf32>, vector<128x128xf32>, vector<64x128xf32> -> vector<64x128xf32>
    %55 = arith.addf %46, %54 : vector<64x128xf32>
    %c2_i32 = arith.constant 2 : i32
    %56 = arith.addi %0, %c2_i32 : i32
    %c0_49 = arith.constant 0 : index
    %57 = arith.index_cast %56 : i32 to index
    %c0_50 = arith.constant 0 : index
    %c0_51 = arith.constant 0 : index
    %58 = vector.load %arg2[%c0_49, %57, %c0_50, %c0_51] : memref<1x10x10x128xf32, #tpu.memory_space<vmem>>, vector<1x8x8x128xf32>
    %59 = vector.shape_cast %58 : vector<1x8x8x128xf32> to vector<8x8x128xf32>
    %60 = vector.shape_cast %59 : vector<8x8x128xf32> to vector<64x128xf32>
    %c2_52 = arith.constant 2 : index
    %c0_53 = arith.constant 0 : index
    %c0_54 = arith.constant 0 : index
    %c0_55 = arith.constant 0 : index
    %61 = vector.load %arg3[%c2_52, %c0_53, %c0_54, %c0_55] : memref<3x3x128x128xf32, #tpu.memory_space<vmem>>, vector<1x1x128x128xf32>
    %62 = vector.shape_cast %61 : vector<1x1x128x128xf32> to vector<128x128xf32>
    %cst_56 = arith.constant dense<0.000000e+00> : vector<64x128xf32>
    %63 = tpu.matmul %60, %62, %cst_56 {dimension_numbers = #tpu.dot_dimension_numbers<[1], [0], [0], [1], [0, 0, 1, 1], [], []>} : vector<64x128xf32>, vector<128x128xf32>, vector<64x128xf32> -> vector<64x128xf32>
    %64 = arith.addf %55, %63 : vector<64x128xf32>
    %c2_i32_57 = arith.constant 2 : i32
    %65 = arith.addi %0, %c2_i32_57 : i32
    %c0_58 = arith.constant 0 : index
    %66 = arith.index_cast %65 : i32 to index
    %c1_59 = arith.constant 1 : index
    %c0_60 = arith.constant 0 : index
    %67 = vector.load %arg2[%c0_58, %66, %c1_59, %c0_60] : memref<1x10x10x128xf32, #tpu.memory_space<vmem>>, vector<1x8x8x128xf32>
    %68 = vector.shape_cast %67 : vector<1x8x8x128xf32> to vector<8x8x128xf32>
    %69 = vector.shape_cast %68 : vector<8x8x128xf32> to vector<64x128xf32>
    %c2_61 = arith.constant 2 : index
    %c1_62 = arith.constant 1 : index
    %c0_63 = arith.constant 0 : index
    %c0_64 = arith.constant 0 : index
    %70 = vector.load %arg3[%c2_61, %c1_62, %c0_63, %c0_64] : memref<3x3x128x128xf32, #tpu.memory_space<vmem>>, vector<1x1x128x128xf32>
    %71 = vector.shape_cast %70 : vector<1x1x128x128xf32> to vector<128x128xf32>
    %cst_65 = arith.constant dense<0.000000e+00> : vector<64x128xf32>
    %72 = tpu.matmul %69, %71, %cst_65 {dimension_numbers = #tpu.dot_dimension_numbers<[1], [0], [0], [1], [0, 0, 1, 1], [], []>} : vector<64x128xf32>, vector<128x128xf32>, vector<64x128xf32> -> vector<64x128xf32>
    %73 = arith.addf %64, %72 : vector<64x128xf32>
    %c2_i32_66 = arith.constant 2 : i32
    %74 = arith.addi %0, %c2_i32_66 : i32
    %c0_67 = arith.constant 0 : index
    %75 = arith.index_cast %74 : i32 to index
    %c2_68 = arith.constant 2 : index
    %c0_69 = arith.constant 0 : index
    %76 = vector.load %arg2[%c0_67, %75, %c2_68, %c0_69] : memref<1x10x10x128xf32, #tpu.memory_space<vmem>>, vector<1x8x8x128xf32>
    %77 = vector.shape_cast %76 : vector<1x8x8x128xf32> to vector<8x8x128xf32>
    %78 = vector.shape_cast %77 : vector<8x8x128xf32> to vector<64x128xf32>
    %c2_70 = arith.constant 2 : index
    %c2_71 = arith.constant 2 : index
    %c0_72 = arith.constant 0 : index
    %c0_73 = arith.constant 0 : index
    %79 = vector.load %arg3[%c2_70, %c2_71, %c0_72, %c0_73] : memref<3x3x128x128xf32, #tpu.memory_space<vmem>>, vector<1x1x128x128xf32>
    %80 = vector.shape_cast %79 : vector<1x1x128x128xf32> to vector<128x128xf32>
    %cst_74 = arith.constant dense<0.000000e+00> : vector<64x128xf32>
    %81 = tpu.matmul %78, %80, %cst_74 {dimension_numbers = #tpu.dot_dimension_numbers<[1], [0], [0], [1], [0, 0, 1, 1], [], []>} : vector<64x128xf32>, vector<128x128xf32>, vector<64x128xf32> -> vector<64x128xf32>
    %82 = arith.addf %73, %81 : vector<64x128xf32>
    %c0_75 = arith.constant 0 : index
    %c0_76 = arith.constant 0 : index
    %83 = vector.load %arg4[%c0_75, %c0_76] : memref<1x128xf32, #tpu.memory_space<vmem>>, vector<1x128xf32>
    %84 = vector.broadcast %83 : vector<1x128xf32> to vector<64x128xf32>
    %85 = arith.addf %82, %84 : vector<64x128xf32>
    %cst_77 = arith.constant 0.000000e+00 : f32
    %86 = vector.broadcast %cst_77 : f32 to vector<64x128xf32>
    %87 = arith.maximumf %85, %86 : vector<64x128xf32>
    %c0_78 = arith.constant 0 : index
    %88 = memref.load %arg5[%c0_78] : memref<1xf32, #tpu.memory_space<smem>>
    %89 = vector.broadcast %88 : f32 to vector<64x128xf32>
    %90 = arith.minimumf %87, %89 : vector<64x128xf32>
    %91 = vector.shape_cast %90 : vector<64x128xf32> to vector<8x8x128xf32>
    %c0_79 = arith.constant 0 : index
    %c0_80 = arith.constant 0 : index
    %c0_81 = arith.constant 0 : index
    %c0_82 = arith.constant 0 : index
    %92 = vector.load %arg6[%c0_79, %c0_80, %c0_81, %c0_82] : memref<1x8x8x128xf32, #tpu.memory_space<vmem>>, vector<1x8x8x128xf32>
    %93 = vector.shape_cast %92 : vector<1x8x8x128xf32> to vector<8x8x128xf32>
    %94 = vector.shape_cast %91 : vector<8x8x128xf32> to vector<1x8x8x128xf32>
    tpu.vector_store %arg6[%c0_79, %c0_80, %c0_81, %c0_82], %94 {strides = array<i32>} : memref<1x8x8x128xf32, #tpu.memory_space<vmem>>, vector<1x8x8x128xf32>,
    return
  }
  func.func @transform_0(%arg0: i32, %arg1: i32) -> (i32, i32, i32, i32) {
    %c0_i32 = arith.constant 0 : i32
    %c0_i32_0 = arith.constant 0 : i32
    %c0_i32_1 = arith.constant 0 : i32
    %c0_i32_2 = arith.constant 0 : i32
    return %arg0, %c0_i32, %c0_i32_0, %c0_i32_1 : i32, i32, i32, i32
  }
  func.func @transform_1(%arg0: i32, %arg1: i32) -> (i32, i32, i32, i32) {
    %c0_i32 = arith.constant 0 : i32
    %c0_i32_0 = arith.constant 0 : i32
    %c0_i32_1 = arith.constant 0 : i32
    %c0_i32_2 = arith.constant 0 : i32
    %c0_i32_3 = arith.constant 0 : i32
    return %c0_i32, %c0_i32_0, %c0_i32_1, %c0_i32_2 : i32, i32, i32, i32
  }
  func.func @transform_2(%arg0: i32, %arg1: i32) -> (i32, i32) {
    %c0_i32 = arith.constant 0 : i32
    %c0_i32_0 = arith.constant 0 : i32
    %c0_i32_1 = arith.constant 0 : i32
    return %c0_i32, %c0_i32_0 : i32, i32
  }
  func.func @transform_3(%arg0: i32, %arg1: i32) -> i32 {
    %c0_i32 = arith.constant 0 : i32
    %c0_i32_0 = arith.constant 0 : i32
    return %c0_i32 : i32
  }
  func.func @transform_4(%arg0: i32, %arg1: i32) -> (i32, i32, i32, i32) {
    %c0_i32 = arith.constant 0 : i32
    %c0_i32_0 = arith.constant 0 : i32
    %c0_i32_1 = arith.constant 0 : i32
    return %arg0, %arg1, %c0_i32, %c0_i32_0 : i32, i32, i32, i32
  }
}

module attributes {stable_mosaic.version = 11 : i64} {
  func.func @kernel(%arg0: i32, %arg1: i32, %arg2: memref<1x10x10x128xf32, #tpu.memory_space<vmem>>, %arg3: memref<3x3x128x128xf32, #tpu.memory_space<vmem>>, %arg4: memref<1x128xf32, #tpu.memory_space<vmem>>, %arg5: memref<1xf32, #tpu.memory_space<smem>>, %arg6: memref<1x8x8x128xf32, #tpu.memory_space<vmem>>, %arg7: memref<1x8x8x128xf32, #tpu.memory_space<vmem>>) attributes {dimension_semantics = [#tpu.dimension_semantics<parallel>, #tpu.dimension_semantics<parallel>], iteration_bounds = array<i64: 2, 1>, scalar_prefetch = 0 : i64, scratch_operands = 0 : i64, tpu.core_type = #tpu.core_type<tc>, window_params = [{transform_indices = @transform_0, window_bounds = array<i64: 1, 10, 10, 128>}, {pipeline_mode = #tpu.pipeline_mode<synchronous>, transform_indices = @transform_1, window_bounds = array<i64: 3, 3, 128, 128>}, {pipeline_mode = #tpu.pipeline_mode<synchronous>, transform_indices = @transform_2, window_bounds = array<i64: 1, 128>}, {transform_indices = @transform_3, window_bounds = array<i64: 1>}, {transform_indices = @transform_4, window_bounds = array<i64: 1, 8, 8, 128>}, {transform_indices = @transform_5, window_bounds = array<i64: 1, 8, 8, 128>}]} {
    %c8_i32 = arith.constant 8 : i32
    %0 = arith.muli %arg1, %c8_i32 : i32
    %cst = arith.constant 0.000000e+00 : f32
    %1 = vector.broadcast %cst : f32 to vector<64x128xf32>
    %c0_i32 = arith.constant 0 : i32
    %2 = arith.addi %0, %c0_i32 : i32
    %c0 = arith.constant 0 : index
    %3 = arith.index_cast %2 : i32 to index
    %c0_0 = arith.constant 0 : index
    %c0_1 = arith.constant 0 : index
    %4 = vector.load %arg2[%c0, %3, %c0_0, %c0_1] : memref<1x10x10x128xf32, #tpu.memory_space<vmem>>, vector<1x8x8x128xf32>
    %5 = vector.shape_cast %4 : vector<1x8x8x128xf32> to vector<8x8x128xf32>
    %6 = vector.shape_cast %5 : vector<8x8x128xf32> to vector<64x128xf32>
    %c0_2 = arith.constant 0 : index
    %c0_3 = arith.constant 0 : index
    %c0_4 = arith.constant 0 : index
    %c0_5 = arith.constant 0 : index
    %7 = vector.load %arg3[%c0_2, %c0_3, %c0_4, %c0_5] : memref<3x3x128x128xf32, #tpu.memory_space<vmem>>, vector<1x1x128x128xf32>
    %8 = vector.shape_cast %7 : vector<1x1x128x128xf32> to vector<128x128xf32>
    %cst_6 = arith.constant dense<0.000000e+00> : vector<64x128xf32>
    %9 = tpu.matmul %6, %8, %cst_6 {dimension_numbers = #tpu.dot_dimension_numbers<[1], [0], [0], [1], [0, 0, 1, 1], [], []>} : vector<64x128xf32>, vector<128x128xf32>, vector<64x128xf32> -> vector<64x128xf32>
    %10 = arith.addf %1, %9 : vector<64x128xf32>
    %c0_i32_7 = arith.constant 0 : i32
    %11 = arith.addi %0, %c0_i32_7 : i32
    %c0_8 = arith.constant 0 : index
    %12 = arith.index_cast %11 : i32 to index
    %c1 = arith.constant 1 : index
    %c0_9 = arith.constant 0 : index
    %13 = vector.load %arg2[%c0_8, %12, %c1, %c0_9] : memref<1x10x10x128xf32, #tpu.memory_space<vmem>>, vector<1x8x8x128xf32>
    %14 = vector.shape_cast %13 : vector<1x8x8x128xf32> to vector<8x8x128xf32>
    %15 = vector.shape_cast %14 : vector<8x8x128xf32> to vector<64x128xf32>
    %c0_10 = arith.constant 0 : index
    %c1_11 = arith.constant 1 : index
    %c0_12 = arith.constant 0 : index
    %c0_13 = arith.constant 0 : index
    %16 = vector.load %arg3[%c0_10, %c1_11, %c0_12, %c0_13] : memref<3x3x128x128xf32, #tpu.memory_space<vmem>>, vector<1x1x128x128xf32>
    %17 = vector.shape_cast %16 : vector<1x1x128x128xf32> to vector<128x128xf32>
    %cst_14 = arith.constant dense<0.000000e+00> : vector<64x128xf32>
    %18 = tpu.matmul %15, %17, %cst_14 {dimension_numbers = #tpu.dot_dimension_numbers<[1], [0], [0], [1], [0, 0, 1, 1], [], []>} : vector<64x128xf32>, vector<128x128xf32>, vector<64x128xf32> -> vector<64x128xf32>
    %19 = arith.addf %10, %18 : vector<64x128xf32>
    %c0_i32_15 = arith.constant 0 : i32
    %20 = arith.addi %0, %c0_i32_15 : i32
    %c0_16 = arith.constant 0 : index
    %21 = arith.index_cast %20 : i32 to index
    %c2 = arith.constant 2 : index
    %c0_17 = arith.constant 0 : index
    %22 = vector.load %arg2[%c0_16, %21, %c2, %c0_17] : memref<1x10x10x128xf32, #tpu.memory_space<vmem>>, vector<1x8x8x128xf32>
    %23 = vector.shape_cast %22 : vector<1x8x8x128xf32> to vector<8x8x128xf32>
    %24 = vector.shape_cast %23 : vector<8x8x128xf32> to vector<64x128xf32>
    %c0_18 = arith.constant 0 : index
    %c2_19 = arith.constant 2 : index
    %c0_20 = arith.constant 0 : index
    %c0_21 = arith.constant 0 : index
    %25 = vector.load %arg3[%c0_18, %c2_19, %c0_20, %c0_21] : memref<3x3x128x128xf32, #tpu.memory_space<vmem>>, vector<1x1x128x128xf32>
    %26 = vector.shape_cast %25 : vector<1x1x128x128xf32> to vector<128x128xf32>
    %cst_22 = arith.constant dense<0.000000e+00> : vector<64x128xf32>
    %27 = tpu.matmul %24, %26, %cst_22 {dimension_numbers = #tpu.dot_dimension_numbers<[1], [0], [0], [1], [0, 0, 1, 1], [], []>} : vector<64x128xf32>, vector<128x128xf32>, vector<64x128xf32> -> vector<64x128xf32>
    %28 = arith.addf %19, %27 : vector<64x128xf32>
    %c1_i32 = arith.constant 1 : i32
    %29 = arith.addi %0, %c1_i32 : i32
    %c0_23 = arith.constant 0 : index
    %30 = arith.index_cast %29 : i32 to index
    %c0_24 = arith.constant 0 : index
    %c0_25 = arith.constant 0 : index
    %31 = vector.load %arg2[%c0_23, %30, %c0_24, %c0_25] : memref<1x10x10x128xf32, #tpu.memory_space<vmem>>, vector<1x8x8x128xf32>
    %32 = vector.shape_cast %31 : vector<1x8x8x128xf32> to vector<8x8x128xf32>
    %33 = vector.shape_cast %32 : vector<8x8x128xf32> to vector<64x128xf32>
    %c1_26 = arith.constant 1 : index
    %c0_27 = arith.constant 0 : index
    %c0_28 = arith.constant 0 : index
    %c0_29 = arith.constant 0 : index
    %34 = vector.load %arg3[%c1_26, %c0_27, %c0_28, %c0_29] : memref<3x3x128x128xf32, #tpu.memory_space<vmem>>, vector<1x1x128x128xf32>
    %35 = vector.shape_cast %34 : vector<1x1x128x128xf32> to vector<128x128xf32>
    %cst_30 = arith.constant dense<0.000000e+00> : vector<64x128xf32>
    %36 = tpu.matmul %33, %35, %cst_30 {dimension_numbers = #tpu.dot_dimension_numbers<[1], [0], [0], [1], [0, 0, 1, 1], [], []>} : vector<64x128xf32>, vector<128x128xf32>, vector<64x128xf32> -> vector<64x128xf32>
    %37 = arith.addf %28, %36 : vector<64x128xf32>
    %c1_i32_31 = arith.constant 1 : i32
    %38 = arith.addi %0, %c1_i32_31 : i32
    %c0_32 = arith.constant 0 : index
    %39 = arith.index_cast %38 : i32 to index
    %c1_33 = arith.constant 1 : index
    %c0_34 = arith.constant 0 : index
    %40 = vector.load %arg2[%c0_32, %39, %c1_33, %c0_34] : memref<1x10x10x128xf32, #tpu.memory_space<vmem>>, vector<1x8x8x128xf32>
    %41 = vector.shape_cast %40 : vector<1x8x8x128xf32> to vector<8x8x128xf32>
    %42 = vector.shape_cast %41 : vector<8x8x128xf32> to vector<64x128xf32>
    %c1_35 = arith.constant 1 : index
    %c1_36 = arith.constant 1 : index
    %c0_37 = arith.constant 0 : index
    %c0_38 = arith.constant 0 : index
    %43 = vector.load %arg3[%c1_35, %c1_36, %c0_37, %c0_38] : memref<3x3x128x128xf32, #tpu.memory_space<vmem>>, vector<1x1x128x128xf32>
    %44 = vector.shape_cast %43 : vector<1x1x128x128xf32> to vector<128x128xf32>
    %cst_39 = arith.constant dense<0.000000e+00> : vector<64x128xf32>
    %45 = tpu.matmul %42, %44, %cst_39 {dimension_numbers = #tpu.dot_dimension_numbers<[1], [0], [0], [1], [0, 0, 1, 1], [], []>} : vector<64x128xf32>, vector<128x128xf32>, vector<64x128xf32> -> vector<64x128xf32>
    %46 = arith.addf %37, %45 : vector<64x128xf32>
    %c1_i32_40 = arith.constant 1 : i32
    %47 = arith.addi %0, %c1_i32_40 : i32
    %c0_41 = arith.constant 0 : index
    %48 = arith.index_cast %47 : i32 to index
    %c2_42 = arith.constant 2 : index
    %c0_43 = arith.constant 0 : index
    %49 = vector.load %arg2[%c0_41, %48, %c2_42, %c0_43] : memref<1x10x10x128xf32, #tpu.memory_space<vmem>>, vector<1x8x8x128xf32>
    %50 = vector.shape_cast %49 : vector<1x8x8x128xf32> to vector<8x8x128xf32>
    %51 = vector.shape_cast %50 : vector<8x8x128xf32> to vector<64x128xf32>
    %c1_44 = arith.constant 1 : index
    %c2_45 = arith.constant 2 : index
    %c0_46 = arith.constant 0 : index
    %c0_47 = arith.constant 0 : index
    %52 = vector.load %arg3[%c1_44, %c2_45, %c0_46, %c0_47] : memref<3x3x128x128xf32, #tpu.memory_space<vmem>>, vector<1x1x128x128xf32>
    %53 = vector.shape_cast %52 : vector<1x1x128x128xf32> to vector<128x128xf32>
    %cst_48 = arith.constant dense<0.000000e+00> : vector<64x128xf32>
    %54 = tpu.matmul %51, %53, %cst_48 {dimension_numbers = #tpu.dot_dimension_numbers<[1], [0], [0], [1], [0, 0, 1, 1], [], []>} : vector<64x128xf32>, vector<128x128xf32>, vector<64x128xf32> -> vector<64x128xf32>
    %55 = arith.addf %46, %54 : vector<64x128xf32>
    %c2_i32 = arith.constant 2 : i32
    %56 = arith.addi %0, %c2_i32 : i32
    %c0_49 = arith.constant 0 : index
    %57 = arith.index_cast %56 : i32 to index
    %c0_50 = arith.constant 0 : index
    %c0_51 = arith.constant 0 : index
    %58 = vector.load %arg2[%c0_49, %57, %c0_50, %c0_51] : memref<1x10x10x128xf32, #tpu.memory_space<vmem>>, vector<1x8x8x128xf32>
    %59 = vector.shape_cast %58 : vector<1x8x8x128xf32> to vector<8x8x128xf32>
    %60 = vector.shape_cast %59 : vector<8x8x128xf32> to vector<64x128xf32>
    %c2_52 = arith.constant 2 : index
    %c0_53 = arith.constant 0 : index
    %c0_54 = arith.constant 0 : index
    %c0_55 = arith.constant 0 : index
    %61 = vector.load %arg3[%c2_52, %c0_53, %c0_54, %c0_55] : memref<3x3x128x128xf32, #tpu.memory_space<vmem>>, vector<1x1x128x128xf32>
    %62 = vector.shape_cast %61 : vector<1x1x128x128xf32> to vector<128x128xf32>
    %cst_56 = arith.constant dense<0.000000e+00> : vector<64x128xf32>
    %63 = tpu.matmul %60, %62, %cst_56 {dimension_numbers = #tpu.dot_dimension_numbers<[1], [0], [0], [1], [0, 0, 1, 1], [], []>} : vector<64x128xf32>, vector<128x128xf32>, vector<64x128xf32> -> vector<64x128xf32>
    %64 = arith.addf %55, %63 : vector<64x128xf32>
    %c2_i32_57 = arith.constant 2 : i32
    %65 = arith.addi %0, %c2_i32_57 : i32
    %c0_58 = arith.constant 0 : index
    %66 = arith.index_cast %65 : i32 to index
    %c1_59 = arith.constant 1 : index
    %c0_60 = arith.constant 0 : index
    %67 = vector.load %arg2[%c0_58, %66, %c1_59, %c0_60] : memref<1x10x10x128xf32, #tpu.memory_space<vmem>>, vector<1x8x8x128xf32>
    %68 = vector.shape_cast %67 : vector<1x8x8x128xf32> to vector<8x8x128xf32>
    %69 = vector.shape_cast %68 : vector<8x8x128xf32> to vector<64x128xf32>
    %c2_61 = arith.constant 2 : index
    %c1_62 = arith.constant 1 : index
    %c0_63 = arith.constant 0 : index
    %c0_64 = arith.constant 0 : index
    %70 = vector.load %arg3[%c2_61, %c1_62, %c0_63, %c0_64] : memref<3x3x128x128xf32, #tpu.memory_space<vmem>>, vector<1x1x128x128xf32>
    %71 = vector.shape_cast %70 : vector<1x1x128x128xf32> to vector<128x128xf32>
    %cst_65 = arith.constant dense<0.000000e+00> : vector<64x128xf32>
    %72 = tpu.matmul %69, %71, %cst_65 {dimension_numbers = #tpu.dot_dimension_numbers<[1], [0], [0], [1], [0, 0, 1, 1], [], []>} : vector<64x128xf32>, vector<128x128xf32>, vector<64x128xf32> -> vector<64x128xf32>
    %73 = arith.addf %64, %72 : vector<64x128xf32>
    %c2_i32_66 = arith.constant 2 : i32
    %74 = arith.addi %0, %c2_i32_66 : i32
    %c0_67 = arith.constant 0 : index
    %75 = arith.index_cast %74 : i32 to index
    %c2_68 = arith.constant 2 : index
    %c0_69 = arith.constant 0 : index
    %76 = vector.load %arg2[%c0_67, %75, %c2_68, %c0_69] : memref<1x10x10x128xf32, #tpu.memory_space<vmem>>, vector<1x8x8x128xf32>
    %77 = vector.shape_cast %76 : vector<1x8x8x128xf32> to vector<8x8x128xf32>
    %78 = vector.shape_cast %77 : vector<8x8x128xf32> to vector<64x128xf32>
    %c2_70 = arith.constant 2 : index
    %c2_71 = arith.constant 2 : index
    %c0_72 = arith.constant 0 : index
    %c0_73 = arith.constant 0 : index
    %79 = vector.load %arg3[%c2_70, %c2_71, %c0_72, %c0_73] : memref<3x3x128x128xf32, #tpu.memory_space<vmem>>, vector<1x1x128x128xf32>
    %80 = vector.shape_cast %79 : vector<1x1x128x128xf32> to vector<128x128xf32>
    %cst_74 = arith.constant dense<0.000000e+00> : vector<64x128xf32>
    %81 = tpu.matmul %78, %80, %cst_74 {dimension_numbers = #tpu.dot_dimension_numbers<[1], [0], [0], [1], [0, 0, 1, 1], [], []>} : vector<64x128xf32>, vector<128x128xf32>, vector<64x128xf32> -> vector<64x128xf32>
    %82 = arith.addf %73, %81 : vector<64x128xf32>
    %c0_75 = arith.constant 0 : index
    %c0_76 = arith.constant 0 : index
    %83 = vector.load %arg4[%c0_75, %c0_76] : memref<1x128xf32, #tpu.memory_space<vmem>>, vector<1x128xf32>
    %84 = vector.broadcast %83 : vector<1x128xf32> to vector<64x128xf32>
    %85 = arith.addf %82, %84 : vector<64x128xf32>
    %c0_77 = arith.constant 0 : index
    %c0_78 = arith.constant 0 : index
    %c0_79 = arith.constant 0 : index
    %c0_80 = arith.constant 0 : index
    %86 = vector.load %arg6[%c0_77, %c0_78, %c0_79, %c0_80] : memref<1x8x8x128xf32, #tpu.memory_space<vmem>>, vector<1x8x8x128xf32>
    %87 = vector.shape_cast %86 : vector<1x8x8x128xf32> to vector<8x8x128xf32>
    %88 = vector.shape_cast %87 : vector<8x8x128xf32> to vector<64x128xf32>
    %89 = arith.addf %85, %88 : vector<64x128xf32>
    %cst_81 = arith.constant 0.000000e+00 : f32
    %90 = vector.broadcast %cst_81 : f32 to vector<64x128xf32>
    %91 = arith.maximumf %89, %90 : vector<64x128xf32>
    %c0_82 = arith.constant 0 : index
    %92 = memref.load %arg5[%c0_82] : memref<1xf32, #tpu.memory_space<smem>>
    %93 = vector.broadcast %92 : f32 to vector<64x128xf32>
    %94 = arith.minimumf %91, %93 : vector<64x128xf32>
    %95 = vector.shape_cast %94 : vector<64x128xf32> to vector<8x8x128xf32>
    %c0_83 = arith.constant 0 : index
    %c0_84 = arith.constant 0 : index
    %c0_85 = arith.constant 0 : index
    %c0_86 = arith.constant 0 : index
    %96 = vector.load %arg7[%c0_83, %c0_84, %c0_85, %c0_86] : memref<1x8x8x128xf32, #tpu.memory_space<vmem>>, vector<1x8x8x128xf32>
    %97 = vector.shape_cast %96 : vector<1x8x8x128xf32> to vector<8x8x128xf32>
    %98 = vector.shape_cast %95 : vector<8x8x128xf32> to vector<1x8x8x128xf32>
    tpu.vector_store %arg7[%c0_83, %c0_84, %c0_85, %c0_86], %98 {strides = array<i32>} : memref<1x8x8x128xf32, #tpu.memory_space<vmem>>, vector<1x8x8x128xf32>,
    return
  }
  func.func @transform_0(%arg0: i32, %arg1: i32) -> (i32, i32, i32, i32) {
    %c0_i32 = arith.constant 0 : i32
    %c0_i32_0 = arith.constant 0 : i32
    %c0_i32_1 = arith.constant 0 : i32
    %c0_i32_2 = arith.constant 0 : i32
    return %arg0, %c0_i32, %c0_i32_0, %c0_i32_1 : i32, i32, i32, i32
  }
  func.func @transform_1(%arg0: i32, %arg1: i32) -> (i32, i32, i32, i32) {
    %c0_i32 = arith.constant 0 : i32
    %c0_i32_0 = arith.constant 0 : i32
    %c0_i32_1 = arith.constant 0 : i32
    %c0_i32_2 = arith.constant 0 : i32
    %c0_i32_3 = arith.constant 0 : i32
    return %c0_i32, %c0_i32_0, %c0_i32_1, %c0_i32_2 : i32, i32, i32, i32
  }
  func.func @transform_2(%arg0: i32, %arg1: i32) -> (i32, i32) {
    %c0_i32 = arith.constant 0 : i32
    %c0_i32_0 = arith.constant 0 : i32
    %c0_i32_1 = arith.constant 0 : i32
    return %c0_i32, %c0_i32_0 : i32, i32
  }
  func.func @transform_3(%arg0: i32, %arg1: i32) -> i32 {
    %c0_i32 = arith.constant 0 : i32
    %c0_i32_0 = arith.constant 0 : i32
    return %c0_i32 : i32
  }
  func.func @transform_4(%arg0: i32, %arg1: i32) -> (i32, i32, i32, i32) {
    %c0_i32 = arith.constant 0 : i32
    %c0_i32_0 = arith.constant 0 : i32
    %c0_i32_1 = arith.constant 0 : i32
    return %arg0, %arg1, %c0_i32, %c0_i32_0 : i32, i32, i32, i32
  }
  func.func @transform_5(%arg0: i32, %arg1: i32) -> (i32, i32, i32, i32) {
    %c0_i32 = arith.constant 0 : i32
    %c0_i32_0 = arith.constant 0 : i32
    %c0_i32_1 = arith.constant 0 : i32
    return %arg0, %arg1, %c0_i32, %c0_i32_0 : i32, i32, i32, i32
  }
}

</mosaic_0001>

<bundles_post_ra>
// kernel: _lambda_.6
= control target key start
LH: loop header
LB: loop body
LE: loop exit
PB: predicated region body
PF: predicated region fallthrough
CT: control target
= control target key end

     0   :  { %s1219_s17 = smov 0   ;;  %s1221_s18 = smov 0   ;;  %s1345_s0 = inlined_call_operand.vmem [shape: f32[2,9,9,16], index: 0, kind: input, shape index: {}]   ;;  %s1346_s1 = inlined_call_operand.vmem [shape: f32[2,2,16,128], index: 1, kind: input, shape index: {}]   ;;  %s1347_s2 = inlined_call_operand.vmem [shape: f32[1,128], index: 2, kind: input, shape index: {}]   ;;  %s1348_s3 = inlined_call_operand.<no memory space> [shape: f32[1], index: 3, kind: input, shape index: {}]   ;;  %s1349_s4 = inlined_call_operand.vmem [shape: f32[2,8,8,128], index: 4, kind: output, shape index: {}]  }
   0x1   :  { %9 = sst [smem:[#allocation2]] %s1348_s3  ;;  %s1223_s19 = smov 0  }
   0x2 LB: > { %s27_s3 = sadd.s32 1, %s1185_s18  ;;  %p936_p0 = scmp.ge.s32.totalorder %s1189_s19, 1  ;;  %s1189_s19 = sphi %s1223_s19, %s15_s19   ;;  %s1185_s18 = sphi %s1221_s18, %s1351_s18   ;;  %s1181_s17 = sphi %s1219_s17, %s1350_s17  }
   0x3   : > { %p29_p1 = scmp.ge.s32.totalorder %s27_s3, 2  ;;  %p177_p2 = scmp.lt.s32.totalorder %s1189_s19, 3 }
   0x5   : > { %s1353_s3 = smov (%p29_p1, %s27_s3), 0  ;;  %p178_p3 = pnand %p936_p0, %p177_p2 }
   0x6   : > { %v940_v0 = vld [vmem:[%s1346_s1 + $0x10] sm:$0xff] (!%p178_p3)  ;;  %v941_v1 = vld [vmem:[%s1346_s1 + $0x18] sm:$0xff] (!%p178_p3)  ;;  %v966_v2 = vld [vmem:[%s1346_s1 + $0x20] sm:$0xff] (!%p178_p3)  ;;  %p207_p4 = scmp.lt.s32.totalorder (!%p178_p3), %s1181_s17, 1  ;;  %vm246_vm0 = vcmask (!%p178_p3), 130048   ;;  %s827_s14 = sld [smem:[#allocation2]] (!%p178_p3) }
   0x7   : > { %181 = sbr.rel (%p178_p3) target bundleno = 270 (0x10e), region = 36  ;;  %v1102_v3 = vpack.c.bf16 (!%p178_p3), %v941_v1, %v940_v0  ;;  %v967_v4 = vld [vmem:[%s1346_s1 + $0x28] sm:$0xff] (!%p178_p3)  ;;  %v233_v5 = vld [vmem:[%s1346_s1] sm:$0xff] (!%p178_p3)  ;;  %v984_v9 = vld [vmem:[%s1346_s1 + $0x30] sm:$0xff] (!%p178_p3) }
   0x8   : > { %v234_v6 = vld [vmem:[%s1346_s1 + $0x8] sm:$0xff] (!%p178_p3)  ;;  %v1110_v7 = vpack.c.bf16 (!%p178_p3), %v967_v4, %v966_v2  ;;  %v985_v10 = vld [vmem:[%s1346_s1 + $0x38] sm:$0xff] (!%p178_p3)  ;;  %v994_v32 = vld [vmem:[%s1347_s2] ss:$0 sm:$0xff] (!%p178_p3) }
   0x9   : > { %v1106_v8 = vpack.c.bf16 (!%p178_p3), %v234_v6, %v233_v5  ;;  %1103 = vmatprep.subr.bf16.mxu1 (!%p178_p3), %v1102_v3  ;;  %v1114_v11 = vpack.c.bf16 (!%p178_p3), %v985_v10, %v984_v9 }
   0xa   : > { %1111 = vmatprep.subr.bf16.mxu0 (!%p178_p3), %v1110_v7  ;;  %1105 = vmatpush3.bf16.msra.mxu1 (!%p178_p3), %v1102_v3 }
   0xb   : > { %1113 = vmatpush3.bf16.msra.mxu0 (!%p178_p3), %v1110_v7  ;;  %1107 = vmatprep.subr.bf16.mxu1 (!%p178_p3), %v1106_v8 }
   0xc   : > { %1115 = vmatprep.subr.bf16.mxu0 (!%p178_p3), %v1114_v11  ;;  %v828_v38 = vstv (!%p178_p3), %s827_s14 }
   0xe   : > { %s1355_s17 = smov (!%p207_p4, %s1181_s17), 1 }
   0xf   : > { %s1142_s10 = smul.u32 144, %s1355_s17  ;;  %s997_s20 = sshll.u32 %s1355_s17, 6 }
  0x10   : > { %s1326_s23 = scalar_lea.vmem %s1349_s4, %s997_s20 }
  0x11   : > { %s1267_s13 = scalar_lea.vmem %s1345_s0, %s1142_s10 }
  0x12   : > { %v235_v12 = vld [vmem:[%s1267_s13 + $0x1] sm:$0xff]  ;;  %v958_v13 = vld [vmem:[%s1267_s13 + $0x10] sm:$0xff] }
  0x13   : > { %v236_v14 = vld [vmem:[%s1267_s13 + $0x11] sm:$0xff]  ;;  %1042 = vmatprep.mubr.msk.f32.mxu1 %vm246_vm0, %v235_v12  ;;  %1074 = vmatprep.mubr.msk.f32.mxu0 %vm246_vm0, %v958_v13  ;;  %v959_v15 = vld [vmem:[%s1267_s13 + $0x20] sm:$0xff] }
  0x14   : > { %v237_v16 = vld [vmem:[%s1267_s13 + $0x21] sm:$0xff]  ;;  %v960_v17 = vld [vmem:[%s1267_s13 + $0x30] sm:$0xff]  ;;  %1043 = vmatmul.mubr.msk.f32.vlgmr.msra.gmra.mrb[0].mxu1 %vm246_vm0, %v236_v14  ;;  %1075 = vmatmul.mubr.msk.f32.vlgmr.msra.gmra.mrb[0].mxu0 %vm246_vm0, %v959_v15 }
  0x15   : > { %1109 = vmatpush3.bf16.msra.mxu1 %v1106_v8  ;;  %1117 = vmatpush3.bf16.msra.mxu0 %v1114_v11  ;;  %v238_v18 = vld [vmem:[%s1267_s13 + $0x31] sm:$0xff]  ;;  %v961_v19 = vld [vmem:[%s1267_s13 + $0x40] sm:$0xff] }
  0x16   : > { %1045 = vmatprep.mubr.msk.f32.mxu1 %vm246_vm0, %v237_v16  ;;  %1077 = vmatprep.mubr.msk.f32.mxu0 %vm246_vm0, %v960_v17  ;;  %v239_v20 = vld [vmem:[%s1267_s13 + $0x41] sm:$0xff]  ;;  %v962_v21 = vld [vmem:[%s1267_s13 + $0x50] sm:$0xff] }
  0x17   : > { %v240_v22 = vld [vmem:[%s1267_s13 + $0x51] sm:$0xff]  ;;  %v963_v23 = vld [vmem:[%s1267_s13 + $0x60] sm:$0xff] }
  0x18   : > { %1046 = vmatmul.mubr.msk.f32.gmra.mrb[2].mxu1 %vm246_vm0, %v238_v18  ;;  %1078 = vmatmul.mubr.msk.f32.gmra.mrb[2].mxu0 %vm246_vm0, %v961_v19  ;;  %v241_v24 = vld [vmem:[%s1267_s13 + $0x61] sm:$0xff]  ;;  %v964_v25 = vld [vmem:[%s1267_s13 + $0x70] sm:$0xff] }
  0x19   : > { %1048 = vmatprep.mubr.msk.f32.mxu1 %vm246_vm0, %v239_v20  ;;  %1080 = vmatprep.mubr.msk.f32.mxu0 %vm246_vm0, %v962_v21  ;;  %v242_v26 = vld [vmem:[%s1267_s13 + $0x71] sm:$0xff]  ;;  %v965_v27 = vld [vmem:[%s1267_s13 + $0x80] sm:$0xff] }
  0x1a   : > { %v225_v28 = vld [vmem:[%s1267_s13] sm:$0xff] }
  0x1b   : > { %v983_v29 = vld [vmem:[%s1267_s13 + $0x81] sm:$0xff] }
  0x1c   : > { %1049 = vmatmul.mubr.msk.f32.gmra.mrb[4].mxu1 %vm246_vm0, %v240_v22  ;;  %1081 = vmatmul.mubr.msk.f32.gmra.mrb[4].mxu0 %vm246_vm0, %v963_v23 }
  0x1d   : > { %1051 = vmatprep.mubr.msk.f32.mxu1 %vm246_vm0, %v241_v24  ;;  %1083 = vmatprep.mubr.msk.f32.mxu0 %vm246_vm0, %v964_v25 }
  0x20   : > { %1052 = vmatmul.mubr.msk.f32.gmra.mrb[6].mxu1 %vm246_vm0, %v242_v26  ;;  %1084 = vmatmul.mubr.msk.f32.gmra.mrb[6].mxu0 %vm246_vm0, %v965_v27 }
  0x21   : > { %1058 = vmatprep.mubr.msk.f32.mxu1 %vm246_vm0, %v225_v28  ;;  %1090 = vmatprep.mubr.msk.f32.mxu0 %vm246_vm0, %v236_v14 }
  0x24   : > { %1059 = vmatmul.mubr.msk.f32.vlgmr.msra.gmra.mrb[0].mxu1 %vm246_vm0, %v958_v13  ;;  %1091 = vmatmul.mubr.msk.f32.vlgmr.msra.gmra.mrb[0].mxu0 %vm246_vm0, %v237_v16 }
  0x25   : > { %1061 = vmatprep.mubr.msk.f32.mxu1 %vm246_vm0, %v959_v15  ;;  %1093 = vmatprep.mubr.msk.f32.mxu0 %vm246_vm0, %v238_v18 }
  0x28   : > { %1062 = vmatmul.mubr.msk.f32.gmra.mrb[2].mxu1 %vm246_vm0, %v960_v17  ;;  %1094 = vmatmul.mubr.msk.f32.gmra.mrb[2].mxu0 %vm246_vm0, %v239_v20 }
  0x29   : > { %1064 = vmatprep.mubr.msk.f32.mxu1 %vm246_vm0, %v961_v19  ;;  %1096 = vmatprep.mubr.msk.f32.mxu0 %vm246_vm0, %v240_v22 }
  0x2c   : > { %1065 = vmatmul.mubr.msk.f32.gmra.mrb[4].mxu1 %vm246_vm0, %v962_v21  ;;  %1097 = vmatmul.mubr.msk.f32.gmra.mrb[4].mxu0 %vm246_vm0, %v241_v24 }
  0x2d   : > { %1067 = vmatprep.mubr.msk.f32.mxu1 %vm246_vm0, %v963_v23  ;;  %1099 = vmatprep.mubr.msk.f32.mxu0 %vm246_vm0, %v242_v26 }
  0x30   : > { %1068 = vmatmul.mubr.msk.f32.gmra.mrb[6].mxu1 %vm246_vm0, %v964_v25  ;;  %1100 = vmatmul.mubr.msk.f32.gmra.mrb[6].mxu0 %vm246_vm0, %v983_v29 }
  0xf7   : > { %v1060_v30 = vpop.f32.mrb[0].mxu1  ;;  %v1092_v31 = vpop.f32.mrb[0].mxu0 }
  0xf8   : > { %v1118_v33 = vadd.f32 %v1092_v31, %v1060_v30  ;;  %v466_v34 = vpop.f32.mrb[1].mxu1  ;;  %v757_v35 = vpop.f32.mrb[1].mxu0 }
  0xf9   : > { %v1119_v36 = vadd.f32 %v757_v35, %v466_v34 }
  0xfa   : > { %v812_v37 = vadd.f32 %v1118_v33, %v994_v32 }
  0xfb   : > { %v811_v39 = vadd.f32 %v1119_v36, %v994_v32  ;;  %v1063_v40 = vpop.f32.mrb[2].mxu1  ;;  %v1095_v41 = vpop.f32.mrb[2].mxu0 }
  0xfc   : > { %v820_v42 = vmax.f32 %v812_v37, 0.0  ;;  %v1120_v43 = vadd.f32 %v1095_v41, %v1063_v40  ;;  %v476_v44 = vpop.f32.mrb[3].mxu1  ;;  %v767_v45 = vpop.f32.mrb[3].mxu0 }
  0xfd   : > { %v819_v46 = vmax.f32 %v811_v39, 0.0  ;;  %v1121_v47 = vadd.f32 %v767_v45, %v476_v44 }
  0xfe   : > { %v830_v48 = vmin.f32 %v820_v42, %v828_v38  ;;  %v814_v49 = vadd.f32 %v1120_v43, %v994_v32 }
  0xff   : > { %v829_v50 = vmin.f32 %v819_v46, %v828_v38  ;;  %v813_v51 = vadd.f32 %v1121_v47, %v994_v32  ;;  %v1066_v52 = vpop.f32.mrb[4].mxu1  ;;  %v1098_v53 = vpop.f32.mrb[4].mxu0 }
 0x100   : > { %838 = vst [vmem:[%s1326_s23 + $0x8] sm:$0xff] %v830_v48  ;;  %v822_v54 = vmax.f32 %v814_v49, 0.0  ;;  %v1122_v55 = vadd.f32 %v1098_v53, %v1066_v52  ;;  %v486_v56 = vpop.f32.mrb[5].mxu1  ;;  %v777_v57 = vpop.f32.mrb[5].mxu0 }
 0x101   : > { %837 = vst [vmem:[%s1326_s23] sm:$0xff] %v829_v50  ;;  %v821_v58 = vmax.f32 %v813_v51, 0.0  ;;  %v1123_v59 = vadd.f32 %v777_v57, %v486_v56 }
 0x102   : > { %v832_v60 = vmin.f32 %v822_v54, %v828_v38  ;;  %v816_v61 = vadd.f32 %v1122_v55, %v994_v32 }
 0x103   : > { %v831_v62 = vmin.f32 %v821_v58, %v828_v38  ;;  %v815_v63 = vadd.f32 %v1123_v59, %v994_v32  ;;  %v1069_v0 = vpop.f32.mrb[6].mxu1  ;;  %v1101_v1 = vpop.f32.mrb[6].mxu0 }
 0x104   : > { %840 = vst [vmem:[%s1326_s23 + $0x18] sm:$0xff] %v832_v60  ;;  %v824_v2 = vmax.f32 %v816_v61, 0.0  ;;  %v1124_v3 = vadd.f32 %v1101_v1, %v1069_v0  ;;  %v496_v4 = vpop.f32.mrb[7].mxu1  ;;  %v787_v5 = vpop.f32.mrb[7].mxu0 }
 0x105   : > { %839 = vst [vmem:[%s1326_s23 + $0x10] sm:$0xff] %v831_v62  ;;  %v823_v6 = vmax.f32 %v815_v63, 0.0  ;;  %v1125_v7 = vadd.f32 %v787_v5, %v496_v4 }
 0x106   : > { %v834_v8 = vmin.f32 %v824_v2, %v828_v38  ;;  %v818_v9 = vadd.f32 %v1124_v3, %v994_v32 }
 0x107   : > { %v833_v10 = vmin.f32 %v823_v6, %v828_v38  ;;  %v817_v11 = vadd.f32 %v1125_v7, %v994_v32 }
 0x108   : > { %842 = vst [vmem:[%s1326_s23 + $0x28] sm:$0xff] %v834_v8  ;;  %v826_v12 = vmax.f32 %v818_v9, 0.0 }
 0x109   : > { %841 = vst [vmem:[%s1326_s23 + $0x20] sm:$0xff] %v833_v10  ;;  %v825_v13 = vmax.f32 %v817_v11, 0.0 }
 0x10a   : > { %v836_v14 = vmin.f32 %v826_v12, %v828_v38 }
 0x10b   : > { %v835_v15 = vmin.f32 %v825_v13, %v828_v38 }
 0x10c   : > { %844 = vst [vmem:[%s1326_s23 + $0x38] sm:$0xff] %v836_v14 }
 0x10d   : > { %843 = vst [vmem:[%s1326_s23 + $0x30] sm:$0xff] %v835_v15 }
 0x10e PF: > { %s15_s19 = sadd.s32 1, %s1189_s19   ;;  %s1350_s17 = smov %s1185_s18 }
 0x10f   : > { %p12_p5 = scmp.ge.s32.totalorder %s15_s19, 4   ;;  %s1351_s18 = smov %s1353_s3 }
 0x111   :  { %14 = sbr.rel (!%p12_p5) target bundleno = 2 (0x2), region = 71 }

// kernel: _lambda_.7
= control target key start
LH: loop header
LB: loop body
LE: loop exit
PB: predicated region body
PF: predicated region fallthrough
CT: control target
= control target key end

     0   :  { %s3188_s26 = smov 0   ;;  %s3190_s27 = smov 0   ;;  %s3850_s0 = inlined_call_operand.vmem [shape: f32[2,10,10,128], index: 0, kind: input, shape index: {}]   ;;  %s3851_s1 = inlined_call_operand.vmem [shape: f32[3,3,128,128], index: 1, kind: input, shape index: {}]   ;;  %s3852_s2 = inlined_call_operand.vmem [shape: f32[1,128], index: 2, kind: input, shape index: {}]   ;;  %s3853_s3 = inlined_call_operand.<no memory space> [shape: f32[1], index: 3, kind: input, shape index: {}]   ;;  %s3854_s4 = inlined_call_operand.vmem [shape: f32[2,8,8,16], index: 4, kind: input, shape index: {}]   ;;  %s3855_s5 = inlined_call_operand.vmem [shape: f32[16,128], index: 5, kind: input, shape index: {}]   ;;  %s3856_s6 = inlined_call_operand.vmem [shape: f32[1,128], index: 6, kind: input, shape index: {}]   ;;  %s3857_s7 = inlined_call_operand.vmem [shape: f32[2,8,8,128], index: 7, kind: output, shape index: {}]  }
   0x1   :  { %12 = sst [smem:[#allocation2]] %s3853_s3  ;;  %s3192_s28 = smov 0  }
   0x2 LB: > { %s30_s3 = sadd.s32 1, %s3139_s27  ;;  %p1890_p0 = scmp.ge.s32.totalorder %s3143_s28, 1  ;;  %s3143_s28 = sphi %s3192_s28, %s18_s28   ;;  %s3139_s27 = sphi %s3190_s27, %s3859_s27   ;;  %s3135_s26 = sphi %s3188_s26, %s3858_s26  }
   0x3   : > { %p32_p1 = scmp.ge.s32.totalorder %s30_s3, 2  ;;  %p269_p2 = scmp.lt.s32.totalorder %s3143_s28, 3 }
   0x5   : > { %s3861_s3 = smov (%p32_p1, %s30_s3), 0  ;;  %p270_p3 = pnand %p1890_p0, %p269_p2 }
   0x6   : > { %v1896_v0 = vld [vmem:[%s3851_s1 + $0x80] sm:$0xff] (!%p270_p3)  ;;  %v1897_v1 = vld [vmem:[%s3851_s1 + $0x88] sm:$0xff] (!%p270_p3)  ;;  %p314_p4 = scmp.lt.s32.totalorder (!%p270_p3), %s3135_s26, 1  ;;  %v1898_v5 = vld [vmem:[%s3851_s1 + $0x90] sm:$0xff] (!%p270_p3)  ;;  %vm1598_vm0 = vcmask (!%p270_p3), 130048   ;;  %s1759_s22 = sld [smem:[#allocation2]] (!%p270_p3) }
   0x7   : > { %273 = sbr.rel (%p270_p3) target bundleno = 405 (0x195), region = 48  ;;  %v1984_v2 = vld [vmem:[%s3851_s1 + $0x280] sm:$0xff] (!%p270_p3)  ;;  %v2724_v3 = vpack.c.bf16 (!%p270_p3), %v1897_v1, %v1896_v0  ;;  %v1985_v4 = vld [vmem:[%s3851_s1 + $0x288] sm:$0xff] (!%p270_p3)  ;;  %v1899_v6 = vld [vmem:[%s3851_s1 + $0x98] sm:$0xff] (!%p270_p3) }
   0x8   : > { %v2884_v7 = vpack.c.bf16 (!%p270_p3), %v1985_v4, %v1984_v2  ;;  %v2728_v8 = vpack.c.bf16 (!%p270_p3), %v1899_v6, %v1898_v5  ;;  %v1986_v9 = vld [vmem:[%s3851_s1 + $0x290] sm:$0xff] (!%p270_p3)  ;;  %v1987_v10 = vld [vmem:[%s3851_s1 + $0x298] sm:$0xff] (!%p270_p3)  ;;  %v1900_v11 = vld [vmem:[%s3851_s1 + $0xa0] sm:$0xff] (!%p270_p3) }
   0x9   : > { %2725 = vmatprep.subr.bf16.mxu1 (!%p270_p3), %v2724_v3  ;;  %v2888_v12 = vpack.c.bf16 (!%p270_p3), %v1987_v10, %v1986_v9  ;;  %v1901_v13 = vld [vmem:[%s3851_s1 + $0xa8] sm:$0xff] (!%p270_p3)  ;;  %v1988_v14 = vld [vmem:[%s3851_s1 + $0x2a0] sm:$0xff] (!%p270_p3)  ;;  %v1902_v18 = vld [vmem:[%s3851_s1 + $0xb0] sm:$0xff] (!%p270_p3) }
   0xa   : > { %v1989_v15 = vld [vmem:[%s3851_s1 + $0x2a8] sm:$0xff] (!%p270_p3)  ;;  %2885 = vmatprep.subr.bf16.mxu0 (!%p270_p3), %v2884_v7  ;;  %2727 = vmatpush3.bf16.msra.mxu1 (!%p270_p3), %v2724_v3  ;;  %v2732_v16 = vpack.c.bf16 (!%p270_p3), %v1901_v13, %v1900_v11  ;;  %v1903_v19 = vld [vmem:[%s3851_s1 + $0xb8] sm:$0xff] (!%p270_p3)  ;;  %v1990_v20 = vld [vmem:[%s3851_s1 + $0x2b0] sm:$0xff] (!%p270_p3) }
   0xb   : > { %2887 = vmatpush3.bf16.msra.mxu0 (!%p270_p3), %v2884_v7  ;;  %2729 = vmatprep.subr.bf16.mxu1 (!%p270_p3), %v2728_v8  ;;  %v2892_v17 = vpack.c.bf16 (!%p270_p3), %v1989_v15, %v1988_v14  ;;  %v1991_v21 = vld [vmem:[%s3851_s1 + $0x2b8] sm:$0xff] (!%p270_p3)  ;;  %v2736_v22 = vpack.c.bf16 (!%p270_p3), %v1903_v19, %v1902_v18  ;;  %v1904_v24 = vld [vmem:[%s3851_s1 + $0xc0] sm:$0xff] (!%p270_p3)  ;;  %v1905_v25 = vld [vmem:[%s3851_s1 + $0xc8] sm:$0xff] (!%p270_p3) }
   0xc   : > { %2889 = vmatprep.subr.bf16.mxu0 (!%p270_p3), %v2888_v12  ;;  %v2896_v23 = vpack.c.bf16 (!%p270_p3), %v1991_v21, %v1990_v20  ;;  %v1992_v27 = vld [vmem:[%s3851_s1 + $0x2c0] sm:$0xff] (!%p270_p3)  ;;  %v1993_v28 = vld [vmem:[%s3851_s1 + $0x2c8] sm:$0xff] (!%p270_p3)  ;;  %v2740_v30 = vpack.c.bf16 (!%p270_p3), %v1905_v25, %v1904_v24  ;;  %v1906_v32 = vld [vmem:[%s3851_s1 + $0xd0] sm:$0xff] (!%p270_p3) }
   0xd   : > { %v2900_v31 = vpack.c.bf16 (!%p270_p3), %v1993_v28, %v1992_v27  ;;  %v1907_v33 = vld [vmem:[%s3851_s1 + $0xd8] sm:$0xff] (!%p270_p3)  ;;  %v1994_v34 = vld [vmem:[%s3851_s1 + $0x2d0] sm:$0xff] (!%p270_p3)  ;;  %v1908_v38 = vld [vmem:[%s3851_s1 + $0xe0] sm:$0xff] (!%p270_p3) }
   0xe   : > { %s3863_s26 = smov (!%p314_p4, %s3135_s26), 1  ;;  %2731 = vmatpush3.bf16.msra.mxu1 %v2728_v8  ;;  %v1995_v35 = vld [vmem:[%s3851_s1 + $0x2d8] sm:$0xff]  ;;  %v2744_v36 = vpack.c.bf16 %v1907_v33, %v1906_v32  ;;  %v1909_v39 = vld [vmem:[%s3851_s1 + $0xe8] sm:$0xff]  ;;  %v1996_v40 = vld [vmem:[%s3851_s1 + $0x2e0] sm:$0xff] }
   0xf   : > { %s3096_s10 = smul.u32 160, %s3863_s26  ;;  %2891 = vmatpush3.bf16.msra.mxu0 %v2888_v12  ;;  %2733 = vmatprep.subr.bf16.mxu1 %v2732_v16  ;;  %v2904_v37 = vpack.c.bf16 %v1995_v35, %v1994_v34  ;;  %v1997_v41 = vld [vmem:[%s3851_s1 + $0x2e8] sm:$0xff]  ;;  %v2748_v42 = vpack.c.bf16 %v1909_v39, %v1908_v38  ;;  %v1910_v44 = vld [vmem:[%s3851_s1 + $0xf0] sm:$0xff]  ;;  %v1911_v45 = vld [vmem:[%s3851_s1 + $0xf8] sm:$0xff]  ;;  %s2084_s18 = sshll.u32 %s3863_s26, 6 }
  0x10   : > { %2893 = vmatprep.subr.bf16.mxu0 %v2892_v17  ;;  %v2908_v43 = vpack.c.bf16 %v1997_v41, %v1996_v40  ;;  %v1998_v46 = vld [vmem:[%s3851_s1 + $0x2f0] sm:$0xff]  ;;  %v1999_v47 = vld [vmem:[%s3851_s1 + $0x2f8] sm:$0xff]  ;;  %v2752_v48 = vpack.c.bf16 %v1911_v45, %v1910_v44  ;;  %v350_v50 = vld [vmem:[%s3851_s1] sm:$0xff]  ;;  %s3770_s29 = scalar_lea.vmem %s3854_s4, %s2084_s18  ;;  %s3831_s30 = scalar_lea.vmem %s3857_s7, %s2084_s18 }
  0x11   : > { %s3260_s21 = scalar_lea.vmem %s3850_s0, %s3096_s10  ;;  %v2912_v49 = vpack.c.bf16 %v1999_v47, %v1998_v46  ;;  %v351_v51 = vld [vmem:[%s3851_s1 + $0x8] sm:$0xff]  ;;  %v2008_v52 = vld [vmem:[%s3851_s1 + $0x300] sm:$0xff]  ;;  %v352_v56 = vld [vmem:[%s3851_s1 + $0x10] sm:$0xff] }
  0x12   : > { %v366_v26 = vld [vmem:[%s3260_s21 + $0x1] sm:$0xff]  ;;  %v3276_v29 = vld [vmem:[%s3260_s21 + $0x12] sm:$0xff]  ;;  %2735 = vmatpush3.bf16.msra.mxu1 %v2732_v16  ;;  %v2756_v54 = vpack.c.bf16 %v351_v51, %v350_v50 }
  0x13   : > { %2344 = vmatprep.mubr.f32.mxu1 %v366_v26  ;;  %2564 = vmatprep.mubr.f32.mxu0 %v3276_v29  ;;  %v2009_v53 = vld [vmem:[%s3851_s1 + $0x308] sm:$0xff]  ;;  %v353_v57 = vld [vmem:[%s3851_s1 + $0x18] sm:$0xff]  ;;  %v2010_v58 = vld [vmem:[%s3851_s1 + $0x310] sm:$0xff] }
  0x14   : > { %2895 = vmatpush3.bf16.msra.mxu0 %v2892_v17  ;;  %2737 = vmatprep.subr.bf16.mxu1 %v2736_v22  ;;  %v2916_v55 = vpack.c.bf16 %v2009_v53, %v2008_v52  ;;  %v2011_v59 = vld [vmem:[%s3851_s1 + $0x318] sm:$0xff]  ;;  %v3343_v61 = vld [vmem:[%s3260_s21 + $0x22] sm:$0xff]  ;;  %v2760_v62 = vpack.c.bf16 %v353_v57, %v352_v56  ;;  %v356_v10 = vld [vmem:[%s3851_s1 + $0x30] sm:$0xff] }
  0x15   : > { %2897 = vmatprep.subr.bf16.mxu0 %v2896_v23  ;;  %v3340_v60 = vld [vmem:[%s3260_s21 + $0x11] sm:$0xff]  ;;  %v2920_v63 = vpack.c.bf16 %v2011_v59, %v2010_v58  ;;  %v354_v0 = vld [vmem:[%s3851_s1 + $0x20] sm:$0xff]  ;;  %v355_v1 = vld [vmem:[%s3851_s1 + $0x28] sm:$0xff] }
  0x16   : > { %2739 = vmatpush3.bf16.msra.mxu1 %v2736_v22  ;;  %v2012_v2 = vld [vmem:[%s3851_s1 + $0x320] sm:$0xff]  ;;  %v2013_v3 = vld [vmem:[%s3851_s1 + $0x328] sm:$0xff]  ;;  %v3363_v5 = vld [vmem:[%s3260_s21 + $0x32] sm:$0xff]  ;;  %v2764_v7 = vpack.c.bf16 %v355_v1, %v354_v0 }
  0x17   : > { %2741 = vmatprep.subr.bf16.mxu1 %v2740_v30  ;;  %v3359_v4 = vld [vmem:[%s3260_s21 + $0x21] sm:$0xff]  ;;  %v3366_v6 = vld [vmem:[%s3260_s21 + $0x31] sm:$0xff]  ;;  %v2924_v9 = vpack.c.bf16 %v2013_v3, %v2012_v2 }
  0x18   : > { %2899 = vmatpush3.bf16.msra.mxu0 %v2896_v23  ;;  %v3369_v8 = vld [vmem:[%s3260_s21 + $0x42] sm:$0xff]  ;;  %v357_v11 = vld [vmem:[%s3851_s1 + $0x38] sm:$0xff]  ;;  %v2014_v12 = vld [vmem:[%s3851_s1 + $0x330] sm:$0xff] }
  0x19   : > { %2901 = vmatprep.subr.bf16.mxu0 %v2900_v31  ;;  %v2015_v13 = vld [vmem:[%s3851_s1 + $0x338] sm:$0xff]  ;;  %v3387_v14 = vld [vmem:[%s3260_s21 + $0x41] sm:$0xff]  ;;  %v2768_v17 = vpack.c.bf16 %v357_v11, %v356_v10  ;;  %v2018_v33 = vld [vmem:[%s3851_s1 + $0x350] sm:$0xff] }
  0x1a   : > { %2743 = vmatpush3.bf16.msra.mxu1 %v2740_v30  ;;  %v3391_v15 = vld [vmem:[%s3260_s21 + $0x52] sm:$0xff]  ;;  %v3397_v18 = vld [vmem:[%s3260_s21 + $0x62] sm:$0xff]  ;;  %v2928_v19 = vpack.c.bf16 %v2015_v13, %v2014_v12 }
  0x1b   : > { %2745 = vmatprep.subr.bf16.mxu1 %v2744_v36  ;;  %v3394_v16 = vld [vmem:[%s3260_s21 + $0x51] sm:$0xff]  ;;  %v358_v20 = vld [vmem:[%s3851_s1 + $0x40] sm:$0xff]  ;;  %v359_v21 = vld [vmem:[%s3851_s1 + $0x48] sm:$0xff] }
  0x1c   : > { %2903 = vmatpush3.bf16.msra.mxu0 %v2900_v31  ;;  %v2016_v22 = vld [vmem:[%s3851_s1 + $0x340] sm:$0xff]  ;;  %v2017_v23 = vld [vmem:[%s3851_s1 + $0x348] sm:$0xff]  ;;  %v3419_v25 = vld [vmem:[%s3260_s21 + $0x72] sm:$0xff]  ;;  %v2772_v27 = vpack.c.bf16 %v359_v21, %v358_v20 }
  0x1d   : > { %2905 = vmatprep.subr.bf16.mxu0 %v2904_v37  ;;  %v3415_v24 = vld [vmem:[%s3260_s21 + $0x61] sm:$0xff]  ;;  %v3422_v26 = vld [vmem:[%s3260_s21 + $0x71] sm:$0xff]  ;;  %v2932_v30 = vpack.c.bf16 %v2017_v23, %v2016_v22 }
  0x1e   : > { %2747 = vmatpush3.bf16.msra.mxu1 %v2744_v36  ;;  %v3425_v28 = vld [vmem:[%s3260_s21 + $0x82] sm:$0xff]  ;;  %v360_v31 = vld [vmem:[%s3851_s1 + $0x50] sm:$0xff]  ;;  %v361_v32 = vld [vmem:[%s3851_s1 + $0x58] sm:$0xff] }
  0x1f   : > { %2749 = vmatprep.subr.bf16.mxu1 %v2748_v42  ;;  %v2019_v34 = vld [vmem:[%s3851_s1 + $0x358] sm:$0xff]  ;;  %v342_v35 = vld [vmem:[%s3260_s21] sm:$0xff]  ;;  %v363_v40 = vld [vmem:[%s3851_s1 + $0x68] sm:$0xff] }
  0x20   : > { %2907 = vmatpush3.bf16.msra.mxu0 %v2904_v37  ;;  %v3445_v36 = vld [vmem:[%s3260_s21 + $0x20] sm:$0xff]  ;;  %v2776_v37 = vpack.c.bf16 %v361_v32, %v360_v31  ;;  %v2936_v38 = vpack.c.bf16 %v2019_v34, %v2018_v33  ;;  %v364_v45 = vld [vmem:[%s3851_s1 + $0x70] sm:$0xff]  ;;  %v365_v46 = vld [vmem:[%s3851_s1 + $0x78] sm:$0xff] }
  0x21   : > { %2909 = vmatprep.subr.bf16.mxu0 %v2908_v43  ;;  %v362_v39 = vld [vmem:[%s3851_s1 + $0x60] sm:$0xff]  ;;  %v2022_v47 = vld [vmem:[%s3851_s1 + $0x370] sm:$0xff]  ;;  %v1913_v52 = vld [vmem:[%s3851_s1 + $0x108] sm:$0xff] }
  0x22   : > { %2751 = vmatpush3.bf16.msra.mxu1 %v2748_v42  ;;  %v2020_v41 = vld [vmem:[%s3851_s1 + $0x360] sm:$0xff]  ;;  %v2021_v42 = vld [vmem:[%s3851_s1 + $0x368] sm:$0xff]  ;;  %v1914_v57 = vld [vmem:[%s3851_s1 + $0x110] sm:$0xff] }
  0x23   : > { %2753 = vmatprep.subr.bf16.mxu1 %v2752_v48  ;;  %v2940_v44 = vpack.c.bf16 %v2021_v42, %v2020_v41  ;;  %v1912_v51 = vld [vmem:[%s3851_s1 + $0x100] sm:$0xff]  ;;  %v1915_v58 = vld [vmem:[%s3851_s1 + $0x118] sm:$0xff]  ;;  %v2034_v59 = vld [vmem:[%s3851_s1 + $0x390] sm:$0xff] }
  0x24   : > { %2911 = vmatpush3.bf16.msra.mxu0 %v2908_v43  ;;  %v2780_v43 = vpack.c.bf16 %v363_v40, %v362_v39  ;;  %v2032_v53 = vld [vmem:[%s3851_s1 + $0x380] sm:$0xff]  ;;  %v3500_v0 = vld [vmem:[%s3260_s21 + $0x30] sm:$0xff]  ;;  %v2792_v1 = vpack.c.bf16 %v1915_v58, %v1914_v57  ;;  %v2037_v10 = vld [vmem:[%s3851_s1 + $0x3a8] sm:$0xff] }
  0x25   : > { %2913 = vmatprep.subr.bf16.mxu0 %v2912_v49  ;;  %v1916_v3 = vld [vmem:[%s3851_s1 + $0x120] sm:$0xff]  ;;  %v3520_v13 = vld [vmem:[%s3260_s21 + $0x50] sm:$0xff]  ;;  %v1919_v20 = vld [vmem:[%s3851_s1 + $0x138] sm:$0xff] }
  0x26   : > { %2755 = vmatpush3.bf16.msra.mxu1 %v2752_v48  ;;  %v2023_v48 = vld [vmem:[%s3851_s1 + $0x378] sm:$0xff]  ;;  %v3517_v11 = vld [vmem:[%s3260_s21 + $0x40] sm:$0xff]  ;;  %v2038_v21 = vld [vmem:[%s3851_s1 + $0x3b0] sm:$0xff] }
  0x27   : > { %2757 = vmatprep.subr.bf16.mxu1 %v2756_v54  ;;  %v2944_v50 = vpack.c.bf16 %v2023_v48, %v2022_v47  ;;  %v2039_v22 = vld [vmem:[%s3851_s1 + $0x3b8] sm:$0xff]  ;;  %v3539_v23 = vld [vmem:[%s3260_s21 + $0x60] sm:$0xff]  ;;  %v1921_v33 = vld [vmem:[%s3851_s1 + $0x148] sm:$0xff] }
  0x28   : > { %2915 = vmatpush3.bf16.msra.mxu0 %v2912_v49  ;;  %v2784_v49 = vpack.c.bf16 %v365_v46, %v364_v45  ;;  %v2960_v31 = vpack.c.bf16 %v2039_v22, %v2038_v21  ;;  %v1920_v32 = vld [vmem:[%s3851_s1 + $0x140] sm:$0xff]  ;;  %v2007_v39 = vld [vmem:[%s3260_s21 + $0x90] sm:$0xff]  ;;  %v1923_v42 = vld [vmem:[%s3851_s1 + $0x158] sm:$0xff] }
  0x29   : > { %2917 = vmatprep.subr.bf16.mxu0 %v2916_v55  ;;  %2345 = vmatmul.mubr.f32.vlgmr.msra.gmra.mrb[0].mxu1 %v3340_v60  ;;  %v2040_v34 = vld [vmem:[%s3851_s1 + $0x3c0] sm:$0xff]  ;;  %v1922_v41 = vld [vmem:[%s3851_s1 + $0x150] sm:$0xff]  ;;  %v2047_v57 = vld [vmem:[%s3851_s1 + $0x3f8] sm:$0xff] }
  0x2a   : > { %2759 = vmatpush3.bf16.msra.mxu1 %v2756_v54  ;;  %2347 = vmatprep.mubr.f32.mxu1 %v3359_v4  ;;  %v2033_v54 = vld [vmem:[%s3851_s1 + $0x388] sm:$0xff]  ;;  %v2808_v46 = vpack.c.bf16 %v1923_v42, %v1922_v41  ;;  %v1924_v48 = vld [vmem:[%s3851_s1 + $0x160] sm:$0xff] }
  0x2b   : > { %2565 = vmatmul.mubr.f32.vlgmr.msra.gmra.mrb[0].mxu0 %v3343_v61  ;;  %2761 = vmatprep.subr.bf16.mxu1 %v2760_v62  ;;  %v2948_v56 = vpack.c.bf16 %v2033_v54, %v2032_v53  ;;  %v601_v45 = vld [vmem:[%s3260_s21 + $0x2] sm:$0xff]  ;;  %v1926_v54 = vld [vmem:[%s3851_s1 + $0x170] sm:$0xff] }
  0x2c   : > { %2919 = vmatpush3.bf16.msra.mxu0 %v2916_v55  ;;  %2567 = vmatprep.mubr.f32.mxu0 %v3363_v5  ;;  %v2788_v55 = vpack.c.bf16 %v1913_v52, %v1912_v51  ;;  %v2045_v51 = vld [vmem:[%s3851_s1 + $0x3e8] sm:$0xff]  ;;  %v1940_v22 = vld [vmem:[%s3851_s1 + $0x1a0] sm:$0xff] }
  0x2d   : > { %2921 = vmatprep.subr.bf16.mxu0 %v2920_v63  ;;  %2348 = vmatmul.mubr.f32.gmra.mrb[2].mxu1 %v3366_v6  ;;  %v1944_v42 = vld [vmem:[%s3851_s1 + $0x1c0] sm:$0xff] }
  0x2e   : > { %2763 = vmatpush3.bf16.msra.mxu1 %v2760_v62  ;;  %2350 = vmatprep.mubr.f32.mxu1 %v3387_v14  ;;  %v2035_v62 = vld [vmem:[%s3851_s1 + $0x398] sm:$0xff] }
  0x2f   : > { %2568 = vmatmul.mubr.f32.gmra.mrb[2].mxu0 %v3369_v8  ;;  %2765 = vmatprep.subr.bf16.mxu1 %v2764_v7  ;;  %v2952_v2 = vpack.c.bf16 %v2035_v62, %v2034_v59  ;;  %v1936_v62 = vld [vmem:[%s3851_s1 + $0x180] sm:$0xff] }
  0x30   : > { %2923 = vmatpush3.bf16.msra.mxu0 %v2920_v63  ;;  %2570 = vmatprep.mubr.f32.mxu0 %v3391_v15  ;;  %v3497_v63 = vld [vmem:[%s3260_s21 + $0x10] sm:$0xff] }
  0x31   : > { %2925 = vmatprep.subr.bf16.mxu0 %v2924_v9  ;;  %2351 = vmatmul.mubr.f32.gmra.mrb[4].mxu1 %v3394_v16 }
  0x32   : > { %2767 = vmatpush3.bf16.msra.mxu1 %v2764_v7  ;;  %2353 = vmatprep.mubr.f32.mxu1 %v3415_v24  ;;  %v1917_v7 = vld [vmem:[%s3851_s1 + $0x128] sm:$0xff] }
  0x33   : > { %2571 = vmatmul.mubr.f32.gmra.mrb[4].mxu0 %v3397_v18  ;;  %2769 = vmatprep.subr.bf16.mxu1 %v2768_v17  ;;  %v2796_v12 = vpack.c.bf16 %v1917_v7, %v1916_v3  ;;  %v2057_v3 = vld [vmem:[%s3851_s1 + $0x408] sm:$0xff] }
  0x34   : > { %2927 = vmatpush3.bf16.msra.mxu0 %v2924_v9  ;;  %2573 = vmatprep.mubr.f32.mxu0 %v3419_v25  ;;  %v2036_v9 = vld [vmem:[%s3851_s1 + $0x3a0] sm:$0xff] }
  0x35   : > { %2929 = vmatprep.subr.bf16.mxu0 %v2928_v19  ;;  %2354 = vmatmul.mubr.f32.gmra.mrb[6].mxu1 %v3422_v26 }
  0x36   : > { %2771 = vmatpush3.bf16.msra.mxu1 %v2768_v17  ;;  %2388 = vmatprep.mubr.f32.mxu1 %v342_v35  ;;  %v2956_v17 = vpack.c.bf16 %v2037_v10, %v2036_v9  ;;  %v2041_v35 = vld [vmem:[%s3851_s1 + $0x3c8] sm:$0xff]  ;;  %v1938_v10 = vld [vmem:[%s3851_s1 + $0x190] sm:$0xff] }
  0x37   : > { %2574 = vmatmul.mubr.f32.gmra.mrb[6].mxu0 %v3425_v28  ;;  %2773 = vmatprep.subr.bf16.mxu1 %v2772_v27  ;;  %v2964_v40 = vpack.c.bf16 %v2041_v35, %v2040_v34  ;;  %v1943_v35 = vld [vmem:[%s3851_s1 + $0x1b8] sm:$0xff] }
  0x38   : > { %2931 = vmatpush3.bf16.msra.mxu0 %v2928_v19  ;;  %2608 = vmatprep.mubr.f32.mxu0 %v3445_v36  ;;  %v1918_v19 = vld [vmem:[%s3851_s1 + $0x130] sm:$0xff] }
  0x39   : > { %2933 = vmatprep.subr.bf16.mxu0 %v2932_v30 }
  0x3a   : > { %2775 = vmatpush3.bf16.msra.mxu1 %v2772_v27  ;;  %v2800_v27 = vpack.c.bf16 %v1919_v20, %v1918_v19  ;;  %v2059_v19 = vld [vmem:[%s3851_s1 + $0x418] sm:$0xff] }
  0x3b   : > { %2777 = vmatprep.subr.bf16.mxu1 %v2776_v37 }
  0x3c   : > { %2935 = vmatpush3.bf16.msra.mxu0 %v2932_v30  ;;  %v3542_v30 = vld [vmem:[%s3260_s21 + $0x70] sm:$0xff] }
  0x3d   : > { %2937 = vmatprep.subr.bf16.mxu0 %v2936_v38 }
  0x3e   : > { %2779 = vmatpush3.bf16.msra.mxu1 %v2776_v37  ;;  %v3561_v37 = vld [vmem:[%s3260_s21 + $0x80] sm:$0xff] }
  0x3f   : > { %2781 = vmatprep.subr.bf16.mxu1 %v2780_v43 }
  0x40   : > { %2939 = vmatpush3.bf16.msra.mxu0 %v2936_v38  ;;  %v2804_v38 = vpack.c.bf16 %v1921_v33, %v1920_v32  ;;  %v2061_v32 = vld [vmem:[%s3851_s1 + $0x428] sm:$0xff] }
  0x41   : > { %2941 = vmatprep.subr.bf16.mxu0 %v2940_v44 }
  0x42   : > { %2783 = vmatpush3.bf16.msra.mxu1 %v2780_v43  ;;  %v2042_v43 = vld [vmem:[%s3851_s1 + $0x3d0] sm:$0xff] }
  0x43   : > { %2785 = vmatprep.subr.bf16.mxu1 %v2784_v49 }
  0x44   : > { %2943 = vmatpush3.bf16.msra.mxu0 %v2940_v44  ;;  %v2043_v44 = vld [vmem:[%s3851_s1 + $0x3d8] sm:$0xff] }
  0x45   : > { %2945 = vmatprep.subr.bf16.mxu0 %v2944_v50  ;;  %v2968_v47 = vpack.c.bf16 %v2043_v44, %v2042_v43  ;;  %v1945_v43 = vld [vmem:[%s3851_s1 + $0x1c8] sm:$0xff]  ;;  %v2064_v44 = vld [vmem:[%s3851_s1 + $0x440] sm:$0xff] }
  0x46   : > { %2787 = vmatpush3.bf16.msra.mxu1 %v2784_v49  ;;  %v1925_v49 = vld [vmem:[%s3851_s1 + $0x168] sm:$0xff] }
  0x47   : > { %2789 = vmatprep.subr.bf16.mxu1 %v2788_v55  ;;  %v2812_v52 = vpack.c.bf16 %v1925_v49, %v1924_v48  ;;  %v2031_v48 = vld [vmem:[%s3260_s21 + $0x91] sm:$0xff] }
  0x48   : > { %2947 = vmatpush3.bf16.msra.mxu0 %v2944_v50  ;;  %v2044_v50 = vld [vmem:[%s3851_s1 + $0x3e0] sm:$0xff] }
  0x49   : > { %2949 = vmatprep.subr.bf16.mxu0 %v2948_v56  ;;  %2389 = vmatmul.mubr.f32.vlgmr.msra.gmra.mrb[0].mxu1 %v3497_v63  ;;  %v2972_v53 = vpack.c.bf16 %v2045_v51, %v2044_v50  ;;  %v1946_v50 = vld [vmem:[%s3851_s1 + $0x1d0] sm:$0xff]  ;;  %v1947_v51 = vld [vmem:[%s3851_s1 + $0x1d8] sm:$0xff] }
  0x4a   : > { %2791 = vmatpush3.bf16.msra.mxu1 %v2788_v55  ;;  %2391 = vmatprep.mubr.f32.mxu1 %v3445_v36  ;;  %v1927_v55 = vld [vmem:[%s3851_s1 + $0x178] sm:$0xff] }
  0x4b   : > { %2609 = vmatmul.mubr.f32.vlgmr.msra.gmra.mrb[0].mxu0 %v3500_v0  ;;  %2793 = vmatprep.subr.bf16.mxu1 %v2792_v1  ;;  %v2816_v58 = vpack.c.bf16 %v1927_v55, %v1926_v54  ;;  %v2840_v54 = vpack.c.bf16 %v1947_v51, %v1946_v50 }
  0x4c   : > { %2951 = vmatpush3.bf16.msra.mxu0 %v2948_v56  ;;  %2611 = vmatprep.mubr.f32.mxu0 %v3517_v11  ;;  %v2046_v56 = vld [vmem:[%s3851_s1 + $0x3f0] sm:$0xff] }
  0x4d   : > { %2953 = vmatprep.subr.bf16.mxu0 %v2952_v2  ;;  %2392 = vmatmul.mubr.f32.gmra.mrb[2].mxu1 %v3500_v0  ;;  %v2976_v59 = vpack.c.bf16 %v2047_v57, %v2046_v56  ;;  %v1948_v56 = vld [vmem:[%s3851_s1 + $0x1e0] sm:$0xff]  ;;  %v1949_v57 = vld [vmem:[%s3851_s1 + $0x1e8] sm:$0xff] }
  0x4e   : > { %2795 = vmatpush3.bf16.msra.mxu1 %v2792_v1  ;;  %2394 = vmatprep.mubr.f32.mxu1 %v3517_v11  ;;  %v1937_v1 = vld [vmem:[%s3851_s1 + $0x188] sm:$0xff] }
  0x4f   : > { %2612 = vmatmul.mubr.f32.gmra.mrb[2].mxu0 %v3520_v13  ;;  %2797 = vmatprep.subr.bf16.mxu1 %v2796_v12  ;;  %v2820_v7 = vpack.c.bf16 %v1937_v1, %v1936_v62  ;;  %v2844_v62 = vpack.c.bf16 %v1949_v57, %v1948_v56 }
  0x50   : > { %2955 = vmatpush3.bf16.msra.mxu0 %v2952_v2  ;;  %2614 = vmatprep.mubr.f32.mxu0 %v3539_v23  ;;  %v2056_v2 = vld [vmem:[%s3851_s1 + $0x400] sm:$0xff] }
  0x51   : > { %2957 = vmatprep.subr.bf16.mxu0 %v2956_v17  ;;  %2395 = vmatmul.mubr.f32.gmra.mrb[4].mxu1 %v3520_v13  ;;  %v2980_v9 = vpack.c.bf16 %v2057_v3, %v2056_v2  ;;  %v1950_v2 = vld [vmem:[%s3851_s1 + $0x1f0] sm:$0xff]  ;;  %v1951_v3 = vld [vmem:[%s3851_s1 + $0x1f8] sm:$0xff] }
  0x52   : > { %2799 = vmatpush3.bf16.msra.mxu1 %v2796_v12  ;;  %2397 = vmatprep.mubr.f32.mxu1 %v3539_v23  ;;  %v1939_v12 = vld [vmem:[%s3851_s1 + $0x198] sm:$0xff] }
  0x53   : > { %2615 = vmatmul.mubr.f32.gmra.mrb[4].mxu0 %v3542_v30  ;;  %2801 = vmatprep.subr.bf16.mxu1 %v2800_v27  ;;  %v2824_v20 = vpack.c.bf16 %v1939_v12, %v1938_v10  ;;  %v1960_v10 = vld [vmem:[%s3851_s1 + $0x200] sm:$0xff]  ;;  %v1961_v12 = vld [vmem:[%s3851_s1 + $0x208] sm:$0xff] }
  0x54   : > { %2959 = vmatpush3.bf16.msra.mxu0 %v2956_v17  ;;  %2617 = vmatprep.mubr.f32.mxu0 %v3561_v37  ;;  %v2058_v17 = vld [vmem:[%s3851_s1 + $0x410] sm:$0xff] }
  0x55   : > { %2961 = vmatprep.subr.bf16.mxu0 %v2960_v31  ;;  %2398 = vmatmul.mubr.f32.gmra.mrb[6].mxu1 %v3542_v30  ;;  %v2984_v21 = vpack.c.bf16 %v2059_v19, %v2058_v17  ;;  %v1596_v17 = vld [vmem:[%s3855_s5] sm:$0xff]  ;;  %v1597_v19 = vld [vmem:[%s3855_s5 + $0x8] sm:$0xff] }
  0x56   : > { %2803 = vmatpush3.bf16.msra.mxu1 %v2800_v27  ;;  %2432 = vmatprep.mubr.f32.mxu1 %v601_v45  ;;  %v1941_v27 = vld [vmem:[%s3851_s1 + $0x1a8] sm:$0xff] }
  0x57   : > { %2618 = vmatmul.mubr.f32.gmra.mrb[6].mxu0 %v2007_v39  ;;  %2805 = vmatprep.subr.bf16.mxu1 %v2804_v38  ;;  %v2828_v33 = vpack.c.bf16 %v1941_v27, %v1940_v22  ;;  %v2063_v39 = vld [vmem:[%s3851_s1 + $0x438] sm:$0xff]  ;;  %v2065_v45 = vld [vmem:[%s3851_s1 + $0x448] sm:$0xff]  ;;  %v3012_v27 = vpack.c.bf16 %v1597_v19, %v1596_v17 }
  0x58   : > { %2963 = vmatpush3.bf16.msra.mxu0 %v2960_v31  ;;  %2652 = vmatprep.mubr.f32.mxu0 %v3359_v4  ;;  %v2060_v31 = vld [vmem:[%s3851_s1 + $0x420] sm:$0xff]  ;;  %v2996_v49 = vpack.c.bf16 %v2065_v45, %v2064_v44  ;;  %v1963_v22 = vld [vmem:[%s3851_s1 + $0x218] sm:$0xff]  ;;  %v1594_v44 = vld [vmem:[%s3770_s29 + $0x30] sm:$0xff] }
  0x59   : > { %2965 = vmatprep.subr.bf16.mxu0 %v2964_v40  ;;  %v2988_v34 = vpack.c.bf16 %v2061_v32, %v2060_v31  ;;  %v1964_v32 = vld [vmem:[%s3851_s1 + $0x220] sm:$0xff]  ;;  %v1595_v45 = vld [vmem:[%s3770_s29 + $0x38] sm:$0xff] }
  0x5a   : > { %2807 = vmatpush3.bf16.msra.mxu1 %v2804_v38  ;;  %v2062_v38 = vld [vmem:[%s3851_s1 + $0x430] sm:$0xff] }
  0x5b   : > { %2809 = vmatprep.subr.bf16.mxu1 %v2808_v46  ;;  %v2992_v41 = vpack.c.bf16 %v2063_v39, %v2062_v38  ;;  %v1972_v38 = vld [vmem:[%s3851_s1 + $0x260] sm:$0xff] }
  0x5c   : > { %2967 = vmatpush3.bf16.msra.mxu0 %v2964_v40 }
  0x5d   : > { %2969 = vmatprep.subr.bf16.mxu0 %v2968_v47 }
  0x5e   : > { %2811 = vmatpush3.bf16.msra.mxu1 %v2808_v46  ;;  %v3675_v46 = vld [vmem:[%s3260_s21 + $0x81] sm:$0xff] }
  0x5f   : > { %2813 = vmatprep.subr.bf16.mxu1 %v2812_v52 }
  0x60   : > { %2971 = vmatpush3.bf16.msra.mxu0 %v2968_v47  ;;  %v2836_v47 = vpack.c.bf16 %v1945_v43, %v1944_v42  ;;  %v1975_v42 = vld [vmem:[%s3851_s1 + $0x278] sm:$0xff] }
  0x61   : > { %2973 = vmatprep.subr.bf16.mxu0 %v2972_v53 }
  0x62   : > { %2815 = vmatpush3.bf16.msra.mxu1 %v2812_v52  ;;  %v2066_v52 = vld [vmem:[%s3851_s1 + $0x450] sm:$0xff] }
  0x63   : > { %2817 = vmatprep.subr.bf16.mxu1 %v2816_v58 }
  0x64   : > { %2975 = vmatpush3.bf16.msra.mxu0 %v2972_v53  ;;  %v2067_v53 = vld [vmem:[%s3851_s1 + $0x458] sm:$0xff] }
  0x65   : > { %2977 = vmatprep.subr.bf16.mxu0 %v2976_v59  ;;  %v3000_v55 = vpack.c.bf16 %v2067_v53, %v2066_v52 }
  0x66   : > { %2819 = vmatpush3.bf16.msra.mxu1 %v2816_v58  ;;  %v2068_v58 = vld [vmem:[%s3851_s1 + $0x460] sm:$0xff] }
  0x67   : > { %2821 = vmatprep.subr.bf16.mxu1 %v2820_v7 }
  0x68   : > { %2979 = vmatpush3.bf16.msra.mxu0 %v2976_v59  ;;  %v2069_v59 = vld [vmem:[%s3851_s1 + $0x468] sm:$0xff] }
  0x69   : > { %2981 = vmatprep.subr.bf16.mxu0 %v2980_v9  ;;  %2433 = vmatmul.mubr.f32.vlgmr.msra.gmra.mrb[0].mxu1 %v3276_v29  ;;  %v1942_v29 = vld [vmem:[%s3851_s1 + $0x1b0] sm:$0xff]  ;;  %v3004_v1 = vpack.c.bf16 %v2069_v59, %v2068_v58 }
  0x6a   : > { %2823 = vmatpush3.bf16.msra.mxu1 %v2820_v7  ;;  %2435 = vmatprep.mubr.f32.mxu1 %v3343_v61  ;;  %v2832_v40 = vpack.c.bf16 %v1943_v35, %v1942_v29  ;;  %v2848_v7 = vpack.c.bf16 %v1951_v3, %v1950_v2  ;;  %v1966_v29 = vld [vmem:[%s3851_s1 + $0x230] sm:$0xff]  ;;  %v1967_v35 = vld [vmem:[%s3851_s1 + $0x238] sm:$0xff] }
  0x6b   : > { %2653 = vmatmul.mubr.f32.vlgmr.msra.gmra.mrb[0].mxu0 %v3366_v6  ;;  %2825 = vmatprep.subr.bf16.mxu1 %v2824_v20 }
  0x6c   : > { %2983 = vmatpush3.bf16.msra.mxu0 %v2980_v9  ;;  %2655 = vmatprep.mubr.f32.mxu0 %v3387_v14 }
  0x6d   : > { %2985 = vmatprep.subr.bf16.mxu0 %v2984_v21  ;;  %2436 = vmatmul.mubr.f32.gmra.mrb[2].mxu1 %v3363_v5 }
  0x6e   : > { %2827 = vmatpush3.bf16.msra.mxu1 %v2824_v20  ;;  %2438 = vmatprep.mubr.f32.mxu1 %v3369_v8  ;;  %v2852_v20 = vpack.c.bf16 %v1961_v12, %v1960_v10 }
  0x6f   : > { %2656 = vmatmul.mubr.f32.gmra.mrb[2].mxu0 %v3394_v16  ;;  %2829 = vmatprep.subr.bf16.mxu1 %v2828_v33 }
  0x70   : > { %2987 = vmatpush3.bf16.msra.mxu0 %v2984_v21  ;;  %2658 = vmatprep.mubr.f32.mxu0 %v3415_v24  ;;  %v1962_v21 = vld [vmem:[%s3851_s1 + $0x210] sm:$0xff] }
  0x71   : > { %2989 = vmatprep.subr.bf16.mxu0 %v2988_v34  ;;  %2439 = vmatmul.mubr.f32.gmra.mrb[4].mxu1 %v3391_v15  ;;  %v2856_v31 = vpack.c.bf16 %v1963_v22, %v1962_v21 }
  0x72   : > { %2831 = vmatpush3.bf16.msra.mxu1 %v2828_v33  ;;  %2441 = vmatprep.mubr.f32.mxu1 %v3397_v18  ;;  %v1965_v33 = vld [vmem:[%s3851_s1 + $0x228] sm:$0xff] }
  0x73   : > { %2659 = vmatmul.mubr.f32.gmra.mrb[4].mxu0 %v3422_v26  ;;  %2833 = vmatprep.subr.bf16.mxu1 %v2832_v40 }
  0x74   : > { %2991 = vmatpush3.bf16.msra.mxu0 %v2988_v34  ;;  %2661 = vmatprep.mubr.f32.mxu0 %v3675_v46  ;;  %v2860_v34 = vpack.c.bf16 %v1965_v33, %v1964_v32 }
  0x75   : > { %2993 = vmatprep.subr.bf16.mxu0 %v2992_v41  ;;  %2442 = vmatmul.mubr.f32.gmra.mrb[6].mxu1 %v3419_v25 }
  0x76   : > { %2835 = vmatpush3.bf16.msra.mxu1 %v2832_v40  ;;  %2476 = vmatprep.mubr.f32.mxu1 %v3497_v63  ;;  %v2071_v63 = vld [vmem:[%s3851_s1 + $0x478] sm:$0xff]  ;;  %v1592_v40 = vld [vmem:[%s3770_s29 + $0x20] sm:$0xff] }
  0x77   : > { %2662 = vmatmul.mubr.f32.gmra.mrb[6].mxu0 %v2031_v48  ;;  %2837 = vmatprep.subr.bf16.mxu1 %v2836_v47 }
  0x78   : > { %2995 = vmatpush3.bf16.msra.mxu0 %v2992_v41  ;;  %2696 = vmatprep.mubr.f32.mxu0 %v3343_v61  ;;  %v2070_v61 = vld [vmem:[%s3851_s1 + $0x470] sm:$0xff] }
  0x79   : > { %2997 = vmatprep.subr.bf16.mxu0 %v2996_v49  ;;  %v3008_v9 = vpack.c.bf16 %v2071_v63, %v2070_v61  ;;  %v1974_v41 = vld [vmem:[%s3851_s1 + $0x270] sm:$0xff] }
  0x7a   : > { %2839 = vmatpush3.bf16.msra.mxu1 %v2836_v47  ;;  %v2880_v43 = vpack.c.bf16 %v1975_v42, %v1974_v41 }
  0x7b   : > { %2841 = vmatprep.subr.bf16.mxu1 %v2840_v54 }
  0x7c   : > { %2999 = vmatpush3.bf16.msra.mxu0 %v2996_v49 }
  0x7d   : > { %3001 = vmatprep.subr.bf16.mxu0 %v3000_v55 }
  0x7e   : > { %2843 = vmatpush3.bf16.msra.mxu1 %v2840_v54 }
  0x7f   : > { %2845 = vmatprep.subr.bf16.mxu1 %v2844_v62 }
  0x80   : > { %3003 = vmatpush3.bf16.msra.mxu0 %v3000_v55 }
  0x81   : > { %3005 = vmatprep.subr.bf16.mxu0 %v3004_v1 }
  0x82   : > { %2847 = vmatpush3.bf16.msra.mxu1 %v2844_v62  ;;  %v1760_v62 = vstv %s1759_s22 }
  0x83   : > { %2849 = vmatprep.subr.bf16.mxu1 %v2848_v7 }
  0x84   : > { %3007 = vmatpush3.bf16.msra.mxu0 %v3004_v1 }
  0x85   : > { %3009 = vmatprep.subr.bf16.mxu0 %v3008_v9 }
  0x86   : > { %2851 = vmatpush3.bf16.msra.mxu1 %v2848_v7 }
  0x87   : > { %2853 = vmatprep.subr.bf16.mxu1 %v2852_v20 }
  0x88   : > { %3011 = vmatpush3.bf16.msra.mxu0 %v3008_v9 }
  0x89   : > { %3013 = vmatprep.subr.bf16.mxu0 %v3012_v27  ;;  %2477 = vmatmul.mubr.f32.vlgmr.msra.gmra.mrb[0].mxu1 %v3445_v36  ;;  %v1969_v36 = vld [vmem:[%s3851_s1 + $0x248] sm:$0xff] }
  0x8a   : > { %2855 = vmatpush3.bf16.msra.mxu1 %v2852_v20  ;;  %2479 = vmatprep.mubr.f32.mxu1 %v3500_v0  ;;  %v1588_v0 = vld [vmem:[%s3770_s29] sm:$0xff] }
  0x8b   : > { %2697 = vmatmul.mubr.f32.vlgmr.msra.gmra.mrb[0].mxu0 %v3363_v5  ;;  %2857 = vmatprep.subr.bf16.mxu1 %v2856_v31  ;;  %v2864_v5 = vpack.c.bf16 %v1967_v35, %v1966_v29 }
  0x8c   : > { %2699 = vmatprep.mubr.f32.mxu0 %v3369_v8  ;;  %3015 = vmatpush3.bf16.msra.mxu0 %v3012_v27  ;;  %v1968_v8 = vld [vmem:[%s3851_s1 + $0x240] sm:$0xff] }
  0x8d   : > { %2480 = vmatmul.mubr.f32.gmra.mrb[2].mxu1 %v3517_v11  ;;  %v1970_v11 = vld [vmem:[%s3851_s1 + $0x250] sm:$0xff] }
  0x8e   : > { %2859 = vmatpush3.bf16.msra.mxu1 %v2856_v31  ;;  %2482 = vmatprep.mubr.f32.mxu1 %v3520_v13  ;;  %v1971_v13 = vld [vmem:[%s3851_s1 + $0x258] sm:$0xff] }
  0x8f   : > { %2700 = vmatmul.mubr.f32.gmra.mrb[2].mxu0 %v3391_v15  ;;  %2861 = vmatprep.subr.bf16.mxu1 %v2860_v34  ;;  %v2055_v15 = vld [vmem:[%s3260_s21 + $0x92] sm:$0xff] }
  0x90   : > { %2702 = vmatprep.mubr.f32.mxu0 %v3397_v18  ;;  %v2868_v18 = vpack.c.bf16 %v1969_v36, %v1968_v8 }
  0x91   : > { %2483 = vmatmul.mubr.f32.gmra.mrb[4].mxu1 %v3539_v23  ;;  %v1590_v23 = vld [vmem:[%s3770_s29 + $0x10] sm:$0xff] }
  0x92   : > { %2863 = vmatpush3.bf16.msra.mxu1 %v2860_v34  ;;  %2485 = vmatprep.mubr.f32.mxu1 %v3542_v30  ;;  %v1973_v30 = vld [vmem:[%s3851_s1 + $0x268] sm:$0xff] }
  0x93   : > { %2703 = vmatmul.mubr.f32.gmra.mrb[4].mxu0 %v3419_v25  ;;  %2865 = vmatprep.subr.bf16.mxu1 %v2864_v5  ;;  %v1589_v25 = vld [vmem:[%s3770_s29 + $0x8] sm:$0xff]  ;;  %v2876_v39 = vpack.c.bf16 %v1973_v30, %v1972_v38 }
  0x94   : > { %2705 = vmatprep.mubr.f32.mxu0 %v3425_v28  ;;  %v2872_v28 = vpack.c.bf16 %v1971_v13, %v1970_v11 }
  0x95   : > { %2486 = vmatmul.mubr.f32.gmra.mrb[6].mxu1 %v3561_v37  ;;  %v1591_v37 = vld [vmem:[%s3770_s29 + $0x18] sm:$0xff] }
  0x96   : > { %2867 = vmatpush3.bf16.msra.mxu1 %v2864_v5  ;;  %2520 = vmatprep.mubr.f32.mxu1 %v3340_v60  ;;  %v1593_v60 = vld [vmem:[%s3770_s29 + $0x28] sm:$0xff] }
  0x97   : > { %2706 = vmatmul.mubr.f32.gmra.mrb[6].mxu0 %v2055_v15  ;;  %2869 = vmatprep.subr.bf16.mxu1 %v2868_v18 }
  0x98   : > { %2712 = vmatprep.mubr.msk.f32.mxu0 %vm1598_vm0, %v1588_v0 }
  0x9a   : > { %2871 = vmatpush3.bf16.msra.mxu1 %v2868_v18 }
  0x9b   : > { %2713 = vmatmul.mubr.msk.f32.vlgmr.msra.gmra.mrb[0].mxu0 %vm1598_vm0, %v1589_v25  ;;  %2873 = vmatprep.subr.bf16.mxu1 %v2872_v28 }
  0x9c   : > { %2715 = vmatprep.mubr.msk.f32.mxu0 %vm1598_vm0, %v1590_v23 }
  0x9e   : > { %2875 = vmatpush3.bf16.msra.mxu1 %v2872_v28 }
  0x9f   : > { %2716 = vmatmul.mubr.msk.f32.gmra.mrb[2].mxu0 %vm1598_vm0, %v1591_v37  ;;  %2877 = vmatprep.subr.bf16.mxu1 %v2876_v39 }
  0xa0   : > { %2718 = vmatprep.mubr.msk.f32.mxu0 %vm1598_vm0, %v1592_v40 }
  0xa2   : > { %2879 = vmatpush3.bf16.msra.mxu1 %v2876_v39 }
  0xa3   : > { %2719 = vmatmul.mubr.msk.f32.gmra.mrb[4].mxu0 %vm1598_vm0, %v1593_v60  ;;  %2881 = vmatprep.subr.bf16.mxu1 %v2880_v43 }
  0xa4   : > { %2721 = vmatprep.mubr.msk.f32.mxu0 %vm1598_vm0, %v1594_v44 }
  0xa6   : > { %2883 = vmatpush3.bf16.msra.mxu1 %v2880_v43 }
  0xa7   : > { %2722 = vmatmul.mubr.msk.f32.gmra.mrb[6].mxu0 %vm1598_vm0, %v1595_v45 }
  0xa9   : > { %2521 = vmatmul.mubr.f32.vlgmr.msra.gmra.mrb[0].mxu1 %v3359_v4 }
  0xaa   : > { %2523 = vmatprep.mubr.f32.mxu1 %v3366_v6  ;;  %v2072_v6 = vld [vmem:[%s3852_s2] ss:$0 sm:$0xff] }
  0xad   : > { %2524 = vmatmul.mubr.f32.gmra.mrb[2].mxu1 %v3387_v14 }
  0xae   : > { %2526 = vmatprep.mubr.f32.mxu1 %v3394_v16 }
  0xb1   : > { %2527 = vmatmul.mubr.f32.gmra.mrb[4].mxu1 %v3415_v24 }
  0xb2   : > { %2529 = vmatprep.mubr.f32.mxu1 %v3422_v26  ;;  %v2081_v26 = vld [vmem:[%s3856_s6] ss:$0 sm:$0xff] }
  0xb5   : > { %2530 = vmatmul.mubr.f32.gmra.mrb[6].mxu1 %v3675_v46 }
 0x16e   : > { %v2714_v47 = vpop.f32.mrb[0].mxu0 }
 0x16f   : > { %v1689_v48 = vpop.f32.mrb[1].mxu0 }
 0x172   : > { %v2717_v49 = vpop.f32.mrb[2].mxu0 }
 0x173   : > { %v1699_v50 = vpop.f32.mrb[3].mxu0 }
 0x176   : > { %v2720_v51 = vpop.f32.mrb[4].mxu0 }
 0x177   : > { %v1709_v52 = vpop.f32.mrb[5].mxu0 }
 0x17a   : > { %v2723_v53 = vpop.f32.mrb[6].mxu0 }
 0x17b   : > { %v1719_v4 = vpop.f32.mrb[7].mxu0 }
 0x17c   : > { %v2522_v14 = vpop.f32.mrb[0].mxu1 }
 0x17d   : > { %v3016_v16 = vadd.f32 %v2522_v14, %v2072_v6  ;;  %v971_v24 = vpop.f32.mrb[1].mxu1 }
 0x17e   : > { %v3018_v46 = vadd.f32 %v2072_v6, %v971_v24 }
 0x17f   : > { %v3017_v54 = vadd.f32 %v3016_v16, %v2714_v47 }
 0x180   : > { %v3019_v55 = vadd.f32 %v3018_v46, %v1689_v48  ;;  %v2525_v56 = vpop.f32.mrb[2].mxu1 }
 0x181   : > { %v1744_v57 = vadd.f32 %v3017_v54, %v2081_v26  ;;  %v3020_v58 = vadd.f32 %v2525_v56, %v2072_v6  ;;  %v981_v59 = vpop.f32.mrb[3].mxu1 }
 0x182   : > { %v1743_v1 = vadd.f32 %v3019_v55, %v2081_v26  ;;  %v3022_v2 = vadd.f32 %v2072_v6, %v981_v59 }
 0x183   : > { %v1752_v3 = vmax.f32 %v1744_v57, 0.0  ;;  %v3021_v61 = vadd.f32 %v3020_v58, %v2717_v49 }
 0x184   : > { %v1751_v63 = vmax.f32 %v1743_v1, 0.0  ;;  %v3023_v7 = vadd.f32 %v3022_v2, %v1699_v50  ;;  %v2528_v9 = vpop.f32.mrb[4].mxu1 }
 0x185   : > { %v1762_v10 = vmin.f32 %v1752_v3, %v1760_v62  ;;  %v1746_v12 = vadd.f32 %v3021_v61, %v2081_v26  ;;  %v3024_v17 = vadd.f32 %v2528_v9, %v2072_v6  ;;  %v991_v19 = vpop.f32.mrb[5].mxu1 }
 0x186   : > { %v1761_v20 = vmin.f32 %v1751_v63, %v1760_v62  ;;  %v1745_v21 = vadd.f32 %v3023_v7, %v2081_v26  ;;  %v3026_v22 = vadd.f32 %v2072_v6, %v991_v19 }
 0x187   : > { %1770 = vst [vmem:[%s3831_s30 + $0x8] sm:$0xff] %v1762_v10  ;;  %v1754_v27 = vmax.f32 %v1746_v12, 0.0  ;;  %v3025_v31 = vadd.f32 %v3024_v17, %v2720_v51 }
 0x188   : > { %1769 = vst [vmem:[%s3831_s30] sm:$0xff] %v1761_v20  ;;  %v1753_v32 = vmax.f32 %v1745_v21, 0.0  ;;  %v3027_v33 = vadd.f32 %v3026_v22, %v1709_v52  ;;  %v2531_v34 = vpop.f32.mrb[6].mxu1 }
 0x189   : > { %v1764_v29 = vmin.f32 %v1754_v27, %v1760_v62  ;;  %v1748_v35 = vadd.f32 %v3025_v31, %v2081_v26  ;;  %v3028_v5 = vadd.f32 %v2531_v34, %v2072_v6  ;;  %v1001_v8 = vpop.f32.mrb[7].mxu1 }
 0x18a   : > { %v1763_v36 = vmin.f32 %v1753_v32, %v1760_v62  ;;  %v1747_v15 = vadd.f32 %v3027_v33, %v2081_v26  ;;  %v3030_v18 = vadd.f32 %v2072_v6, %v1001_v8 }
 0x18b   : > { %1772 = vst [vmem:[%s3831_s30 + $0x18] sm:$0xff] %v1764_v29  ;;  %v1756_v0 = vmax.f32 %v1748_v35, 0.0  ;;  %v3029_v11 = vadd.f32 %v3028_v5, %v2723_v53 }
 0x18c   : > { %1771 = vst [vmem:[%s3831_s30 + $0x10] sm:$0xff] %v1763_v36  ;;  %v1755_v13 = vmax.f32 %v1747_v15, 0.0  ;;  %v3031_v25 = vadd.f32 %v3030_v18, %v1719_v4 }
 0x18d   : > { %v1766_v28 = vmin.f32 %v1756_v0, %v1760_v62  ;;  %v1750_v23 = vadd.f32 %v3029_v11, %v2081_v26 }
 0x18e   : > { %v1765_v38 = vmin.f32 %v1755_v13, %v1760_v62  ;;  %v1749_v30 = vadd.f32 %v3031_v25, %v2081_v26 }
 0x18f   : > { %1774 = vst [vmem:[%s3831_s30 + $0x28] sm:$0xff] %v1766_v28  ;;  %v1758_v37 = vmax.f32 %v1750_v23, 0.0 }
 0x190   : > { %1773 = vst [vmem:[%s3831_s30 + $0x20] sm:$0xff] %v1765_v38  ;;  %v1757_v39 = vmax.f32 %v1749_v30, 0.0 }
 0x191   : > { %v1768_v40 = vmin.f32 %v1758_v37, %v1760_v62 }
 0x192   : > { %v1767_v41 = vmin.f32 %v1757_v39, %v1760_v62 }
 0x193   : > { %1776 = vst [vmem:[%s3831_s30 + $0x38] sm:$0xff] %v1768_v40 }
 0x194   : > { %1775 = vst [vmem:[%s3831_s30 + $0x30] sm:$0xff] %v1767_v41 }
 0x195 PF: > { %s18_s28 = sadd.s32 1, %s3143_s28   ;;  %s3858_s26 = smov %s3139_s27 }
 0x196   : > { %p15_p5 = scmp.ge.s32.totalorder %s18_s28, 4   ;;  %s3859_s27 = smov %s3861_s3 }
 0x198   :  { %17 = sbr.rel (!%p15_p5) target bundleno = 2 (0x2), region = 92 }

// kernel: _lambda_.9
= control target key start
LH: loop header
LB: loop body
LE: loop exit
PB: predicated region body
PF: predicated region fallthrough
CT: control target
= control target key end

     0   :  { %s2938_s20 = smov 0   ;;  %s2940_s21 = smov 0   ;;  %s3579_s0 = inlined_call_operand.vmem [shape: f32[2,10,10,128], index: 0, kind: input, shape index: {}]   ;;  %s3580_s1 = inlined_call_operand.vmem [shape: f32[3,3,128,128], index: 1, kind: input, shape index: {}]   ;;  %s3581_s2 = inlined_call_operand.vmem [shape: f32[1,128], index: 2, kind: input, shape index: {}]   ;;  %s3582_s3 = inlined_call_operand.<no memory space> [shape: f32[1], index: 3, kind: input, shape index: {}]   ;;  %s3583_s4 = inlined_call_operand.vmem [shape: f32[2,8,8,128], index: 4, kind: input, shape index: {}]   ;;  %s3584_s5 = inlined_call_operand.vmem [shape: f32[2,8,8,128], index: 5, kind: output, shape index: {}]  }
   0x1   :  { %10 = sst [smem:[#allocation2]] %s3582_s3  ;;  %s2942_s22 = smov 0  }
   0x2 LB: > { %s28_s3 = sadd.s32 1, %s2899_s21  ;;  %p1689_p0 = scmp.ge.s32.totalorder %s2903_s22, 1  ;;  %s2903_s22 = sphi %s2942_s22, %s16_s22   ;;  %s2899_s21 = sphi %s2940_s21, %s3586_s21   ;;  %s2895_s20 = sphi %s2938_s20, %s3585_s20  }
   0x3   : > { %p30_p1 = scmp.ge.s32.totalorder %s28_s3, 2  ;;  %p219_p2 = scmp.lt.s32.totalorder %s2903_s22, 3 }
   0x5   : > { %s3588_s3 = smov (%p30_p1, %s28_s3), 0  ;;  %p220_p3 = pnand %p1689_p0, %p219_p2 }
   0x6   : > { %v1695_v0 = vld [vmem:[%s3580_s1 + $0x80] sm:$0xff] (!%p220_p3)  ;;  %v1696_v1 = vld [vmem:[%s3580_s1 + $0x88] sm:$0xff] (!%p220_p3)  ;;  %p260_p4 = scmp.lt.s32.totalorder (!%p220_p3), %s2895_s20, 1  ;;  %v1697_v5 = vld [vmem:[%s3580_s1 + $0x90] sm:$0xff] (!%p220_p3)  ;;  %s1558_s16 = sld [smem:[#allocation2]] (!%p220_p3) }
   0x7   : > { %223 = sbr.rel (%p220_p3) target bundleno = 399 (0x18f), region = 40  ;;  %v1759_v2 = vld [vmem:[%s3580_s1 + $0x200] sm:$0xff] (!%p220_p3)  ;;  %v2488_v3 = vpack.c.bf16 (!%p220_p3), %v1696_v1, %v1695_v0  ;;  %v1760_v4 = vld [vmem:[%s3580_s1 + $0x208] sm:$0xff] (!%p220_p3)  ;;  %v1698_v6 = vld [vmem:[%s3580_s1 + $0x98] sm:$0xff] (!%p220_p3) }
   0x8   : > { %v2616_v7 = vpack.c.bf16 (!%p220_p3), %v1760_v4, %v1759_v2  ;;  %v2492_v8 = vpack.c.bf16 (!%p220_p3), %v1698_v6, %v1697_v5  ;;  %v1761_v9 = vld [vmem:[%s3580_s1 + $0x210] sm:$0xff] (!%p220_p3)  ;;  %v1762_v10 = vld [vmem:[%s3580_s1 + $0x218] sm:$0xff] (!%p220_p3)  ;;  %v1699_v11 = vld [vmem:[%s3580_s1 + $0xa0] sm:$0xff] (!%p220_p3) }
   0x9   : > { %2489 = vmatprep.subr.bf16.mxu1 (!%p220_p3), %v2488_v3  ;;  %v2620_v12 = vpack.c.bf16 (!%p220_p3), %v1762_v10, %v1761_v9  ;;  %v1700_v13 = vld [vmem:[%s3580_s1 + $0xa8] sm:$0xff] (!%p220_p3)  ;;  %v1763_v14 = vld [vmem:[%s3580_s1 + $0x220] sm:$0xff] (!%p220_p3)  ;;  %v1701_v18 = vld [vmem:[%s3580_s1 + $0xb0] sm:$0xff] (!%p220_p3) }
   0xa   : > { %v1764_v15 = vld [vmem:[%s3580_s1 + $0x228] sm:$0xff] (!%p220_p3)  ;;  %2617 = vmatprep.subr.bf16.mxu0 (!%p220_p3), %v2616_v7  ;;  %2491 = vmatpush3.bf16.msra.mxu1 (!%p220_p3), %v2488_v3  ;;  %v2496_v16 = vpack.c.bf16 (!%p220_p3), %v1700_v13, %v1699_v11  ;;  %v1702_v19 = vld [vmem:[%s3580_s1 + $0xb8] sm:$0xff] (!%p220_p3)  ;;  %v1765_v20 = vld [vmem:[%s3580_s1 + $0x230] sm:$0xff] (!%p220_p3) }
   0xb   : > { %2619 = vmatpush3.bf16.msra.mxu0 (!%p220_p3), %v2616_v7  ;;  %2493 = vmatprep.subr.bf16.mxu1 (!%p220_p3), %v2492_v8  ;;  %v2624_v17 = vpack.c.bf16 (!%p220_p3), %v1764_v15, %v1763_v14  ;;  %v1766_v21 = vld [vmem:[%s3580_s1 + $0x238] sm:$0xff] (!%p220_p3)  ;;  %v2500_v22 = vpack.c.bf16 (!%p220_p3), %v1702_v19, %v1701_v18  ;;  %v1703_v24 = vld [vmem:[%s3580_s1 + $0xc0] sm:$0xff] (!%p220_p3)  ;;  %v1704_v25 = vld [vmem:[%s3580_s1 + $0xc8] sm:$0xff] (!%p220_p3) }
   0xc   : > { %2621 = vmatprep.subr.bf16.mxu0 (!%p220_p3), %v2620_v12  ;;  %v2628_v23 = vpack.c.bf16 (!%p220_p3), %v1766_v21, %v1765_v20  ;;  %v1767_v27 = vld [vmem:[%s3580_s1 + $0x240] sm:$0xff] (!%p220_p3)  ;;  %v1768_v28 = vld [vmem:[%s3580_s1 + $0x248] sm:$0xff] (!%p220_p3)  ;;  %v2504_v30 = vpack.c.bf16 (!%p220_p3), %v1704_v25, %v1703_v24  ;;  %v1705_v32 = vld [vmem:[%s3580_s1 + $0xd0] sm:$0xff] (!%p220_p3) }
   0xd   : > { %v2632_v31 = vpack.c.bf16 (!%p220_p3), %v1768_v28, %v1767_v27  ;;  %v1706_v33 = vld [vmem:[%s3580_s1 + $0xd8] sm:$0xff] (!%p220_p3)  ;;  %v1769_v34 = vld [vmem:[%s3580_s1 + $0x250] sm:$0xff] (!%p220_p3)  ;;  %v1707_v38 = vld [vmem:[%s3580_s1 + $0xe0] sm:$0xff] (!%p220_p3) }
   0xe   : > { %s3590_s20 = smov (!%p260_p4, %s2895_s20), 1  ;;  %2495 = vmatpush3.bf16.msra.mxu1 %v2492_v8  ;;  %v1770_v35 = vld [vmem:[%s3580_s1 + $0x258] sm:$0xff]  ;;  %v2508_v36 = vpack.c.bf16 %v1706_v33, %v1705_v32  ;;  %v1708_v39 = vld [vmem:[%s3580_s1 + $0xe8] sm:$0xff]  ;;  %v1771_v40 = vld [vmem:[%s3580_s1 + $0x260] sm:$0xff] }
   0xf   : > { %s2856_s25 = smul.u32 160, %s3590_s20  ;;  %2623 = vmatpush3.bf16.msra.mxu0 %v2620_v12  ;;  %2497 = vmatprep.subr.bf16.mxu1 %v2496_v16  ;;  %v2636_v37 = vpack.c.bf16 %v1770_v35, %v1769_v34  ;;  %v1772_v41 = vld [vmem:[%s3580_s1 + $0x268] sm:$0xff]  ;;  %v2512_v42 = vpack.c.bf16 %v1708_v39, %v1707_v38  ;;  %v1709_v44 = vld [vmem:[%s3580_s1 + $0xf0] sm:$0xff]  ;;  %v1710_v45 = vld [vmem:[%s3580_s1 + $0xf8] sm:$0xff] }
  0x10   : > { %2625 = vmatprep.subr.bf16.mxu0 %v2624_v17  ;;  %v2640_v43 = vpack.c.bf16 %v1772_v41, %v1771_v40  ;;  %v1773_v46 = vld [vmem:[%s3580_s1 + $0x270] sm:$0xff]  ;;  %v1774_v47 = vld [vmem:[%s3580_s1 + $0x278] sm:$0xff]  ;;  %v2516_v48 = vpack.c.bf16 %v1710_v45, %v1709_v44  ;;  %v296_v50 = vld [vmem:[%s3580_s1] sm:$0xff] }
  0x11   : > { %s3010_s11 = scalar_lea.vmem %s3579_s0, %s2856_s25  ;;  %v2644_v49 = vpack.c.bf16 %v1774_v47, %v1773_v46  ;;  %v297_v51 = vld [vmem:[%s3580_s1 + $0x8] sm:$0xff]  ;;  %v1783_v52 = vld [vmem:[%s3580_s1 + $0x280] sm:$0xff]  ;;  %v298_v56 = vld [vmem:[%s3580_s1 + $0x10] sm:$0xff] }
  0x12   : > { %v312_v26 = vld [vmem:[%s3010_s11 + $0x1] sm:$0xff]  ;;  %v1751_v29 = vld [vmem:[%s3010_s11 + $0x11] sm:$0xff]  ;;  %2499 = vmatpush3.bf16.msra.mxu1 %v2496_v16  ;;  %v2520_v54 = vpack.c.bf16 %v297_v51, %v296_v50 }
  0x13   : > { %2124 = vmatprep.mubr.f32.mxu1 %v312_v26  ;;  %2300 = vmatprep.mubr.f32.mxu0 %v1751_v29  ;;  %v1784_v53 = vld [vmem:[%s3580_s1 + $0x288] sm:$0xff]  ;;  %v299_v57 = vld [vmem:[%s3580_s1 + $0x18] sm:$0xff]  ;;  %v1785_v58 = vld [vmem:[%s3580_s1 + $0x290] sm:$0xff] }
  0x14   : > { %2627 = vmatpush3.bf16.msra.mxu0 %v2624_v17  ;;  %2501 = vmatprep.subr.bf16.mxu1 %v2500_v22  ;;  %v2648_v55 = vpack.c.bf16 %v1784_v53, %v1783_v52  ;;  %v1786_v59 = vld [vmem:[%s3580_s1 + $0x298] sm:$0xff]  ;;  %v3087_v60 = vld [vmem:[%s3010_s11 + $0x21] sm:$0xff]  ;;  %v2524_v61 = vpack.c.bf16 %v299_v57, %v298_v56  ;;  %v302_v7 = vld [vmem:[%s3580_s1 + $0x30] sm:$0xff] }
  0x15   : > { %2629 = vmatprep.subr.bf16.mxu0 %v2628_v23  ;;  %v2652_v62 = vpack.c.bf16 %v1786_v59, %v1785_v58  ;;  %v300_v63 = vld [vmem:[%s3580_s1 + $0x20] sm:$0xff]  ;;  %v301_v0 = vld [vmem:[%s3580_s1 + $0x28] sm:$0xff]  ;;  %v3103_v3 = vld [vmem:[%s3010_s11 + $0x31] sm:$0xff] }
  0x16   : > { %2503 = vmatpush3.bf16.msra.mxu1 %v2500_v22  ;;  %v1787_v1 = vld [vmem:[%s3580_s1 + $0x2a0] sm:$0xff]  ;;  %v1788_v2 = vld [vmem:[%s3580_s1 + $0x2a8] sm:$0xff]  ;;  %v2528_v4 = vpack.c.bf16 %v301_v0, %v300_v63  ;;  %v303_v8 = vld [vmem:[%s3580_s1 + $0x38] sm:$0xff] }
  0x17   : > { %2505 = vmatprep.subr.bf16.mxu1 %v2504_v30  ;;  %v3106_v5 = vld [vmem:[%s3010_s11 + $0x41] sm:$0xff]  ;;  %v2656_v6 = vpack.c.bf16 %v1788_v2, %v1787_v1  ;;  %v1789_v9 = vld [vmem:[%s3580_s1 + $0x2b0] sm:$0xff]  ;;  %v1790_v10 = vld [vmem:[%s3580_s1 + $0x2b8] sm:$0xff]  ;;  %v2532_v12 = vpack.c.bf16 %v303_v8, %v302_v7 }
  0x18   : > { %2631 = vmatpush3.bf16.msra.mxu0 %v2628_v23  ;;  %v3125_v11 = vld [vmem:[%s3010_s11 + $0x51] sm:$0xff]  ;;  %v3128_v13 = vld [vmem:[%s3010_s11 + $0x61] sm:$0xff]  ;;  %v2660_v14 = vpack.c.bf16 %v1790_v10, %v1789_v9 }
  0x19   : > { %2633 = vmatprep.subr.bf16.mxu0 %v2632_v31  ;;  %v304_v15 = vld [vmem:[%s3580_s1 + $0x40] sm:$0xff]  ;;  %v305_v16 = vld [vmem:[%s3580_s1 + $0x48] sm:$0xff]  ;;  %v3147_v19 = vld [vmem:[%s3010_s11 + $0x71] sm:$0xff] }
  0x1a   : > { %2507 = vmatpush3.bf16.msra.mxu1 %v2504_v30  ;;  %v1791_v17 = vld [vmem:[%s3580_s1 + $0x2c0] sm:$0xff]  ;;  %v1792_v18 = vld [vmem:[%s3580_s1 + $0x2c8] sm:$0xff]  ;;  %v2536_v20 = vpack.c.bf16 %v305_v16, %v304_v15  ;;  %v306_v23 = vld [vmem:[%s3580_s1 + $0x50] sm:$0xff] }
  0x1b   : > { %2509 = vmatprep.subr.bf16.mxu1 %v2508_v36  ;;  %v3150_v21 = vld [vmem:[%s3010_s11 + $0x81] sm:$0xff]  ;;  %v2664_v22 = vpack.c.bf16 %v1792_v18, %v1791_v17  ;;  %v307_v24 = vld [vmem:[%s3580_s1 + $0x58] sm:$0xff]  ;;  %v1793_v25 = vld [vmem:[%s3580_s1 + $0x2d0] sm:$0xff] }
  0x1c   : > { %2635 = vmatpush3.bf16.msra.mxu0 %v2632_v31  ;;  %v1794_v26 = vld [vmem:[%s3580_s1 + $0x2d8] sm:$0xff]  ;;  %v288_v27 = vld [vmem:[%s3010_s11] sm:$0xff]  ;;  %v309_v32 = vld [vmem:[%s3580_s1 + $0x68] sm:$0xff] }
  0x1d   : > { %2637 = vmatprep.subr.bf16.mxu0 %v2636_v37  ;;  %v3170_v28 = vld [vmem:[%s3010_s11 + $0x12] sm:$0xff]  ;;  %v2668_v30 = vpack.c.bf16 %v1794_v26, %v1793_v25  ;;  %v308_v31 = vld [vmem:[%s3580_s1 + $0x60] sm:$0xff]  ;;  %v1796_v34 = vld [vmem:[%s3580_s1 + $0x2e8] sm:$0xff] }
  0x1e   : > { %2511 = vmatpush3.bf16.msra.mxu1 %v2508_v36  ;;  %v1795_v33 = vld [vmem:[%s3580_s1 + $0x2e0] sm:$0xff]  ;;  %v2544_v35 = vpack.c.bf16 %v309_v32, %v308_v31  ;;  %v311_v38 = vld [vmem:[%s3580_s1 + $0x78] sm:$0xff]  ;;  %v1797_v39 = vld [vmem:[%s3580_s1 + $0x2f0] sm:$0xff] }
  0x1f   : > { %2513 = vmatprep.subr.bf16.mxu1 %v2512_v42  ;;  %v2672_v36 = vpack.c.bf16 %v1796_v34, %v1795_v33  ;;  %v1798_v40 = vld [vmem:[%s3580_s1 + $0x2f8] sm:$0xff]  ;;  %v1712_v44 = vld [vmem:[%s3580_s1 + $0x108] sm:$0xff]  ;;  %v1807_v45 = vld [vmem:[%s3580_s1 + $0x300] sm:$0xff] }
  0x20   : > { %2639 = vmatpush3.bf16.msra.mxu0 %v2636_v37  ;;  %v310_v37 = vld [vmem:[%s3580_s1 + $0x70] sm:$0xff]  ;;  %v1808_v46 = vld [vmem:[%s3580_s1 + $0x308] sm:$0xff]  ;;  %v1714_v50 = vld [vmem:[%s3580_s1 + $0x118] sm:$0xff] }
  0x21   : > { %2641 = vmatprep.subr.bf16.mxu0 %v2640_v43  ;;  %v2548_v41 = vpack.c.bf16 %v311_v38, %v310_v37  ;;  %v1809_v51 = vld [vmem:[%s3580_s1 + $0x310] sm:$0xff]  ;;  %v1810_v52 = vld [vmem:[%s3580_s1 + $0x318] sm:$0xff]  ;;  %v1715_v57 = vld [vmem:[%s3580_s1 + $0x120] sm:$0xff] }
  0x22   : > { %2515 = vmatpush3.bf16.msra.mxu1 %v2512_v42  ;;  %v2676_v42 = vpack.c.bf16 %v1798_v40, %v1797_v39  ;;  %v3222_v53 = vld [vmem:[%s3010_s11 + $0x10] sm:$0xff]  ;;  %v2684_v56 = vpack.c.bf16 %v1810_v52, %v1809_v51  ;;  %v1716_v58 = vld [vmem:[%s3580_s1 + $0x128] sm:$0xff]  ;;  %v1811_v59 = vld [vmem:[%s3580_s1 + $0x320] sm:$0xff] }
  0x23   : > { %2517 = vmatprep.subr.bf16.mxu1 %v2516_v48  ;;  %v3245_v63 = vld [vmem:[%s3010_s11 + $0x32] sm:$0xff]  ;;  %v2560_v1 = vpack.c.bf16 %v1716_v58, %v1715_v57  ;;  %v3251_v2 = vld [vmem:[%s3010_s11 + $0x42] sm:$0xff] }
  0x24   : > { %2643 = vmatpush3.bf16.msra.mxu0 %v2640_v43  ;;  %v1711_v43 = vld [vmem:[%s3580_s1 + $0x100] sm:$0xff]  ;;  %v3248_v0 = vld [vmem:[%s3010_s11 + $0x30] sm:$0xff]  ;;  %v1718_v7 = vld [vmem:[%s3580_s1 + $0x138] sm:$0xff] }
  0x25   : > { %2645 = vmatprep.subr.bf16.mxu0 %v2644_v49  ;;  %v2552_v47 = vpack.c.bf16 %v1712_v44, %v1711_v43  ;;  %v1813_v8 = vld [vmem:[%s3580_s1 + $0x330] sm:$0xff]  ;;  %v1814_v9 = vld [vmem:[%s3580_s1 + $0x338] sm:$0xff]  ;;  %v3269_v10 = vld [vmem:[%s3010_s11 + $0x40] sm:$0xff] }
  0x26   : > { %2519 = vmatpush3.bf16.msra.mxu1 %v2516_v48  ;;  %v2680_v48 = vpack.c.bf16 %v1808_v46, %v1807_v45  ;;  %v3279_v16 = vld [vmem:[%s3010_s11 + $0x62] sm:$0xff]  ;;  %v2692_v17 = vpack.c.bf16 %v1814_v9, %v1813_v8  ;;  %v3301_v25 = vld [vmem:[%s3010_s11 + $0x72] sm:$0xff] }
  0x27   : > { %2521 = vmatprep.subr.bf16.mxu1 %v2520_v54  ;;  %v1719_v18 = vld [vmem:[%s3580_s1 + $0x140] sm:$0xff]  ;;  %v3304_v26 = vld [vmem:[%s3010_s11 + $0x70] sm:$0xff]  ;;  %v1722_v32 = vld [vmem:[%s3580_s1 + $0x158] sm:$0xff] }
  0x28   : > { %2647 = vmatpush3.bf16.msra.mxu0 %v2644_v49  ;;  %v1713_v49 = vld [vmem:[%s3580_s1 + $0x110] sm:$0xff]  ;;  %v1818_v34 = vld [vmem:[%s3580_s1 + $0x358] sm:$0xff]  ;;  %v1723_v38 = vld [vmem:[%s3580_s1 + $0x160] sm:$0xff] }
  0x29   : > { %2649 = vmatprep.subr.bf16.mxu0 %v2648_v55  ;;  %2125 = vmatmul.mubr.f32.vlgmr.msra.gmra.mrb[0].mxu1 %v1751_v29  ;;  %v2540_v29 = vpack.c.bf16 %v307_v24, %v306_v23  ;;  %v1816_v23 = vld [vmem:[%s3580_s1 + $0x348] sm:$0xff]  ;;  %v3297_v24 = vld [vmem:[%s3010_s11 + $0x60] sm:$0xff]  ;;  %v1721_v31 = vld [vmem:[%s3580_s1 + $0x150] sm:$0xff] }
  0x2a   : > { %2523 = vmatpush3.bf16.msra.mxu1 %v2520_v54  ;;  %2127 = vmatprep.mubr.f32.mxu1 %v3087_v60  ;;  %v3225_v54 = vld [vmem:[%s3010_s11 + $0x22] sm:$0xff]  ;;  %v1817_v33 = vld [vmem:[%s3580_s1 + $0x350] sm:$0xff]  ;;  %v1726_v45 = vld [vmem:[%s3580_s1 + $0x178] sm:$0xff] }
  0x2b   : > { %2301 = vmatmul.mubr.f32.vlgmr.msra.gmra.mrb[0].mxu0 %v3087_v60  ;;  %2525 = vmatprep.subr.bf16.mxu1 %v2524_v61  ;;  %v2700_v37 = vpack.c.bf16 %v1818_v34, %v1817_v33  ;;  %v1724_v39 = vld [vmem:[%s3580_s1 + $0x168] sm:$0xff]  ;;  %v1819_v40 = vld [vmem:[%s3580_s1 + $0x360] sm:$0xff]  ;;  %v1725_v44 = vld [vmem:[%s3580_s1 + $0x170] sm:$0xff] }
  0x2c   : > { %2651 = vmatpush3.bf16.msra.mxu0 %v2648_v55  ;;  %2303 = vmatprep.mubr.f32.mxu0 %v3103_v3  ;;  %v2556_v55 = vpack.c.bf16 %v1714_v50, %v1713_v49  ;;  %v1821_v46 = vld [vmem:[%s3580_s1 + $0x370] sm:$0xff]  ;;  %v1735_v50 = vld [vmem:[%s3580_s1 + $0x180] sm:$0xff]  ;;  %v1736_v51 = vld [vmem:[%s3580_s1 + $0x188] sm:$0xff] }
  0x2d   : > { %2653 = vmatprep.subr.bf16.mxu0 %v2652_v62  ;;  %2128 = vmatmul.mubr.f32.gmra.mrb[2].mxu1 %v3103_v3  ;;  %v1831_v52 = vld [vmem:[%s3580_s1 + $0x380] sm:$0xff]  ;;  %v1737_v58 = vld [vmem:[%s3580_s1 + $0x190] sm:$0xff]  ;;  %v1740_v8 = vld [vmem:[%s3580_s1 + $0x1a8] sm:$0xff] }
  0x2e   : > { %2527 = vmatpush3.bf16.msra.mxu1 %v2524_v61  ;;  %2130 = vmatprep.mubr.f32.mxu1 %v3106_v5  ;;  %v1812_v61 = vld [vmem:[%s3580_s1 + $0x328] sm:$0xff]  ;;  %v1835_v9 = vld [vmem:[%s3580_s1 + $0x3a0] sm:$0xff] }
  0x2f   : > { %2304 = vmatmul.mubr.f32.gmra.mrb[2].mxu0 %v3106_v5  ;;  %2529 = vmatprep.subr.bf16.mxu1 %v2528_v4  ;;  %v1839_v33 = vld [vmem:[%s3580_s1 + $0x3c0] sm:$0xff]  ;;  %v1840_v34 = vld [vmem:[%s3580_s1 + $0x3c8] sm:$0xff] }
  0x30   : > { %2655 = vmatpush3.bf16.msra.mxu0 %v2652_v62  ;;  %2306 = vmatprep.mubr.f32.mxu0 %v3125_v11  ;;  %v3241_v62 = vld [vmem:[%s3010_s11 + $0x20] sm:$0xff] }
  0x31   : > { %2657 = vmatprep.subr.bf16.mxu0 %v2656_v6  ;;  %2131 = vmatmul.mubr.f32.gmra.mrb[4].mxu1 %v3125_v11 }
  0x32   : > { %2531 = vmatpush3.bf16.msra.mxu1 %v2528_v4  ;;  %2133 = vmatprep.mubr.f32.mxu1 %v3128_v13  ;;  %v2688_v4 = vpack.c.bf16 %v1812_v61, %v1811_v59  ;;  %v1738_v59 = vld [vmem:[%s3580_s1 + $0x198] sm:$0xff]  ;;  %v1833_v61 = vld [vmem:[%s3580_s1 + $0x390] sm:$0xff] }
  0x33   : > { %2307 = vmatmul.mubr.f32.gmra.mrb[4].mxu0 %v3128_v13  ;;  %2533 = vmatprep.subr.bf16.mxu1 %v2532_v12 }
  0x34   : > { %2659 = vmatpush3.bf16.msra.mxu0 %v2656_v6  ;;  %2309 = vmatprep.mubr.f32.mxu0 %v3147_v19  ;;  %v1717_v6 = vld [vmem:[%s3580_s1 + $0x130] sm:$0xff] }
  0x35   : > { %2661 = vmatprep.subr.bf16.mxu0 %v2660_v14  ;;  %2134 = vmatmul.mubr.f32.gmra.mrb[6].mxu1 %v3147_v19  ;;  %v2564_v15 = vpack.c.bf16 %v1718_v7, %v1717_v6  ;;  %v1739_v7 = vld [vmem:[%s3580_s1 + $0x1a0] sm:$0xff] }
  0x36   : > { %2535 = vmatpush3.bf16.msra.mxu1 %v2532_v12  ;;  %2168 = vmatprep.mubr.f32.mxu1 %v288_v27  ;;  %v3273_v12 = vld [vmem:[%s3010_s11 + $0x52] sm:$0xff] }
  0x37   : > { %2310 = vmatmul.mubr.f32.gmra.mrb[6].mxu0 %v3150_v21  ;;  %2537 = vmatprep.subr.bf16.mxu1 %v2536_v20 }
  0x38   : > { %2663 = vmatpush3.bf16.msra.mxu0 %v2660_v14  ;;  %2344 = vmatprep.mubr.f32.mxu0 %v3170_v28  ;;  %v3276_v14 = vld [vmem:[%s3010_s11 + $0x50] sm:$0xff] }
  0x39   : > { %2665 = vmatprep.subr.bf16.mxu0 %v2664_v22 }
  0x3a   : > { %2539 = vmatpush3.bf16.msra.mxu1 %v2536_v20  ;;  %v1720_v20 = vld [vmem:[%s3580_s1 + $0x148] sm:$0xff] }
  0x3b   : > { %2541 = vmatprep.subr.bf16.mxu1 %v2540_v29  ;;  %v2568_v27 = vpack.c.bf16 %v1720_v20, %v1719_v18  ;;  %v1742_v20 = vld [vmem:[%s3580_s1 + $0x1b8] sm:$0xff] }
  0x3c   : > { %2667 = vmatpush3.bf16.msra.mxu0 %v2664_v22  ;;  %v1815_v22 = vld [vmem:[%s3580_s1 + $0x340] sm:$0xff] }
  0x3d   : > { %2669 = vmatprep.subr.bf16.mxu0 %v2668_v30 }
  0x3e   : > { %2543 = vmatpush3.bf16.msra.mxu1 %v2540_v29  ;;  %v3307_v29 = vld [vmem:[%s3010_s11 + $0x82] sm:$0xff] }
  0x3f   : > { %2545 = vmatprep.subr.bf16.mxu1 %v2544_v35 }
  0x40   : > { %2671 = vmatpush3.bf16.msra.mxu0 %v2668_v30  ;;  %v2696_v30 = vpack.c.bf16 %v1816_v23, %v1815_v22  ;;  %v1837_v22 = vld [vmem:[%s3580_s1 + $0x3b0] sm:$0xff]  ;;  %v1838_v23 = vld [vmem:[%s3580_s1 + $0x3b8] sm:$0xff] }
  0x41   : > { %2673 = vmatprep.subr.bf16.mxu0 %v2672_v36 }
  0x42   : > { %2547 = vmatpush3.bf16.msra.mxu1 %v2544_v35  ;;  %v547_v35 = vld [vmem:[%s3010_s11 + $0x2] sm:$0xff] }
  0x43   : > { %2549 = vmatprep.subr.bf16.mxu1 %v2548_v41 }
  0x44   : > { %2675 = vmatpush3.bf16.msra.mxu0 %v2672_v36  ;;  %v2572_v36 = vpack.c.bf16 %v1722_v32, %v1721_v31  ;;  %v1743_v31 = vld [vmem:[%s3580_s1 + $0x1c0] sm:$0xff]  ;;  %v1744_v32 = vld [vmem:[%s3580_s1 + $0x1c8] sm:$0xff] }
  0x45   : > { %2677 = vmatprep.subr.bf16.mxu0 %v2676_v42 }
  0x46   : > { %2551 = vmatpush3.bf16.msra.mxu1 %v2548_v41  ;;  %v1820_v41 = vld [vmem:[%s3580_s1 + $0x368] sm:$0xff] }
  0x47   : > { %2553 = vmatprep.subr.bf16.mxu1 %v2552_v47  ;;  %v2704_v43 = vpack.c.bf16 %v1820_v41, %v1819_v40  ;;  %v1746_v40 = vld [vmem:[%s3580_s1 + $0x1d8] sm:$0xff]  ;;  %v1841_v41 = vld [vmem:[%s3580_s1 + $0x3d0] sm:$0xff] }
  0x48   : > { %2679 = vmatpush3.bf16.msra.mxu0 %v2676_v42  ;;  %v2576_v42 = vpack.c.bf16 %v1724_v39, %v1723_v38  ;;  %v2728_v38 = vpack.c.bf16 %v1840_v34, %v1839_v33  ;;  %v1745_v39 = vld [vmem:[%s3580_s1 + $0x1d0] sm:$0xff] }
  0x49   : > { %2681 = vmatprep.subr.bf16.mxu0 %v2680_v48  ;;  %2169 = vmatmul.mubr.f32.vlgmr.msra.gmra.mrb[0].mxu1 %v3222_v53 }
  0x4a   : > { %2555 = vmatpush3.bf16.msra.mxu1 %v2552_v47  ;;  %2171 = vmatprep.mubr.f32.mxu1 %v3241_v62  ;;  %v1822_v47 = vld [vmem:[%s3580_s1 + $0x378] sm:$0xff] }
  0x4b   : > { %2345 = vmatmul.mubr.f32.vlgmr.msra.gmra.mrb[0].mxu0 %v3225_v54  ;;  %2557 = vmatprep.subr.bf16.mxu1 %v2556_v55  ;;  %v2708_v49 = vpack.c.bf16 %v1822_v47, %v1821_v46  ;;  %v1748_v46 = vld [vmem:[%s3580_s1 + $0x1e8] sm:$0xff]  ;;  %v1843_v47 = vld [vmem:[%s3580_s1 + $0x3e0] sm:$0xff] }
  0x4c   : > { %2683 = vmatpush3.bf16.msra.mxu0 %v2680_v48  ;;  %2347 = vmatprep.mubr.f32.mxu0 %v3245_v63  ;;  %v2580_v48 = vpack.c.bf16 %v1726_v45, %v1725_v44  ;;  %v1747_v45 = vld [vmem:[%s3580_s1 + $0x1e0] sm:$0xff] }
  0x4d   : > { %2685 = vmatprep.subr.bf16.mxu0 %v2684_v56  ;;  %2172 = vmatmul.mubr.f32.gmra.mrb[2].mxu1 %v3248_v0 }
  0x4e   : > { %2559 = vmatpush3.bf16.msra.mxu1 %v2556_v55  ;;  %2174 = vmatprep.mubr.f32.mxu1 %v3269_v10  ;;  %v1832_v55 = vld [vmem:[%s3580_s1 + $0x388] sm:$0xff] }
  0x4f   : > { %2348 = vmatmul.mubr.f32.gmra.mrb[2].mxu0 %v3251_v2  ;;  %2561 = vmatprep.subr.bf16.mxu1 %v2560_v1  ;;  %v2712_v57 = vpack.c.bf16 %v1832_v55, %v1831_v52  ;;  %v1845_v52 = vld [vmem:[%s3580_s1 + $0x3f0] sm:$0xff] }
  0x50   : > { %2687 = vmatpush3.bf16.msra.mxu0 %v2684_v56  ;;  %2350 = vmatprep.mubr.f32.mxu0 %v3273_v12  ;;  %v2584_v56 = vpack.c.bf16 %v1736_v51, %v1735_v50  ;;  %v1750_v51 = vld [vmem:[%s3580_s1 + $0x1f8] sm:$0xff] }
  0x51   : > { %2689 = vmatprep.subr.bf16.mxu0 %v2688_v4  ;;  %2175 = vmatmul.mubr.f32.gmra.mrb[4].mxu1 %v3276_v14 }
  0x52   : > { %2563 = vmatpush3.bf16.msra.mxu1 %v2560_v1  ;;  %2177 = vmatprep.mubr.f32.mxu1 %v3297_v24  ;;  %v1834_v1 = vld [vmem:[%s3580_s1 + $0x398] sm:$0xff] }
  0x53   : > { %2351 = vmatmul.mubr.f32.gmra.mrb[4].mxu0 %v3279_v16  ;;  %2565 = vmatprep.subr.bf16.mxu1 %v2564_v15  ;;  %v2716_v6 = vpack.c.bf16 %v1834_v1, %v1833_v61  ;;  %v1857_v61 = vld [vmem:[%s3580_s1 + $0x410] sm:$0xff]  ;;  %v1858_v1 = vld [vmem:[%s3580_s1 + $0x418] sm:$0xff] }
  0x54   : > { %2691 = vmatpush3.bf16.msra.mxu0 %v2688_v4  ;;  %2353 = vmatprep.mubr.f32.mxu0 %v3301_v25  ;;  %v2588_v4 = vpack.c.bf16 %v1738_v59, %v1737_v58  ;;  %v1856_v58 = vld [vmem:[%s3580_s1 + $0x408] sm:$0xff] }
  0x55   : > { %2693 = vmatprep.subr.bf16.mxu0 %v2692_v17  ;;  %2178 = vmatmul.mubr.f32.gmra.mrb[6].mxu1 %v3304_v26 }
  0x56   : > { %2567 = vmatpush3.bf16.msra.mxu1 %v2564_v15  ;;  %2212 = vmatprep.mubr.f32.mxu1 %v547_v35  ;;  %v1836_v15 = vld [vmem:[%s3580_s1 + $0x3a8] sm:$0xff]  ;;  %v3422_v35 = vld [vmem:[%s3010_s11 + $0x80] sm:$0xff] }
  0x57   : > { %2354 = vmatmul.mubr.f32.gmra.mrb[6].mxu0 %v3307_v29  ;;  %2569 = vmatprep.subr.bf16.mxu1 %v2568_v27  ;;  %v2720_v18 = vpack.c.bf16 %v1836_v15, %v1835_v9  ;;  %v1862_v9 = vld [vmem:[%s3580_s1 + $0x438] sm:$0xff]  ;;  %v1869_v15 = vld [vmem:[%s3580_s1 + $0x470] sm:$0xff] }
  0x58   : > { %2695 = vmatpush3.bf16.msra.mxu0 %v2692_v17  ;;  %2388 = vmatprep.mubr.f32.mxu0 %v3241_v62  ;;  %v2592_v17 = vpack.c.bf16 %v1740_v8, %v1739_v7  ;;  %v1860_v7 = vld [vmem:[%s3580_s1 + $0x428] sm:$0xff] }
  0x59   : > { %2697 = vmatprep.subr.bf16.mxu0 %v2696_v30 }
  0x5a   : > { %2571 = vmatpush3.bf16.msra.mxu1 %v2568_v27 }
  0x5b   : > { %2573 = vmatprep.subr.bf16.mxu1 %v2572_v36 }
  0x5c   : > { %2699 = vmatpush3.bf16.msra.mxu0 %v2696_v30  ;;  %v2724_v30 = vpack.c.bf16 %v1838_v23, %v1837_v22 }
  0x5d   : > { %2701 = vmatprep.subr.bf16.mxu0 %v2700_v37 }
  0x5e   : > { %2575 = vmatpush3.bf16.msra.mxu1 %v2572_v36  ;;  %v2600_v36 = vpack.c.bf16 %v1744_v32, %v1743_v31 }
  0x5f   : > { %2577 = vmatprep.subr.bf16.mxu1 %v2576_v42 }
  0x60   : > { %2703 = vmatpush3.bf16.msra.mxu0 %v2700_v37  ;;  %v1806_v37 = vld [vmem:[%s3010_s11 + $0x90] sm:$0xff] }
  0x61   : > { %2705 = vmatprep.subr.bf16.mxu0 %v2704_v43 }
  0x62   : > { %2579 = vmatpush3.bf16.msra.mxu1 %v2576_v42  ;;  %v1842_v42 = vld [vmem:[%s3580_s1 + $0x3d8] sm:$0xff] }
  0x63   : > { %2581 = vmatprep.subr.bf16.mxu1 %v2580_v48  ;;  %v2732_v44 = vpack.c.bf16 %v1842_v42, %v1841_v41 }
  0x64   : > { %2707 = vmatpush3.bf16.msra.mxu0 %v2704_v43  ;;  %v2604_v43 = vpack.c.bf16 %v1746_v40, %v1745_v39 }
  0x65   : > { %2709 = vmatprep.subr.bf16.mxu0 %v2708_v49 }
  0x66   : > { %2583 = vmatpush3.bf16.msra.mxu1 %v2580_v48  ;;  %v1844_v48 = vld [vmem:[%s3580_s1 + $0x3e8] sm:$0xff] }
  0x67   : > { %2585 = vmatprep.subr.bf16.mxu1 %v2584_v56  ;;  %v2736_v50 = vpack.c.bf16 %v1844_v48, %v1843_v47 }
  0x68   : > { %2711 = vmatpush3.bf16.msra.mxu0 %v2708_v49  ;;  %v2608_v49 = vpack.c.bf16 %v1748_v46, %v1747_v45 }
  0x69   : > { %2713 = vmatprep.subr.bf16.mxu0 %v2712_v57  ;;  %2213 = vmatmul.mubr.f32.vlgmr.msra.gmra.mrb[0].mxu1 %v3170_v28  ;;  %v1741_v28 = vld [vmem:[%s3580_s1 + $0x1b0] sm:$0xff] }
  0x6a   : > { %2587 = vmatpush3.bf16.msra.mxu1 %v2584_v56  ;;  %2215 = vmatprep.mubr.f32.mxu1 %v3225_v54  ;;  %v2596_v27 = vpack.c.bf16 %v1742_v20, %v1741_v28 }
  0x6b   : > { %2389 = vmatmul.mubr.f32.vlgmr.msra.gmra.mrb[0].mxu0 %v3248_v0  ;;  %2589 = vmatprep.subr.bf16.mxu1 %v2588_v4 }
  0x6c   : > { %2715 = vmatpush3.bf16.msra.mxu0 %v2712_v57  ;;  %2391 = vmatprep.mubr.f32.mxu0 %v3269_v10  ;;  %v1855_v57 = vld [vmem:[%s3580_s1 + $0x400] sm:$0xff] }
  0x6d   : > { %2717 = vmatprep.subr.bf16.mxu0 %v2716_v6  ;;  %2216 = vmatmul.mubr.f32.gmra.mrb[2].mxu1 %v3245_v63  ;;  %v2744_v59 = vpack.c.bf16 %v1856_v58, %v1855_v57 }
  0x6e   : > { %2591 = vmatpush3.bf16.msra.mxu1 %v2588_v4  ;;  %2218 = vmatprep.mubr.f32.mxu1 %v3251_v2  ;;  %v2748_v4 = vpack.c.bf16 %v1858_v1, %v1857_v61 }
  0x6f   : > { %2392 = vmatmul.mubr.f32.gmra.mrb[2].mxu0 %v3276_v14  ;;  %2593 = vmatprep.subr.bf16.mxu1 %v2592_v17 }
  0x70   : > { %2719 = vmatpush3.bf16.msra.mxu0 %v2716_v6  ;;  %2394 = vmatprep.mubr.f32.mxu0 %v3297_v24  ;;  %v1859_v6 = vld [vmem:[%s3580_s1 + $0x420] sm:$0xff] }
  0x71   : > { %2721 = vmatprep.subr.bf16.mxu0 %v2720_v18  ;;  %2219 = vmatmul.mubr.f32.gmra.mrb[4].mxu1 %v3273_v12  ;;  %v2752_v8 = vpack.c.bf16 %v1860_v7, %v1859_v6 }
  0x72   : > { %2595 = vmatpush3.bf16.msra.mxu1 %v2592_v17  ;;  %2221 = vmatprep.mubr.f32.mxu1 %v3279_v16  ;;  %v1870_v17 = vld [vmem:[%s3580_s1 + $0x478] sm:$0xff] }
  0x73   : > { %2395 = vmatmul.mubr.f32.gmra.mrb[4].mxu0 %v3304_v26  ;;  %2597 = vmatprep.subr.bf16.mxu1 %v2596_v27 }
  0x74   : > { %2723 = vmatpush3.bf16.msra.mxu0 %v2720_v18  ;;  %2397 = vmatprep.mubr.f32.mxu0 %v3422_v35 }
  0x75   : > { %2725 = vmatprep.subr.bf16.mxu0 %v2724_v30  ;;  %2222 = vmatmul.mubr.f32.gmra.mrb[6].mxu1 %v3301_v25 }
  0x76   : > { %2599 = vmatpush3.bf16.msra.mxu1 %v2596_v27  ;;  %2256 = vmatprep.mubr.f32.mxu1 %v3222_v53  ;;  %v1749_v53 = vld [vmem:[%s3580_s1 + $0x1f0] sm:$0xff] }
  0x77   : > { %2398 = vmatmul.mubr.f32.gmra.mrb[6].mxu0 %v1806_v37  ;;  %2601 = vmatprep.subr.bf16.mxu1 %v2600_v36  ;;  %v2612_v55 = vpack.c.bf16 %v1750_v51, %v1749_v53  ;;  %v1559_v51 = vstv %s1558_s16 }
  0x78   : > { %2727 = vmatpush3.bf16.msra.mxu0 %v2724_v30  ;;  %2432 = vmatprep.mubr.f32.mxu0 %v3087_v60  ;;  %v1846_v60 = vld [vmem:[%s3580_s1 + $0x3f8] sm:$0xff] }
  0x79   : > { %2729 = vmatprep.subr.bf16.mxu0 %v2728_v38  ;;  %v2740_v56 = vpack.c.bf16 %v1846_v60, %v1845_v52 }
  0x7a   : > { %2603 = vmatpush3.bf16.msra.mxu1 %v2600_v36 }
  0x7b   : > { %2605 = vmatprep.subr.bf16.mxu1 %v2604_v43 }
  0x7c   : > { %2731 = vmatpush3.bf16.msra.mxu0 %v2728_v38 }
  0x7d   : > { %2733 = vmatprep.subr.bf16.mxu0 %v2732_v44 }
  0x7e   : > { %2607 = vmatpush3.bf16.msra.mxu1 %v2604_v43 }
  0x7f   : > { %2609 = vmatprep.subr.bf16.mxu1 %v2608_v49 }
  0x80   : > { %2735 = vmatpush3.bf16.msra.mxu0 %v2732_v44 }
  0x81   : > { %2737 = vmatprep.subr.bf16.mxu0 %v2736_v50 }
  0x82   : > { %2611 = vmatpush3.bf16.msra.mxu1 %v2608_v49 }
  0x83   : > { %2613 = vmatprep.subr.bf16.mxu1 %v2612_v55 }
  0x84   : > { %2739 = vmatpush3.bf16.msra.mxu0 %v2736_v50 }
  0x85   : > { %2741 = vmatprep.subr.bf16.mxu0 %v2740_v56 }
  0x86   : > { %2615 = vmatpush3.bf16.msra.mxu1 %v2612_v55 }
  0x87   : > { %2776 = vmatprep.subr.bf16.mxu1 %v2744_v59 }
  0x88   : > { %2743 = vmatpush3.bf16.msra.mxu0 %v2740_v56 }
  0x89   : > { %2745 = vmatprep.subr.bf16.mxu0 %v2744_v59  ;;  %2257 = vmatmul.mubr.f32.vlgmr.msra.gmra.mrb[0].mxu1 %v3241_v62  ;;  %v1861_v62 = vld [vmem:[%s3580_s1 + $0x430] sm:$0xff] }
  0x8a   : > { %2784 = vmatpush3.bf16.msra.mxu1 %v2744_v59  ;;  %2259 = vmatprep.mubr.f32.mxu1 %v3248_v0  ;;  %v1864_v0 = vld [vmem:[%s3580_s1 + $0x448] sm:$0xff] }
  0x8b   : > { %2433 = vmatmul.mubr.f32.vlgmr.msra.gmra.mrb[0].mxu0 %v3103_v3  ;;  %2777 = vmatprep.subr.bf16.mxu1 %v2748_v4  ;;  %v2756_v3 = vpack.c.bf16 %v1862_v9, %v1861_v62 }
  0x8c   : > { %2747 = vmatpush3.bf16.msra.mxu0 %v2744_v59  ;;  %2435 = vmatprep.mubr.f32.mxu0 %v3106_v5  ;;  %v1863_v5 = vld [vmem:[%s3580_s1 + $0x440] sm:$0xff] }
  0x8d   : > { %2749 = vmatprep.subr.bf16.mxu0 %v2748_v4  ;;  %2260 = vmatmul.mubr.f32.gmra.mrb[2].mxu1 %v3269_v10  ;;  %v1865_v10 = vld [vmem:[%s3580_s1 + $0x450] sm:$0xff] }
  0x8e   : > { %2785 = vmatpush3.bf16.msra.mxu1 %v2748_v4  ;;  %2262 = vmatprep.mubr.f32.mxu1 %v3276_v14  ;;  %v1866_v14 = vld [vmem:[%s3580_s1 + $0x458] sm:$0xff] }
  0x8f   : > { %2436 = vmatmul.mubr.f32.gmra.mrb[2].mxu0 %v3125_v11  ;;  %2778 = vmatprep.subr.bf16.mxu1 %v2752_v8  ;;  %v1830_v11 = vld [vmem:[%s3010_s11 + $0x91] sm:$0xff] }
  0x90   : > { %2751 = vmatpush3.bf16.msra.mxu0 %v2748_v4  ;;  %2438 = vmatprep.mubr.f32.mxu0 %v3128_v13  ;;  %v2760_v13 = vpack.c.bf16 %v1864_v0, %v1863_v5 }
  0x91   : > { %2753 = vmatprep.subr.bf16.mxu0 %v2752_v8  ;;  %2263 = vmatmul.mubr.f32.gmra.mrb[4].mxu1 %v3297_v24  ;;  %v1868_v24 = vld [vmem:[%s3580_s1 + $0x468] sm:$0xff] }
  0x92   : > { %2786 = vmatpush3.bf16.msra.mxu1 %v2752_v8  ;;  %2265 = vmatprep.mubr.f32.mxu1 %v3304_v26 }
  0x93   : > { %2439 = vmatmul.mubr.f32.gmra.mrb[4].mxu0 %v3147_v19  ;;  %2779 = vmatprep.subr.bf16.mxu1 %v2756_v3  ;;  %v2764_v19 = vpack.c.bf16 %v1866_v14, %v1865_v10 }
  0x94   : > { %2755 = vmatpush3.bf16.msra.mxu0 %v2752_v8  ;;  %2441 = vmatprep.mubr.f32.mxu0 %v3150_v21  ;;  %v1867_v21 = vld [vmem:[%s3580_s1 + $0x460] sm:$0xff] }
  0x95   : > { %2757 = vmatprep.subr.bf16.mxu0 %v2756_v3  ;;  %2266 = vmatmul.mubr.f32.gmra.mrb[6].mxu1 %v3422_v35  ;;  %v2768_v26 = vpack.c.bf16 %v1868_v24, %v1867_v21 }
  0x96   : > { %2787 = vmatpush3.bf16.msra.mxu1 %v2756_v3  ;;  %2482 = vmatprep.mubr.f32.mxu1 %v3279_v16  ;;  %v1854_v16 = vld [vmem:[%s3010_s11 + $0x92] sm:$0xff]  ;;  %s1874_s11 = sshll.u32 %s3590_s20, 6 }
  0x97   : > { %2442 = vmatmul.mubr.f32.gmra.mrb[6].mxu0 %v1830_v11  ;;  %2780 = vmatprep.subr.bf16.mxu1 %v2760_v13  ;;  %s3542_s19 = scalar_lea.vmem %s3583_s4, %s1874_s11  ;;  %s3559_s27 = scalar_lea.vmem %s3584_s5, %s1874_s11 }
  0x98   : > { %2759 = vmatpush3.bf16.msra.mxu0 %v2756_v3  ;;  %2476 = vmatprep.mubr.f32.mxu0 %v3225_v54  ;;  %v2772_v54 = vpack.c.bf16 %v1870_v17, %v1869_v15  ;;  %v1539_v41 = vld [vmem:[%s3542_s19 + $0x28] sm:$0xff]  ;;  %v1538_v47 = vld [vmem:[%s3542_s19 + $0x20] sm:$0xff]  ;;  %v1541_v1 = vld [vmem:[%s3542_s19 + $0x38] sm:$0xff] }
  0x99   : > { %2761 = vmatprep.subr.bf16.mxu0 %v2760_v13  ;;  %v1535_v44 = vld [vmem:[%s3542_s19 + $0x8] sm:$0xff]  ;;  %v1534_v49 = vld [vmem:[%s3542_s19] sm:$0xff]  ;;  %v1537_v62 = vld [vmem:[%s3542_s19 + $0x18] sm:$0xff] }
  0x9a   : > { %2788 = vmatpush3.bf16.msra.mxu1 %v2760_v13  ;;  %v1540_v5 = vld [vmem:[%s3542_s19 + $0x30] sm:$0xff] }
  0x9b   : > { %2781 = vmatprep.subr.bf16.mxu1 %v2764_v19  ;;  %v1536_v10 = vld [vmem:[%s3542_s19 + $0x10] sm:$0xff] }
  0x9c   : > { %2763 = vmatpush3.bf16.msra.mxu0 %v2760_v13 }
  0x9d   : > { %2765 = vmatprep.subr.bf16.mxu0 %v2764_v19 }
  0x9e   : > { %2789 = vmatpush3.bf16.msra.mxu1 %v2764_v19 }
  0x9f   : > { %2782 = vmatprep.subr.bf16.mxu1 %v2768_v26 }
  0xa0   : > { %2767 = vmatpush3.bf16.msra.mxu0 %v2764_v19 }
  0xa1   : > { %2769 = vmatprep.subr.bf16.mxu0 %v2768_v26 }
  0xa2   : > { %2790 = vmatpush3.bf16.msra.mxu1 %v2768_v26 }
  0xa3   : > { %2783 = vmatprep.subr.bf16.mxu1 %v2772_v54 }
  0xa4   : > { %2771 = vmatpush3.bf16.msra.mxu0 %v2768_v26 }
  0xa5   : > { %2773 = vmatprep.subr.bf16.mxu0 %v2772_v54 }
  0xa6   : > { %2791 = vmatpush3.bf16.msra.mxu1 %v2772_v54 }
  0xa8   : > { %2775 = vmatpush3.bf16.msra.mxu0 %v2772_v54 }
  0xa9   : > { %2483 = vmatmul.mubr.f32.vlgmr.msra.gmra.mrb[8].mxu1 %v3301_v25 }
  0xaa   : > { %2485 = vmatprep.mubr.f32.mxu1 %v3307_v29 }
  0xab   : > { %2477 = vmatmul.mubr.f32.vlgmr.msra.gmra.mrb[0].mxu0 %v3245_v63 }
  0xac   : > { %2479 = vmatprep.mubr.f32.mxu0 %v3251_v2 }
  0xad   : > { %2486 = vmatmul.mubr.f32.gmra.mrb[10].mxu1 %v1854_v16 }
  0xaf   : > { %2480 = vmatmul.mubr.f32.gmra.mrb[2].mxu0 %v3273_v12  ;;  %v1871_v12 = vld [vmem:[%s3581_s2] ss:$0 sm:$0xff] }
 0x15c   : > { %v2258_v18 = vpop.f32.mrb[0].mxu1 }
 0x15d   : > { %v779_v28 = vpop.f32.mrb[1].mxu1 }
 0x160   : > { %v2261_v20 = vpop.f32.mrb[2].mxu1 }
 0x161   : > { %v789_v22 = vpop.f32.mrb[3].mxu1 }
 0x164   : > { %v2264_v23 = vpop.f32.mrb[4].mxu1 }
 0x165   : > { %v799_v30 = vpop.f32.mrb[5].mxu1 }
 0x166   : > { %v2440_v27 = vpop.f32.mrb[4].mxu0 }
 0x167   : > { %v2796_v25 = vadd.f32 %v2440_v27, %v2264_v23  ;;  %v1354_v31 = vpop.f32.mrb[5].mxu0 }
 0x168   : > { %v2798_v63 = vadd.f32 %v1354_v31, %v799_v30  ;;  %v2267_v32 = vpop.f32.mrb[6].mxu1 }
 0x169   : > { %v809_v33 = vpop.f32.mrb[7].mxu1 }
 0x16a   : > { %v2443_v29 = vpop.f32.mrb[6].mxu0 }
 0x16b   : > { %v2800_v34 = vadd.f32 %v2443_v29, %v2267_v32  ;;  %v1364_v2 = vpop.f32.mrb[7].mxu0 }
 0x16c   : > { %v2802_v35 = vadd.f32 %v1364_v2, %v809_v33 }
 0x17c   : > { %v2484_v36 = vpop.f32.mrb[8].mxu1 }
 0x17d   : > { %v2797_v38 = vadd.f32 %v2796_v25, %v2484_v36  ;;  %v1492_v39 = vpop.f32.mrb[9].mxu1 }
 0x17e   : > { %v2478_v37 = vpop.f32.mrb[0].mxu0  ;;  %v2799_v43 = vadd.f32 %v2798_v63, %v1492_v39 }
 0x17f   : > { %v2792_v40 = vadd.f32 %v2478_v37, %v2258_v18  ;;  %v1472_v42 = vpop.f32.mrb[1].mxu0  ;;  %v1531_v45 = vadd.f32 %v2797_v38, %v1871_v12 }
 0x180   : > { %v2793_v46 = vadd.f32 %v1472_v42, %v779_v28  ;;  %v1530_v50 = vadd.f32 %v2799_v43, %v1871_v12  ;;  %v2487_v53 = vpop.f32.mrb[10].mxu1 }
 0x181   : > { %v1527_v48 = vadd.f32 %v2792_v40, %v1871_v12  ;;  %v1547_v52 = vadd.f32 %v1539_v41, %v1531_v45  ;;  %v2801_v56 = vadd.f32 %v2800_v34, %v2487_v53  ;;  %v1502_v57 = vpop.f32.mrb[11].mxu1 }
 0x182   : > { %v1526_v60 = vadd.f32 %v2793_v46, %v1871_v12  ;;  %v2481_v55 = vpop.f32.mrb[2].mxu0  ;;  %v1546_v59 = vadd.f32 %v1538_v47, %v1530_v50  ;;  %v2803_v6 = vadd.f32 %v2802_v35, %v1502_v57 }
 0x183   : > { %v1543_v58 = vadd.f32 %v1535_v44, %v1527_v48  ;;  %v2794_v61 = vadd.f32 %v2481_v55, %v2261_v20  ;;  %v1482_v4 = vpop.f32.mrb[3].mxu0  ;;  %v1555_v7 = vmax.f32 %v1547_v52, 0.0  ;;  %v1533_v9 = vadd.f32 %v2801_v56, %v1871_v12 }
 0x184   : > { %v1542_v8 = vadd.f32 %v1534_v49, %v1526_v60  ;;  %v2795_v3 = vadd.f32 %v1482_v4, %v789_v22  ;;  %v1554_v11 = vmax.f32 %v1546_v59, 0.0  ;;  %v1532_v14 = vadd.f32 %v2803_v6, %v1871_v12 }
 0x185   : > { %v1551_v0 = vmax.f32 %v1543_v58, 0.0  ;;  %v1529_v13 = vadd.f32 %v2794_v61, %v1871_v12  ;;  %v1565_v19 = vmin.f32 %v1555_v7, %v1559_v51  ;;  %v1549_v24 = vadd.f32 %v1541_v1, %v1533_v9 }
 0x186   : > { %v1550_v21 = vmax.f32 %v1542_v8, 0.0  ;;  %v1528_v26 = vadd.f32 %v2795_v3, %v1871_v12  ;;  %v1564_v17 = vmin.f32 %v1554_v11, %v1559_v51  ;;  %v1548_v16 = vadd.f32 %v1540_v5, %v1532_v14 }
 0x187   : > { %v1561_v15 = vmin.f32 %v1551_v0, %v1559_v51  ;;  %v1545_v54 = vadd.f32 %v1537_v62, %v1529_v13  ;;  %1573 = vst [vmem:[%s3559_s27 + $0x28] sm:$0xff] %v1565_v19  ;;  %v1557_v28 = vmax.f32 %v1549_v24, 0.0 }
 0x188   : > { %v1560_v18 = vmin.f32 %v1550_v21, %v1559_v51  ;;  %v1544_v20 = vadd.f32 %v1536_v10, %v1528_v26  ;;  %1572 = vst [vmem:[%s3559_s27 + $0x20] sm:$0xff] %v1564_v17  ;;  %v1556_v23 = vmax.f32 %v1548_v16, 0.0 }
 0x189   : > { %1569 = vst [vmem:[%s3559_s27 + $0x8] sm:$0xff] %v1561_v15  ;;  %v1553_v22 = vmax.f32 %v1545_v54, 0.0  ;;  %v1567_v27 = vmin.f32 %v1557_v28, %v1559_v51 }
 0x18a   : > { %1568 = vst [vmem:[%s3559_s27] sm:$0xff] %v1560_v18  ;;  %v1552_v30 = vmax.f32 %v1544_v20, 0.0  ;;  %v1566_v31 = vmin.f32 %v1556_v23, %v1559_v51 }
 0x18b   : > { %v1563_v25 = vmin.f32 %v1553_v22, %v1559_v51  ;;  %1575 = vst [vmem:[%s3559_s27 + $0x38] sm:$0xff] %v1567_v27 }
 0x18c   : > { %v1562_v63 = vmin.f32 %v1552_v30, %v1559_v51  ;;  %1574 = vst [vmem:[%s3559_s27 + $0x30] sm:$0xff] %v1566_v31 }
 0x18d   : > { %1571 = vst [vmem:[%s3559_s27 + $0x18] sm:$0xff] %v1563_v25 }
 0x18e   : > { %1570 = vst [vmem:[%s3559_s27 + $0x10] sm:$0xff] %v1562_v63 }
 0x18f PF: > { %s16_s22 = sadd.s32 1, %s2903_s22   ;;  %s3585_s20 = smov %s2899_s21 }
 0x190   : > { %p13_p5 = scmp.ge.s32.totalorder %s16_s22, 4   ;;  %s3586_s21 = smov %s3588_s3 }
 0x192   :  { %15 = sbr.rel (!%p13_p5) target bundleno = 2 (0x2), region = 84 }

// kernel: _lambda_.8
= control target key start
LH: loop header
LB: loop body
LE: loop exit
PB: predicated region body
PF: predicated region fallthrough
CT: control target
= control target key end

     0   :  { %s2833_s17 = smov 0   ;;  %s2835_s18 = smov 0   ;;  %s3457_s0 = inlined_call_operand.vmem [shape: f32[2,10,10,128], index: 0, kind: input, shape index: {}]   ;;  %s3458_s1 = inlined_call_operand.vmem [shape: f32[3,3,128,128], index: 1, kind: input, shape index: {}]   ;;  %s3459_s2 = inlined_call_operand.vmem [shape: f32[1,128], index: 2, kind: input, shape index: {}]   ;;  %s3460_s3 = inlined_call_operand.<no memory space> [shape: f32[1], index: 3, kind: input, shape index: {}]   ;;  %s3461_s4 = inlined_call_operand.vmem [shape: f32[2,8,8,128], index: 4, kind: output, shape index: {}]  }
   0x1   :  { %9 = sst [smem:[#allocation2]] %s3460_s3  ;;  %s2837_s19 = smov 0  }
   0x2 LB: > { %s27_s3 = sadd.s32 1, %s2799_s18  ;;  %p1592_p0 = scmp.ge.s32.totalorder %s2803_s19, 1  ;;  %s2803_s19 = sphi %s2837_s19, %s15_s19   ;;  %s2799_s18 = sphi %s2835_s18, %s3463_s18   ;;  %s2795_s17 = sphi %s2833_s17, %s3462_s17  }
   0x3   : > { %p29_p1 = scmp.ge.s32.totalorder %s27_s3, 2  ;;  %p177_p2 = scmp.lt.s32.totalorder %s2803_s19, 3 }
   0x5   : > { %s3465_s3 = smov (%p29_p1, %s27_s3), 0  ;;  %p178_p3 = pnand %p1592_p0, %p177_p2 }
   0x6   : > { %v1596_v0 = vld [vmem:[%s3458_s1 + $0x80] sm:$0xff] (!%p178_p3)  ;;  %v1597_v1 = vld [vmem:[%s3458_s1 + $0x88] sm:$0xff] (!%p178_p3)  ;;  %p207_p4 = scmp.lt.s32.totalorder (!%p178_p3), %s2795_s17, 1  ;;  %v1598_v5 = vld [vmem:[%s3458_s1 + $0x90] sm:$0xff] (!%p178_p3) }
   0x7   : > { %181 = sbr.rel (%p178_p3) target bundleno = 397 (0x18d), region = 36  ;;  %v1660_v2 = vld [vmem:[%s3458_s1 + $0x200] sm:$0xff] (!%p178_p3)  ;;  %v2388_v3 = vpack.c.bf16 (!%p178_p3), %v1597_v1, %v1596_v0  ;;  %v1661_v4 = vld [vmem:[%s3458_s1 + $0x208] sm:$0xff] (!%p178_p3)  ;;  %v1599_v6 = vld [vmem:[%s3458_s1 + $0x98] sm:$0xff] (!%p178_p3) }
   0x8   : > { %v2516_v7 = vpack.c.bf16 (!%p178_p3), %v1661_v4, %v1660_v2  ;;  %v2392_v8 = vpack.c.bf16 (!%p178_p3), %v1599_v6, %v1598_v5  ;;  %v1662_v9 = vld [vmem:[%s3458_s1 + $0x210] sm:$0xff] (!%p178_p3)  ;;  %v1663_v10 = vld [vmem:[%s3458_s1 + $0x218] sm:$0xff] (!%p178_p3)  ;;  %v1600_v11 = vld [vmem:[%s3458_s1 + $0xa0] sm:$0xff] (!%p178_p3) }
   0x9   : > { %2389 = vmatprep.subr.bf16.mxu1 (!%p178_p3), %v2388_v3  ;;  %v2520_v12 = vpack.c.bf16 (!%p178_p3), %v1663_v10, %v1662_v9  ;;  %v1601_v13 = vld [vmem:[%s3458_s1 + $0xa8] sm:$0xff] (!%p178_p3)  ;;  %v1664_v14 = vld [vmem:[%s3458_s1 + $0x220] sm:$0xff] (!%p178_p3)  ;;  %v1602_v18 = vld [vmem:[%s3458_s1 + $0xb0] sm:$0xff] (!%p178_p3) }
   0xa   : > { %v1665_v15 = vld [vmem:[%s3458_s1 + $0x228] sm:$0xff] (!%p178_p3)  ;;  %2517 = vmatprep.subr.bf16.mxu0 (!%p178_p3), %v2516_v7  ;;  %2391 = vmatpush3.bf16.msra.mxu1 (!%p178_p3), %v2388_v3  ;;  %v2396_v16 = vpack.c.bf16 (!%p178_p3), %v1601_v13, %v1600_v11  ;;  %v1603_v19 = vld [vmem:[%s3458_s1 + $0xb8] sm:$0xff] (!%p178_p3)  ;;  %v1666_v20 = vld [vmem:[%s3458_s1 + $0x230] sm:$0xff] (!%p178_p3) }
   0xb   : > { %2519 = vmatpush3.bf16.msra.mxu0 (!%p178_p3), %v2516_v7  ;;  %2393 = vmatprep.subr.bf16.mxu1 (!%p178_p3), %v2392_v8  ;;  %v2524_v17 = vpack.c.bf16 (!%p178_p3), %v1665_v15, %v1664_v14  ;;  %v1667_v21 = vld [vmem:[%s3458_s1 + $0x238] sm:$0xff] (!%p178_p3)  ;;  %v2400_v22 = vpack.c.bf16 (!%p178_p3), %v1603_v19, %v1602_v18  ;;  %v1604_v24 = vld [vmem:[%s3458_s1 + $0xc0] sm:$0xff] (!%p178_p3)  ;;  %v1605_v25 = vld [vmem:[%s3458_s1 + $0xc8] sm:$0xff] (!%p178_p3) }
   0xc   : > { %2521 = vmatprep.subr.bf16.mxu0 (!%p178_p3), %v2520_v12  ;;  %v2528_v23 = vpack.c.bf16 (!%p178_p3), %v1667_v21, %v1666_v20  ;;  %v1668_v27 = vld [vmem:[%s3458_s1 + $0x240] sm:$0xff] (!%p178_p3)  ;;  %v1669_v28 = vld [vmem:[%s3458_s1 + $0x248] sm:$0xff] (!%p178_p3)  ;;  %v2404_v30 = vpack.c.bf16 (!%p178_p3), %v1605_v25, %v1604_v24  ;;  %v1606_v32 = vld [vmem:[%s3458_s1 + $0xd0] sm:$0xff] (!%p178_p3) }
   0xd   : > { %v2532_v31 = vpack.c.bf16 (!%p178_p3), %v1669_v28, %v1668_v27  ;;  %v1607_v33 = vld [vmem:[%s3458_s1 + $0xd8] sm:$0xff] (!%p178_p3)  ;;  %v1670_v34 = vld [vmem:[%s3458_s1 + $0x250] sm:$0xff] (!%p178_p3)  ;;  %v1608_v38 = vld [vmem:[%s3458_s1 + $0xe0] sm:$0xff] (!%p178_p3) }
   0xe   : > { %s3467_s17 = smov (!%p207_p4, %s2795_s17), 1  ;;  %2395 = vmatpush3.bf16.msra.mxu1 %v2392_v8  ;;  %v1671_v35 = vld [vmem:[%s3458_s1 + $0x258] sm:$0xff]  ;;  %v2408_v36 = vpack.c.bf16 %v1607_v33, %v1606_v32  ;;  %v1609_v39 = vld [vmem:[%s3458_s1 + $0xe8] sm:$0xff]  ;;  %v1672_v40 = vld [vmem:[%s3458_s1 + $0x260] sm:$0xff] }
   0xf   : > { %s2756_s21 = smul.u32 160, %s3467_s17  ;;  %2523 = vmatpush3.bf16.msra.mxu0 %v2520_v12  ;;  %2397 = vmatprep.subr.bf16.mxu1 %v2396_v16  ;;  %v2536_v37 = vpack.c.bf16 %v1671_v35, %v1670_v34  ;;  %v1673_v41 = vld [vmem:[%s3458_s1 + $0x268] sm:$0xff]  ;;  %v2412_v42 = vpack.c.bf16 %v1609_v39, %v1608_v38  ;;  %v1610_v44 = vld [vmem:[%s3458_s1 + $0xf0] sm:$0xff]  ;;  %v1611_v45 = vld [vmem:[%s3458_s1 + $0xf8] sm:$0xff]  ;;  %s1775_s26 = sshll.u32 %s3467_s17, 6 }
  0x10   : > { %2525 = vmatprep.subr.bf16.mxu0 %v2524_v17  ;;  %v2540_v43 = vpack.c.bf16 %v1673_v41, %v1672_v40  ;;  %v1674_v46 = vld [vmem:[%s3458_s1 + $0x270] sm:$0xff]  ;;  %v1675_v47 = vld [vmem:[%s3458_s1 + $0x278] sm:$0xff]  ;;  %v2416_v48 = vpack.c.bf16 %v1611_v45, %v1610_v44  ;;  %v233_v50 = vld [vmem:[%s3458_s1] sm:$0xff]  ;;  %s3438_s29 = scalar_lea.vmem %s3461_s4, %s1775_s26 }
  0x11   : > { %s2905_s6 = scalar_lea.vmem %s3457_s0, %s2756_s21  ;;  %v2544_v49 = vpack.c.bf16 %v1675_v47, %v1674_v46  ;;  %v234_v51 = vld [vmem:[%s3458_s1 + $0x8] sm:$0xff]  ;;  %v1684_v52 = vld [vmem:[%s3458_s1 + $0x280] sm:$0xff]  ;;  %v235_v56 = vld [vmem:[%s3458_s1 + $0x10] sm:$0xff] }
  0x12   : > { %v249_v26 = vld [vmem:[%s2905_s6 + $0x1] sm:$0xff]  ;;  %v1652_v29 = vld [vmem:[%s2905_s6 + $0x11] sm:$0xff]  ;;  %2399 = vmatpush3.bf16.msra.mxu1 %v2396_v16  ;;  %v2420_v54 = vpack.c.bf16 %v234_v51, %v233_v50 }
  0x13   : > { %2024 = vmatprep.mubr.f32.mxu1 %v249_v26  ;;  %2200 = vmatprep.mubr.f32.mxu0 %v1652_v29  ;;  %v1685_v53 = vld [vmem:[%s3458_s1 + $0x288] sm:$0xff]  ;;  %v236_v57 = vld [vmem:[%s3458_s1 + $0x18] sm:$0xff]  ;;  %v1686_v58 = vld [vmem:[%s3458_s1 + $0x290] sm:$0xff] }
  0x14   : > { %2527 = vmatpush3.bf16.msra.mxu0 %v2524_v17  ;;  %2401 = vmatprep.subr.bf16.mxu1 %v2400_v22  ;;  %v2548_v55 = vpack.c.bf16 %v1685_v53, %v1684_v52  ;;  %v1687_v59 = vld [vmem:[%s3458_s1 + $0x298] sm:$0xff]  ;;  %v2982_v60 = vld [vmem:[%s2905_s6 + $0x21] sm:$0xff]  ;;  %v2424_v61 = vpack.c.bf16 %v236_v57, %v235_v56  ;;  %v239_v7 = vld [vmem:[%s3458_s1 + $0x30] sm:$0xff] }
  0x15   : > { %2529 = vmatprep.subr.bf16.mxu0 %v2528_v23  ;;  %v2552_v62 = vpack.c.bf16 %v1687_v59, %v1686_v58  ;;  %v237_v63 = vld [vmem:[%s3458_s1 + $0x20] sm:$0xff]  ;;  %v238_v0 = vld [vmem:[%s3458_s1 + $0x28] sm:$0xff]  ;;  %v2998_v3 = vld [vmem:[%s2905_s6 + $0x31] sm:$0xff] }
  0x16   : > { %2403 = vmatpush3.bf16.msra.mxu1 %v2400_v22  ;;  %v1688_v1 = vld [vmem:[%s3458_s1 + $0x2a0] sm:$0xff]  ;;  %v1689_v2 = vld [vmem:[%s3458_s1 + $0x2a8] sm:$0xff]  ;;  %v2428_v4 = vpack.c.bf16 %v238_v0, %v237_v63  ;;  %v240_v8 = vld [vmem:[%s3458_s1 + $0x38] sm:$0xff] }
  0x17   : > { %2405 = vmatprep.subr.bf16.mxu1 %v2404_v30  ;;  %v3001_v5 = vld [vmem:[%s2905_s6 + $0x41] sm:$0xff]  ;;  %v2556_v6 = vpack.c.bf16 %v1689_v2, %v1688_v1  ;;  %v1690_v9 = vld [vmem:[%s3458_s1 + $0x2b0] sm:$0xff]  ;;  %v1691_v10 = vld [vmem:[%s3458_s1 + $0x2b8] sm:$0xff]  ;;  %v2432_v12 = vpack.c.bf16 %v240_v8, %v239_v7 }
  0x18   : > { %2531 = vmatpush3.bf16.msra.mxu0 %v2528_v23  ;;  %v3020_v11 = vld [vmem:[%s2905_s6 + $0x51] sm:$0xff]  ;;  %v3023_v13 = vld [vmem:[%s2905_s6 + $0x61] sm:$0xff]  ;;  %v2560_v14 = vpack.c.bf16 %v1691_v10, %v1690_v9 }
  0x19   : > { %2533 = vmatprep.subr.bf16.mxu0 %v2532_v31  ;;  %v241_v15 = vld [vmem:[%s3458_s1 + $0x40] sm:$0xff]  ;;  %v242_v16 = vld [vmem:[%s3458_s1 + $0x48] sm:$0xff]  ;;  %v3042_v19 = vld [vmem:[%s2905_s6 + $0x71] sm:$0xff] }
  0x1a   : > { %2407 = vmatpush3.bf16.msra.mxu1 %v2404_v30  ;;  %v1692_v17 = vld [vmem:[%s3458_s1 + $0x2c0] sm:$0xff]  ;;  %v1693_v18 = vld [vmem:[%s3458_s1 + $0x2c8] sm:$0xff]  ;;  %v2436_v20 = vpack.c.bf16 %v242_v16, %v241_v15  ;;  %v243_v23 = vld [vmem:[%s3458_s1 + $0x50] sm:$0xff] }
  0x1b   : > { %2409 = vmatprep.subr.bf16.mxu1 %v2408_v36  ;;  %v3045_v21 = vld [vmem:[%s2905_s6 + $0x81] sm:$0xff]  ;;  %v2564_v22 = vpack.c.bf16 %v1693_v18, %v1692_v17  ;;  %v244_v24 = vld [vmem:[%s3458_s1 + $0x58] sm:$0xff]  ;;  %v1694_v25 = vld [vmem:[%s3458_s1 + $0x2d0] sm:$0xff] }
  0x1c   : > { %2535 = vmatpush3.bf16.msra.mxu0 %v2532_v31  ;;  %v1695_v26 = vld [vmem:[%s3458_s1 + $0x2d8] sm:$0xff]  ;;  %v225_v27 = vld [vmem:[%s2905_s6] sm:$0xff]  ;;  %v246_v32 = vld [vmem:[%s3458_s1 + $0x68] sm:$0xff] }
  0x1d   : > { %2537 = vmatprep.subr.bf16.mxu0 %v2536_v37  ;;  %v3065_v28 = vld [vmem:[%s2905_s6 + $0x12] sm:$0xff]  ;;  %v2568_v30 = vpack.c.bf16 %v1695_v26, %v1694_v25  ;;  %v245_v31 = vld [vmem:[%s3458_s1 + $0x60] sm:$0xff]  ;;  %v1697_v34 = vld [vmem:[%s3458_s1 + $0x2e8] sm:$0xff] }
  0x1e   : > { %2411 = vmatpush3.bf16.msra.mxu1 %v2408_v36  ;;  %v1696_v33 = vld [vmem:[%s3458_s1 + $0x2e0] sm:$0xff]  ;;  %v2444_v35 = vpack.c.bf16 %v246_v32, %v245_v31  ;;  %v248_v38 = vld [vmem:[%s3458_s1 + $0x78] sm:$0xff]  ;;  %v1698_v39 = vld [vmem:[%s3458_s1 + $0x2f0] sm:$0xff] }
  0x1f   : > { %2413 = vmatprep.subr.bf16.mxu1 %v2412_v42  ;;  %v2572_v36 = vpack.c.bf16 %v1697_v34, %v1696_v33  ;;  %v1699_v40 = vld [vmem:[%s3458_s1 + $0x2f8] sm:$0xff]  ;;  %v1613_v44 = vld [vmem:[%s3458_s1 + $0x108] sm:$0xff]  ;;  %v1708_v45 = vld [vmem:[%s3458_s1 + $0x300] sm:$0xff] }
  0x20   : > { %2539 = vmatpush3.bf16.msra.mxu0 %v2536_v37  ;;  %v247_v37 = vld [vmem:[%s3458_s1 + $0x70] sm:$0xff]  ;;  %v1709_v46 = vld [vmem:[%s3458_s1 + $0x308] sm:$0xff]  ;;  %v1615_v50 = vld [vmem:[%s3458_s1 + $0x118] sm:$0xff] }
  0x21   : > { %2541 = vmatprep.subr.bf16.mxu0 %v2540_v43  ;;  %v2448_v41 = vpack.c.bf16 %v248_v38, %v247_v37  ;;  %v1710_v51 = vld [vmem:[%s3458_s1 + $0x310] sm:$0xff]  ;;  %v1711_v52 = vld [vmem:[%s3458_s1 + $0x318] sm:$0xff]  ;;  %v1616_v57 = vld [vmem:[%s3458_s1 + $0x120] sm:$0xff] }
  0x22   : > { %2415 = vmatpush3.bf16.msra.mxu1 %v2412_v42  ;;  %v2576_v42 = vpack.c.bf16 %v1699_v40, %v1698_v39  ;;  %v3117_v53 = vld [vmem:[%s2905_s6 + $0x10] sm:$0xff]  ;;  %v2584_v56 = vpack.c.bf16 %v1711_v52, %v1710_v51  ;;  %v1617_v58 = vld [vmem:[%s3458_s1 + $0x128] sm:$0xff]  ;;  %v1712_v59 = vld [vmem:[%s3458_s1 + $0x320] sm:$0xff] }
  0x23   : > { %2417 = vmatprep.subr.bf16.mxu1 %v2416_v48  ;;  %v3140_v63 = vld [vmem:[%s2905_s6 + $0x32] sm:$0xff]  ;;  %v2460_v1 = vpack.c.bf16 %v1617_v58, %v1616_v57  ;;  %v3146_v2 = vld [vmem:[%s2905_s6 + $0x42] sm:$0xff] }
  0x24   : > { %2543 = vmatpush3.bf16.msra.mxu0 %v2540_v43  ;;  %v1612_v43 = vld [vmem:[%s3458_s1 + $0x100] sm:$0xff]  ;;  %v3143_v0 = vld [vmem:[%s2905_s6 + $0x30] sm:$0xff]  ;;  %v1619_v7 = vld [vmem:[%s3458_s1 + $0x138] sm:$0xff] }
  0x25   : > { %2545 = vmatprep.subr.bf16.mxu0 %v2544_v49  ;;  %v2452_v47 = vpack.c.bf16 %v1613_v44, %v1612_v43  ;;  %v1714_v8 = vld [vmem:[%s3458_s1 + $0x330] sm:$0xff]  ;;  %v1715_v9 = vld [vmem:[%s3458_s1 + $0x338] sm:$0xff]  ;;  %v3164_v10 = vld [vmem:[%s2905_s6 + $0x40] sm:$0xff] }
  0x26   : > { %2419 = vmatpush3.bf16.msra.mxu1 %v2416_v48  ;;  %v2580_v48 = vpack.c.bf16 %v1709_v46, %v1708_v45  ;;  %v3174_v16 = vld [vmem:[%s2905_s6 + $0x62] sm:$0xff]  ;;  %v2592_v17 = vpack.c.bf16 %v1715_v9, %v1714_v8  ;;  %v3196_v25 = vld [vmem:[%s2905_s6 + $0x72] sm:$0xff] }
  0x27   : > { %2421 = vmatprep.subr.bf16.mxu1 %v2420_v54  ;;  %v1620_v18 = vld [vmem:[%s3458_s1 + $0x140] sm:$0xff]  ;;  %v3199_v26 = vld [vmem:[%s2905_s6 + $0x70] sm:$0xff]  ;;  %v1623_v32 = vld [vmem:[%s3458_s1 + $0x158] sm:$0xff] }
  0x28   : > { %2547 = vmatpush3.bf16.msra.mxu0 %v2544_v49  ;;  %v1614_v49 = vld [vmem:[%s3458_s1 + $0x110] sm:$0xff]  ;;  %v1719_v34 = vld [vmem:[%s3458_s1 + $0x358] sm:$0xff]  ;;  %v1624_v38 = vld [vmem:[%s3458_s1 + $0x160] sm:$0xff] }
  0x29   : > { %2549 = vmatprep.subr.bf16.mxu0 %v2548_v55  ;;  %2025 = vmatmul.mubr.f32.vlgmr.msra.gmra.mrb[0].mxu1 %v1652_v29  ;;  %v2440_v29 = vpack.c.bf16 %v244_v24, %v243_v23  ;;  %v1717_v23 = vld [vmem:[%s3458_s1 + $0x348] sm:$0xff]  ;;  %v3192_v24 = vld [vmem:[%s2905_s6 + $0x60] sm:$0xff]  ;;  %v1622_v31 = vld [vmem:[%s3458_s1 + $0x150] sm:$0xff] }
  0x2a   : > { %2423 = vmatpush3.bf16.msra.mxu1 %v2420_v54  ;;  %2027 = vmatprep.mubr.f32.mxu1 %v2982_v60  ;;  %v3120_v54 = vld [vmem:[%s2905_s6 + $0x22] sm:$0xff]  ;;  %v1718_v33 = vld [vmem:[%s3458_s1 + $0x350] sm:$0xff]  ;;  %v1627_v45 = vld [vmem:[%s3458_s1 + $0x178] sm:$0xff] }
  0x2b   : > { %2201 = vmatmul.mubr.f32.vlgmr.msra.gmra.mrb[0].mxu0 %v2982_v60  ;;  %2425 = vmatprep.subr.bf16.mxu1 %v2424_v61  ;;  %v2600_v37 = vpack.c.bf16 %v1719_v34, %v1718_v33  ;;  %v1625_v39 = vld [vmem:[%s3458_s1 + $0x168] sm:$0xff]  ;;  %v1720_v40 = vld [vmem:[%s3458_s1 + $0x360] sm:$0xff]  ;;  %v1626_v44 = vld [vmem:[%s3458_s1 + $0x170] sm:$0xff] }
  0x2c   : > { %2551 = vmatpush3.bf16.msra.mxu0 %v2548_v55  ;;  %2203 = vmatprep.mubr.f32.mxu0 %v2998_v3  ;;  %v2456_v55 = vpack.c.bf16 %v1615_v50, %v1614_v49  ;;  %v1722_v46 = vld [vmem:[%s3458_s1 + $0x370] sm:$0xff]  ;;  %v1636_v50 = vld [vmem:[%s3458_s1 + $0x180] sm:$0xff]  ;;  %v1637_v51 = vld [vmem:[%s3458_s1 + $0x188] sm:$0xff] }
  0x2d   : > { %2553 = vmatprep.subr.bf16.mxu0 %v2552_v62  ;;  %2028 = vmatmul.mubr.f32.gmra.mrb[2].mxu1 %v2998_v3  ;;  %v1732_v52 = vld [vmem:[%s3458_s1 + $0x380] sm:$0xff]  ;;  %v1638_v58 = vld [vmem:[%s3458_s1 + $0x190] sm:$0xff]  ;;  %v1641_v8 = vld [vmem:[%s3458_s1 + $0x1a8] sm:$0xff] }
  0x2e   : > { %2427 = vmatpush3.bf16.msra.mxu1 %v2424_v61  ;;  %2030 = vmatprep.mubr.f32.mxu1 %v3001_v5  ;;  %v1713_v61 = vld [vmem:[%s3458_s1 + $0x328] sm:$0xff]  ;;  %v1736_v9 = vld [vmem:[%s3458_s1 + $0x3a0] sm:$0xff] }
  0x2f   : > { %2204 = vmatmul.mubr.f32.gmra.mrb[2].mxu0 %v3001_v5  ;;  %2429 = vmatprep.subr.bf16.mxu1 %v2428_v4  ;;  %v1740_v33 = vld [vmem:[%s3458_s1 + $0x3c0] sm:$0xff]  ;;  %v1741_v34 = vld [vmem:[%s3458_s1 + $0x3c8] sm:$0xff] }
  0x30   : > { %2555 = vmatpush3.bf16.msra.mxu0 %v2552_v62  ;;  %2206 = vmatprep.mubr.f32.mxu0 %v3020_v11  ;;  %v3136_v62 = vld [vmem:[%s2905_s6 + $0x20] sm:$0xff] }
  0x31   : > { %2557 = vmatprep.subr.bf16.mxu0 %v2556_v6  ;;  %2031 = vmatmul.mubr.f32.gmra.mrb[4].mxu1 %v3020_v11 }
  0x32   : > { %2431 = vmatpush3.bf16.msra.mxu1 %v2428_v4  ;;  %2033 = vmatprep.mubr.f32.mxu1 %v3023_v13  ;;  %v2588_v4 = vpack.c.bf16 %v1713_v61, %v1712_v59  ;;  %v1639_v59 = vld [vmem:[%s3458_s1 + $0x198] sm:$0xff]  ;;  %v1734_v61 = vld [vmem:[%s3458_s1 + $0x390] sm:$0xff] }
  0x33   : > { %2207 = vmatmul.mubr.f32.gmra.mrb[4].mxu0 %v3023_v13  ;;  %2433 = vmatprep.subr.bf16.mxu1 %v2432_v12 }
  0x34   : > { %2559 = vmatpush3.bf16.msra.mxu0 %v2556_v6  ;;  %2209 = vmatprep.mubr.f32.mxu0 %v3042_v19  ;;  %v1618_v6 = vld [vmem:[%s3458_s1 + $0x130] sm:$0xff] }
  0x35   : > { %2561 = vmatprep.subr.bf16.mxu0 %v2560_v14  ;;  %2034 = vmatmul.mubr.f32.gmra.mrb[6].mxu1 %v3042_v19  ;;  %v2464_v15 = vpack.c.bf16 %v1619_v7, %v1618_v6  ;;  %v1640_v7 = vld [vmem:[%s3458_s1 + $0x1a0] sm:$0xff] }
  0x36   : > { %2435 = vmatpush3.bf16.msra.mxu1 %v2432_v12  ;;  %2068 = vmatprep.mubr.f32.mxu1 %v225_v27  ;;  %v3168_v12 = vld [vmem:[%s2905_s6 + $0x52] sm:$0xff] }
  0x37   : > { %2210 = vmatmul.mubr.f32.gmra.mrb[6].mxu0 %v3045_v21  ;;  %2437 = vmatprep.subr.bf16.mxu1 %v2436_v20 }
  0x38   : > { %2563 = vmatpush3.bf16.msra.mxu0 %v2560_v14  ;;  %2244 = vmatprep.mubr.f32.mxu0 %v3065_v28  ;;  %v3171_v14 = vld [vmem:[%s2905_s6 + $0x50] sm:$0xff] }
  0x39   : > { %2565 = vmatprep.subr.bf16.mxu0 %v2564_v22 }
  0x3a   : > { %2439 = vmatpush3.bf16.msra.mxu1 %v2436_v20  ;;  %v1621_v20 = vld [vmem:[%s3458_s1 + $0x148] sm:$0xff] }
  0x3b   : > { %2441 = vmatprep.subr.bf16.mxu1 %v2440_v29  ;;  %v2468_v27 = vpack.c.bf16 %v1621_v20, %v1620_v18  ;;  %v1643_v20 = vld [vmem:[%s3458_s1 + $0x1b8] sm:$0xff] }
  0x3c   : > { %2567 = vmatpush3.bf16.msra.mxu0 %v2564_v22  ;;  %v1716_v22 = vld [vmem:[%s3458_s1 + $0x340] sm:$0xff] }
  0x3d   : > { %2569 = vmatprep.subr.bf16.mxu0 %v2568_v30 }
  0x3e   : > { %2443 = vmatpush3.bf16.msra.mxu1 %v2440_v29  ;;  %v3202_v29 = vld [vmem:[%s2905_s6 + $0x82] sm:$0xff] }
  0x3f   : > { %2445 = vmatprep.subr.bf16.mxu1 %v2444_v35 }
  0x40   : > { %2571 = vmatpush3.bf16.msra.mxu0 %v2568_v30  ;;  %v2596_v30 = vpack.c.bf16 %v1717_v23, %v1716_v22  ;;  %v1738_v22 = vld [vmem:[%s3458_s1 + $0x3b0] sm:$0xff]  ;;  %v1739_v23 = vld [vmem:[%s3458_s1 + $0x3b8] sm:$0xff] }
  0x41   : > { %2573 = vmatprep.subr.bf16.mxu0 %v2572_v36 }
  0x42   : > { %2447 = vmatpush3.bf16.msra.mxu1 %v2444_v35  ;;  %v484_v35 = vld [vmem:[%s2905_s6 + $0x2] sm:$0xff] }
  0x43   : > { %2449 = vmatprep.subr.bf16.mxu1 %v2448_v41 }
  0x44   : > { %2575 = vmatpush3.bf16.msra.mxu0 %v2572_v36  ;;  %v2472_v36 = vpack.c.bf16 %v1623_v32, %v1622_v31  ;;  %v1644_v31 = vld [vmem:[%s3458_s1 + $0x1c0] sm:$0xff]  ;;  %v1645_v32 = vld [vmem:[%s3458_s1 + $0x1c8] sm:$0xff] }
  0x45   : > { %2577 = vmatprep.subr.bf16.mxu0 %v2576_v42 }
  0x46   : > { %2451 = vmatpush3.bf16.msra.mxu1 %v2448_v41  ;;  %v1721_v41 = vld [vmem:[%s3458_s1 + $0x368] sm:$0xff] }
  0x47   : > { %2453 = vmatprep.subr.bf16.mxu1 %v2452_v47  ;;  %v2604_v43 = vpack.c.bf16 %v1721_v41, %v1720_v40  ;;  %v1647_v40 = vld [vmem:[%s3458_s1 + $0x1d8] sm:$0xff]  ;;  %v1742_v41 = vld [vmem:[%s3458_s1 + $0x3d0] sm:$0xff] }
  0x48   : > { %2579 = vmatpush3.bf16.msra.mxu0 %v2576_v42  ;;  %v2476_v42 = vpack.c.bf16 %v1625_v39, %v1624_v38  ;;  %v2628_v38 = vpack.c.bf16 %v1741_v34, %v1740_v33  ;;  %v1646_v39 = vld [vmem:[%s3458_s1 + $0x1d0] sm:$0xff] }
  0x49   : > { %2581 = vmatprep.subr.bf16.mxu0 %v2580_v48  ;;  %2069 = vmatmul.mubr.f32.vlgmr.msra.gmra.mrb[0].mxu1 %v3117_v53 }
  0x4a   : > { %2455 = vmatpush3.bf16.msra.mxu1 %v2452_v47  ;;  %2071 = vmatprep.mubr.f32.mxu1 %v3136_v62  ;;  %v1723_v47 = vld [vmem:[%s3458_s1 + $0x378] sm:$0xff] }
  0x4b   : > { %2245 = vmatmul.mubr.f32.vlgmr.msra.gmra.mrb[0].mxu0 %v3120_v54  ;;  %2457 = vmatprep.subr.bf16.mxu1 %v2456_v55  ;;  %v2608_v49 = vpack.c.bf16 %v1723_v47, %v1722_v46  ;;  %v1649_v46 = vld [vmem:[%s3458_s1 + $0x1e8] sm:$0xff]  ;;  %v1744_v47 = vld [vmem:[%s3458_s1 + $0x3e0] sm:$0xff] }
  0x4c   : > { %2583 = vmatpush3.bf16.msra.mxu0 %v2580_v48  ;;  %2247 = vmatprep.mubr.f32.mxu0 %v3140_v63  ;;  %v2480_v48 = vpack.c.bf16 %v1627_v45, %v1626_v44  ;;  %v1648_v45 = vld [vmem:[%s3458_s1 + $0x1e0] sm:$0xff] }
  0x4d   : > { %2585 = vmatprep.subr.bf16.mxu0 %v2584_v56  ;;  %2072 = vmatmul.mubr.f32.gmra.mrb[2].mxu1 %v3143_v0 }
  0x4e   : > { %2459 = vmatpush3.bf16.msra.mxu1 %v2456_v55  ;;  %2074 = vmatprep.mubr.f32.mxu1 %v3164_v10  ;;  %v1733_v55 = vld [vmem:[%s3458_s1 + $0x388] sm:$0xff] }
  0x4f   : > { %2248 = vmatmul.mubr.f32.gmra.mrb[2].mxu0 %v3146_v2  ;;  %2461 = vmatprep.subr.bf16.mxu1 %v2460_v1  ;;  %v2612_v57 = vpack.c.bf16 %v1733_v55, %v1732_v52  ;;  %v1746_v52 = vld [vmem:[%s3458_s1 + $0x3f0] sm:$0xff] }
  0x50   : > { %2587 = vmatpush3.bf16.msra.mxu0 %v2584_v56  ;;  %2250 = vmatprep.mubr.f32.mxu0 %v3168_v12  ;;  %v2484_v56 = vpack.c.bf16 %v1637_v51, %v1636_v50  ;;  %v1651_v51 = vld [vmem:[%s3458_s1 + $0x1f8] sm:$0xff] }
  0x51   : > { %2589 = vmatprep.subr.bf16.mxu0 %v2588_v4  ;;  %2075 = vmatmul.mubr.f32.gmra.mrb[4].mxu1 %v3171_v14 }
  0x52   : > { %2463 = vmatpush3.bf16.msra.mxu1 %v2460_v1  ;;  %2077 = vmatprep.mubr.f32.mxu1 %v3192_v24  ;;  %v1735_v1 = vld [vmem:[%s3458_s1 + $0x398] sm:$0xff] }
  0x53   : > { %2251 = vmatmul.mubr.f32.gmra.mrb[4].mxu0 %v3174_v16  ;;  %2465 = vmatprep.subr.bf16.mxu1 %v2464_v15  ;;  %v2616_v6 = vpack.c.bf16 %v1735_v1, %v1734_v61  ;;  %v1758_v61 = vld [vmem:[%s3458_s1 + $0x410] sm:$0xff]  ;;  %v1759_v1 = vld [vmem:[%s3458_s1 + $0x418] sm:$0xff] }
  0x54   : > { %2591 = vmatpush3.bf16.msra.mxu0 %v2588_v4  ;;  %2253 = vmatprep.mubr.f32.mxu0 %v3196_v25  ;;  %v2488_v4 = vpack.c.bf16 %v1639_v59, %v1638_v58  ;;  %v1757_v58 = vld [vmem:[%s3458_s1 + $0x408] sm:$0xff] }
  0x55   : > { %2593 = vmatprep.subr.bf16.mxu0 %v2592_v17  ;;  %2078 = vmatmul.mubr.f32.gmra.mrb[6].mxu1 %v3199_v26 }
  0x56   : > { %2467 = vmatpush3.bf16.msra.mxu1 %v2464_v15  ;;  %2112 = vmatprep.mubr.f32.mxu1 %v484_v35  ;;  %v1737_v15 = vld [vmem:[%s3458_s1 + $0x3a8] sm:$0xff]  ;;  %v3317_v35 = vld [vmem:[%s2905_s6 + $0x80] sm:$0xff] }
  0x57   : > { %2254 = vmatmul.mubr.f32.gmra.mrb[6].mxu0 %v3202_v29  ;;  %2469 = vmatprep.subr.bf16.mxu1 %v2468_v27  ;;  %v2620_v18 = vpack.c.bf16 %v1737_v15, %v1736_v9  ;;  %v1763_v9 = vld [vmem:[%s3458_s1 + $0x438] sm:$0xff]  ;;  %v1770_v15 = vld [vmem:[%s3458_s1 + $0x470] sm:$0xff] }
  0x58   : > { %2595 = vmatpush3.bf16.msra.mxu0 %v2592_v17  ;;  %2288 = vmatprep.mubr.f32.mxu0 %v3136_v62  ;;  %v2492_v17 = vpack.c.bf16 %v1641_v8, %v1640_v7  ;;  %v1761_v7 = vld [vmem:[%s3458_s1 + $0x428] sm:$0xff] }
  0x59   : > { %2597 = vmatprep.subr.bf16.mxu0 %v2596_v30 }
  0x5a   : > { %2471 = vmatpush3.bf16.msra.mxu1 %v2468_v27 }
  0x5b   : > { %2473 = vmatprep.subr.bf16.mxu1 %v2472_v36 }
  0x5c   : > { %2599 = vmatpush3.bf16.msra.mxu0 %v2596_v30  ;;  %v2624_v30 = vpack.c.bf16 %v1739_v23, %v1738_v22 }
  0x5d   : > { %2601 = vmatprep.subr.bf16.mxu0 %v2600_v37 }
  0x5e   : > { %2475 = vmatpush3.bf16.msra.mxu1 %v2472_v36  ;;  %v2500_v36 = vpack.c.bf16 %v1645_v32, %v1644_v31 }
  0x5f   : > { %2477 = vmatprep.subr.bf16.mxu1 %v2476_v42 }
  0x60   : > { %2603 = vmatpush3.bf16.msra.mxu0 %v2600_v37  ;;  %v1707_v37 = vld [vmem:[%s2905_s6 + $0x90] sm:$0xff] }
  0x61   : > { %2605 = vmatprep.subr.bf16.mxu0 %v2604_v43 }
  0x62   : > { %2479 = vmatpush3.bf16.msra.mxu1 %v2476_v42  ;;  %v1743_v42 = vld [vmem:[%s3458_s1 + $0x3d8] sm:$0xff] }
  0x63   : > { %2481 = vmatprep.subr.bf16.mxu1 %v2480_v48  ;;  %v2632_v44 = vpack.c.bf16 %v1743_v42, %v1742_v41 }
  0x64   : > { %2607 = vmatpush3.bf16.msra.mxu0 %v2604_v43  ;;  %v2504_v43 = vpack.c.bf16 %v1647_v40, %v1646_v39 }
  0x65   : > { %2609 = vmatprep.subr.bf16.mxu0 %v2608_v49 }
  0x66   : > { %2483 = vmatpush3.bf16.msra.mxu1 %v2480_v48  ;;  %v1745_v48 = vld [vmem:[%s3458_s1 + $0x3e8] sm:$0xff] }
  0x67   : > { %2485 = vmatprep.subr.bf16.mxu1 %v2484_v56  ;;  %v2636_v50 = vpack.c.bf16 %v1745_v48, %v1744_v47 }
  0x68   : > { %2611 = vmatpush3.bf16.msra.mxu0 %v2608_v49  ;;  %v2508_v49 = vpack.c.bf16 %v1649_v46, %v1648_v45 }
  0x69   : > { %2613 = vmatprep.subr.bf16.mxu0 %v2612_v57  ;;  %2113 = vmatmul.mubr.f32.vlgmr.msra.gmra.mrb[0].mxu1 %v3065_v28  ;;  %v1642_v28 = vld [vmem:[%s3458_s1 + $0x1b0] sm:$0xff] }
  0x6a   : > { %2487 = vmatpush3.bf16.msra.mxu1 %v2484_v56  ;;  %2115 = vmatprep.mubr.f32.mxu1 %v3120_v54  ;;  %v2496_v27 = vpack.c.bf16 %v1643_v20, %v1642_v28 }
  0x6b   : > { %2289 = vmatmul.mubr.f32.vlgmr.msra.gmra.mrb[0].mxu0 %v3143_v0  ;;  %2489 = vmatprep.subr.bf16.mxu1 %v2488_v4 }
  0x6c   : > { %2615 = vmatpush3.bf16.msra.mxu0 %v2612_v57  ;;  %2291 = vmatprep.mubr.f32.mxu0 %v3164_v10  ;;  %v1756_v57 = vld [vmem:[%s3458_s1 + $0x400] sm:$0xff] }
  0x6d   : > { %2617 = vmatprep.subr.bf16.mxu0 %v2616_v6  ;;  %2116 = vmatmul.mubr.f32.gmra.mrb[2].mxu1 %v3140_v63  ;;  %v2644_v59 = vpack.c.bf16 %v1757_v58, %v1756_v57 }
  0x6e   : > { %2491 = vmatpush3.bf16.msra.mxu1 %v2488_v4  ;;  %2118 = vmatprep.mubr.f32.mxu1 %v3146_v2  ;;  %v2648_v4 = vpack.c.bf16 %v1759_v1, %v1758_v61 }
  0x6f   : > { %2292 = vmatmul.mubr.f32.gmra.mrb[2].mxu0 %v3171_v14  ;;  %2493 = vmatprep.subr.bf16.mxu1 %v2492_v17 }
  0x70   : > { %2619 = vmatpush3.bf16.msra.mxu0 %v2616_v6  ;;  %2294 = vmatprep.mubr.f32.mxu0 %v3192_v24  ;;  %v1760_v6 = vld [vmem:[%s3458_s1 + $0x420] sm:$0xff] }
  0x71   : > { %2621 = vmatprep.subr.bf16.mxu0 %v2620_v18  ;;  %2119 = vmatmul.mubr.f32.gmra.mrb[4].mxu1 %v3168_v12  ;;  %v2652_v8 = vpack.c.bf16 %v1761_v7, %v1760_v6 }
  0x72   : > { %2495 = vmatpush3.bf16.msra.mxu1 %v2492_v17  ;;  %2121 = vmatprep.mubr.f32.mxu1 %v3174_v16  ;;  %v1771_v17 = vld [vmem:[%s3458_s1 + $0x478] sm:$0xff] }
  0x73   : > { %2295 = vmatmul.mubr.f32.gmra.mrb[4].mxu0 %v3199_v26  ;;  %2497 = vmatprep.subr.bf16.mxu1 %v2496_v27 }
  0x74   : > { %2623 = vmatpush3.bf16.msra.mxu0 %v2620_v18  ;;  %2297 = vmatprep.mubr.f32.mxu0 %v3317_v35 }
  0x75   : > { %2625 = vmatprep.subr.bf16.mxu0 %v2624_v30  ;;  %2122 = vmatmul.mubr.f32.gmra.mrb[6].mxu1 %v3196_v25 }
  0x76   : > { %2499 = vmatpush3.bf16.msra.mxu1 %v2496_v27  ;;  %2156 = vmatprep.mubr.f32.mxu1 %v3117_v53  ;;  %v1650_v53 = vld [vmem:[%s3458_s1 + $0x1f0] sm:$0xff] }
  0x77   : > { %2298 = vmatmul.mubr.f32.gmra.mrb[6].mxu0 %v1707_v37  ;;  %2501 = vmatprep.subr.bf16.mxu1 %v2500_v36  ;;  %v2512_v55 = vpack.c.bf16 %v1651_v51, %v1650_v53 }
  0x78   : > { %2627 = vmatpush3.bf16.msra.mxu0 %v2624_v30  ;;  %2332 = vmatprep.mubr.f32.mxu0 %v2982_v60  ;;  %v1747_v60 = vld [vmem:[%s3458_s1 + $0x3f8] sm:$0xff] }
  0x79   : > { %2629 = vmatprep.subr.bf16.mxu0 %v2628_v38  ;;  %v2640_v56 = vpack.c.bf16 %v1747_v60, %v1746_v52 }
  0x7a   : > { %2503 = vmatpush3.bf16.msra.mxu1 %v2500_v36 }
  0x7b   : > { %2505 = vmatprep.subr.bf16.mxu1 %v2504_v43 }
  0x7c   : > { %2631 = vmatpush3.bf16.msra.mxu0 %v2628_v38 }
  0x7d   : > { %2633 = vmatprep.subr.bf16.mxu0 %v2632_v44 }
  0x7e   : > { %2507 = vmatpush3.bf16.msra.mxu1 %v2504_v43 }
  0x7f   : > { %2509 = vmatprep.subr.bf16.mxu1 %v2508_v49 }
  0x80   : > { %2635 = vmatpush3.bf16.msra.mxu0 %v2632_v44 }
  0x81   : > { %2637 = vmatprep.subr.bf16.mxu0 %v2636_v50 }
  0x82   : > { %2511 = vmatpush3.bf16.msra.mxu1 %v2508_v49 }
  0x83   : > { %2513 = vmatprep.subr.bf16.mxu1 %v2512_v55 }
  0x84   : > { %2639 = vmatpush3.bf16.msra.mxu0 %v2636_v50 }
  0x85   : > { %2641 = vmatprep.subr.bf16.mxu0 %v2640_v56 }
  0x86   : > { %2515 = vmatpush3.bf16.msra.mxu1 %v2512_v55 }
  0x87   : > { %2676 = vmatprep.subr.bf16.mxu1 %v2644_v59 }
  0x88   : > { %2643 = vmatpush3.bf16.msra.mxu0 %v2640_v56 }
  0x89   : > { %2645 = vmatprep.subr.bf16.mxu0 %v2644_v59  ;;  %2157 = vmatmul.mubr.f32.vlgmr.msra.gmra.mrb[0].mxu1 %v3136_v62  ;;  %v1762_v62 = vld [vmem:[%s3458_s1 + $0x430] sm:$0xff] }
  0x8a   : > { %2684 = vmatpush3.bf16.msra.mxu1 %v2644_v59  ;;  %2159 = vmatprep.mubr.f32.mxu1 %v3143_v0  ;;  %v1765_v0 = vld [vmem:[%s3458_s1 + $0x448] sm:$0xff] }
  0x8b   : > { %2333 = vmatmul.mubr.f32.vlgmr.msra.gmra.mrb[0].mxu0 %v2998_v3  ;;  %2677 = vmatprep.subr.bf16.mxu1 %v2648_v4  ;;  %v2656_v3 = vpack.c.bf16 %v1763_v9, %v1762_v62 }
  0x8c   : > { %2647 = vmatpush3.bf16.msra.mxu0 %v2644_v59  ;;  %2335 = vmatprep.mubr.f32.mxu0 %v3001_v5  ;;  %v1764_v5 = vld [vmem:[%s3458_s1 + $0x440] sm:$0xff] }
  0x8d   : > { %2649 = vmatprep.subr.bf16.mxu0 %v2648_v4  ;;  %2160 = vmatmul.mubr.f32.gmra.mrb[2].mxu1 %v3164_v10  ;;  %v1766_v10 = vld [vmem:[%s3458_s1 + $0x450] sm:$0xff] }
  0x8e   : > { %2685 = vmatpush3.bf16.msra.mxu1 %v2648_v4  ;;  %2162 = vmatprep.mubr.f32.mxu1 %v3171_v14  ;;  %v1767_v14 = vld [vmem:[%s3458_s1 + $0x458] sm:$0xff] }
  0x8f   : > { %2336 = vmatmul.mubr.f32.gmra.mrb[2].mxu0 %v3020_v11  ;;  %2678 = vmatprep.subr.bf16.mxu1 %v2652_v8  ;;  %v1731_v11 = vld [vmem:[%s2905_s6 + $0x91] sm:$0xff] }
  0x90   : > { %2651 = vmatpush3.bf16.msra.mxu0 %v2648_v4  ;;  %2338 = vmatprep.mubr.f32.mxu0 %v3023_v13  ;;  %v2660_v13 = vpack.c.bf16 %v1765_v0, %v1764_v5 }
  0x91   : > { %2653 = vmatprep.subr.bf16.mxu0 %v2652_v8  ;;  %2163 = vmatmul.mubr.f32.gmra.mrb[4].mxu1 %v3192_v24  ;;  %v1769_v24 = vld [vmem:[%s3458_s1 + $0x468] sm:$0xff] }
  0x92   : > { %2686 = vmatpush3.bf16.msra.mxu1 %v2652_v8  ;;  %2165 = vmatprep.mubr.f32.mxu1 %v3199_v26 }
  0x93   : > { %2339 = vmatmul.mubr.f32.gmra.mrb[4].mxu0 %v3042_v19  ;;  %2679 = vmatprep.subr.bf16.mxu1 %v2656_v3  ;;  %v2664_v19 = vpack.c.bf16 %v1767_v14, %v1766_v10 }
  0x94   : > { %2655 = vmatpush3.bf16.msra.mxu0 %v2652_v8  ;;  %2341 = vmatprep.mubr.f32.mxu0 %v3045_v21  ;;  %v1768_v21 = vld [vmem:[%s3458_s1 + $0x460] sm:$0xff] }
  0x95   : > { %2657 = vmatprep.subr.bf16.mxu0 %v2656_v3  ;;  %2166 = vmatmul.mubr.f32.gmra.mrb[6].mxu1 %v3317_v35  ;;  %v2668_v26 = vpack.c.bf16 %v1769_v24, %v1768_v21 }
  0x96   : > { %2687 = vmatpush3.bf16.msra.mxu1 %v2656_v3  ;;  %2382 = vmatprep.mubr.f32.mxu1 %v3174_v16  ;;  %v1755_v16 = vld [vmem:[%s2905_s6 + $0x92] sm:$0xff]  ;;  %s1479_s6 = sld [smem:[#allocation2]] }
  0x97   : > { %2342 = vmatmul.mubr.f32.gmra.mrb[6].mxu0 %v1731_v11  ;;  %2680 = vmatprep.subr.bf16.mxu1 %v2660_v13 }
  0x98   : > { %2659 = vmatpush3.bf16.msra.mxu0 %v2656_v3  ;;  %2376 = vmatprep.mubr.f32.mxu0 %v3120_v54  ;;  %v2672_v54 = vpack.c.bf16 %v1771_v17, %v1770_v15 }
  0x99   : > { %2661 = vmatprep.subr.bf16.mxu0 %v2660_v13 }
  0x9a   : > { %2688 = vmatpush3.bf16.msra.mxu1 %v2660_v13 }
  0x9b   : > { %2681 = vmatprep.subr.bf16.mxu1 %v2664_v19 }
  0x9c   : > { %2663 = vmatpush3.bf16.msra.mxu0 %v2660_v13  ;;  %v1480_v46 = vstv %s1479_s6 }
  0x9d   : > { %2665 = vmatprep.subr.bf16.mxu0 %v2664_v19 }
  0x9e   : > { %2689 = vmatpush3.bf16.msra.mxu1 %v2664_v19 }
  0x9f   : > { %2682 = vmatprep.subr.bf16.mxu1 %v2668_v26 }
  0xa0   : > { %2667 = vmatpush3.bf16.msra.mxu0 %v2664_v19 }
  0xa1   : > { %2669 = vmatprep.subr.bf16.mxu0 %v2668_v26 }
  0xa2   : > { %2690 = vmatpush3.bf16.msra.mxu1 %v2668_v26 }
  0xa3   : > { %2683 = vmatprep.subr.bf16.mxu1 %v2672_v54 }
  0xa4   : > { %2671 = vmatpush3.bf16.msra.mxu0 %v2668_v26 }
  0xa5   : > { %2673 = vmatprep.subr.bf16.mxu0 %v2672_v54 }
  0xa6   : > { %2691 = vmatpush3.bf16.msra.mxu1 %v2672_v54 }
  0xa8   : > { %2675 = vmatpush3.bf16.msra.mxu0 %v2672_v54 }
  0xa9   : > { %2383 = vmatmul.mubr.f32.vlgmr.msra.gmra.mrb[8].mxu1 %v3196_v25 }
  0xaa   : > { %2385 = vmatprep.mubr.f32.mxu1 %v3202_v29 }
  0xab   : > { %2377 = vmatmul.mubr.f32.vlgmr.msra.gmra.mrb[0].mxu0 %v3140_v63 }
  0xac   : > { %2379 = vmatprep.mubr.f32.mxu0 %v3146_v2 }
  0xad   : > { %2386 = vmatmul.mubr.f32.gmra.mrb[10].mxu1 %v1755_v16 }
  0xaf   : > { %2380 = vmatmul.mubr.f32.gmra.mrb[2].mxu0 %v3168_v12  ;;  %v1772_v12 = vld [vmem:[%s3459_s2] ss:$0 sm:$0xff] }
 0x15c   : > { %v2158_v18 = vpop.f32.mrb[0].mxu1 }
 0x15d   : > { %v716_v28 = vpop.f32.mrb[1].mxu1 }
 0x160   : > { %v2161_v20 = vpop.f32.mrb[2].mxu1 }
 0x161   : > { %v726_v22 = vpop.f32.mrb[3].mxu1 }
 0x164   : > { %v2164_v23 = vpop.f32.mrb[4].mxu1 }
 0x165   : > { %v736_v30 = vpop.f32.mrb[5].mxu1 }
 0x166   : > { %v2340_v27 = vpop.f32.mrb[4].mxu0 }
 0x167   : > { %v2696_v31 = vadd.f32 %v2340_v27, %v2164_v23  ;;  %v1291_v32 = vpop.f32.mrb[5].mxu0 }
 0x168   : > { %v2698_v25 = vadd.f32 %v1291_v32, %v736_v30  ;;  %v2167_v63 = vpop.f32.mrb[6].mxu1 }
 0x169   : > { %v746_v29 = vpop.f32.mrb[7].mxu1 }
 0x16a   : > { %v2343_v33 = vpop.f32.mrb[6].mxu0 }
 0x16b   : > { %v2700_v34 = vadd.f32 %v2343_v33, %v2167_v63  ;;  %v1301_v35 = vpop.f32.mrb[7].mxu0 }
 0x16c   : > { %v2702_v2 = vadd.f32 %v1301_v35, %v746_v29 }
 0x17c   : > { %v2384_v36 = vpop.f32.mrb[8].mxu1 }
 0x17d   : > { %v2697_v38 = vadd.f32 %v2696_v31, %v2384_v36  ;;  %v1429_v39 = vpop.f32.mrb[9].mxu1 }
 0x17e   : > { %v2378_v37 = vpop.f32.mrb[0].mxu0  ;;  %v2699_v42 = vadd.f32 %v2698_v25, %v1429_v39 }
 0x17f   : > { %v2692_v40 = vadd.f32 %v2378_v37, %v2158_v18  ;;  %v1409_v41 = vpop.f32.mrb[1].mxu0  ;;  %v1468_v43 = vadd.f32 %v2697_v38, %v1772_v12 }
 0x180   : > { %v2693_v44 = vadd.f32 %v1409_v41, %v716_v28  ;;  %v1467_v47 = vadd.f32 %v2699_v42, %v1772_v12  ;;  %v2387_v48 = vpop.f32.mrb[10].mxu1 }
 0x181   : > { %v1464_v45 = vadd.f32 %v2692_v40, %v1772_v12  ;;  %v1476_v49 = vmax.f32 %v1468_v43, 0.0  ;;  %v2701_v51 = vadd.f32 %v2700_v34, %v2387_v48  ;;  %v1439_v52 = vpop.f32.mrb[11].mxu1 }
 0x182   : > { %v1463_v50 = vadd.f32 %v2693_v44, %v1772_v12  ;;  %v2381_v53 = vpop.f32.mrb[2].mxu0  ;;  %v1475_v55 = vmax.f32 %v1467_v47, 0.0  ;;  %v2703_v58 = vadd.f32 %v2702_v2, %v1439_v52 }
 0x183   : > { %v1472_v60 = vmax.f32 %v1464_v45, 0.0  ;;  %v2694_v56 = vadd.f32 %v2381_v53, %v2161_v20  ;;  %v1419_v57 = vpop.f32.mrb[3].mxu0  ;;  %v1486_v59 = vmin.f32 %v1476_v49, %v1480_v46  ;;  %v1470_v1 = vadd.f32 %v2701_v51, %v1772_v12 }
 0x184   : > { %v1471_v61 = vmax.f32 %v1463_v50, 0.0  ;;  %v2695_v4 = vadd.f32 %v1419_v57, %v726_v22  ;;  %v1485_v7 = vmin.f32 %v1475_v55, %v1480_v46  ;;  %v1469_v62 = vadd.f32 %v2703_v58, %v1772_v12 }
 0x185   : > { %v1482_v6 = vmin.f32 %v1472_v60, %v1480_v46  ;;  %v1466_v8 = vadd.f32 %v2694_v56, %v1772_v12  ;;  %1494 = vst [vmem:[%s3438_s29 + $0x28] sm:$0xff] %v1486_v59  ;;  %v1478_v3 = vmax.f32 %v1470_v1, 0.0 }
 0x186   : > { %v1481_v9 = vmin.f32 %v1471_v61, %v1480_v46  ;;  %v1465_v5 = vadd.f32 %v2695_v4, %v1772_v12  ;;  %1493 = vst [vmem:[%s3438_s29 + $0x20] sm:$0xff] %v1485_v7  ;;  %v1477_v11 = vmax.f32 %v1469_v62, 0.0 }
 0x187   : > { %1490 = vst [vmem:[%s3438_s29 + $0x8] sm:$0xff] %v1482_v6  ;;  %v1474_v0 = vmax.f32 %v1466_v8, 0.0  ;;  %v1488_v13 = vmin.f32 %v1478_v3, %v1480_v46 }
 0x188   : > { %1489 = vst [vmem:[%s3438_s29] sm:$0xff] %v1481_v9  ;;  %v1473_v10 = vmax.f32 %v1465_v5, 0.0  ;;  %v1487_v19 = vmin.f32 %v1477_v11, %v1480_v46 }
 0x189   : > { %v1484_v14 = vmin.f32 %v1474_v0, %v1480_v46  ;;  %1496 = vst [vmem:[%s3438_s29 + $0x38] sm:$0xff] %v1488_v13 }
 0x18a   : > { %v1483_v21 = vmin.f32 %v1473_v10, %v1480_v46  ;;  %1495 = vst [vmem:[%s3438_s29 + $0x30] sm:$0xff] %v1487_v19 }
 0x18b   : > { %1492 = vst [vmem:[%s3438_s29 + $0x18] sm:$0xff] %v1484_v14 }
 0x18c   : > { %1491 = vst [vmem:[%s3438_s29 + $0x10] sm:$0xff] %v1483_v21 }
 0x18d PF: > { %s15_s19 = sadd.s32 1, %s2803_s19   ;;  %s3462_s17 = smov %s2799_s18 }
 0x18e   : > { %p12_p5 = scmp.ge.s32.totalorder %s15_s19, 4   ;;  %s3463_s18 = smov %s3465_s3 }
 0x190   :  { %14 = sbr.rel (!%p12_p5) target bundleno = 2 (0x2), region = 77 }

</bundles_post_ra>
